<compile_context>
chip_gen: v7x
topology: tpu7x:2x2x1
jax: 0.10.0
libtpu: 0.0.40
codegen_flags: <defaults>
</compile_context>

<pallas_src>
import functools

import jax
import jax.numpy as jnp
from jax.experimental import pallas as pl
from jax.experimental.pallas import tpu as pltpu

_EPS = 1e-5
# Sublane-aligned column offset at which the image sits inside the halo
# scratch; the 3x3 taps read columns _PAD_OFF-1 .. _PAD_OFF+W.
_PAD_OFF = 8


# --------------------------- kernel building blocks --------------------------

def _fill_halo(pad_ref, img, H, W):
    """Zero only the halo strips and place `img` (H, W, C) at the aligned offset.

    Strips: row 0, row H+1 (full width) and the two 8-wide column bands that
    contain the left/right halo columns.  All stores are sublane-aligned
    (requires W % 8 == 0).  No full-scratch memset, no program_id gating.
    """
    Wp = pad_ref.shape[1]
    C = pad_ref.shape[2]
    zrow = jnp.zeros((Wp, C), pad_ref.dtype)
    zcol = jnp.zeros((H, _PAD_OFF, C), pad_ref.dtype)
    pad_ref[0] = zrow
    pad_ref[H + 1] = zrow
    pad_ref[1:H + 1, 0:_PAD_OFF, :] = zcol
    pad_ref[1:H + 1, _PAD_OFF + W:_PAD_OFF + W + _PAD_OFF, :] = zcol
    pad_ref[1:H + 1, _PAD_OFF:_PAD_OFF + W, :] = img.astype(pad_ref.dtype)


def _conv3x3_bn_relu(pad_ref, w_ref, s_ref, b_ref, H, W, Cin, Cout):
    """3x3 conv (stride 1, pad 1) + fused BN affine + ReLU.

    Builds an im2col operand (H*W, 9*Cin) by lane-concatenating the 9 shifted
    patches of the halo scratch, then runs ONE bf16 MXU matmul against the
    (9*Cin, Cout) weight.  Returns the activation as (H*W, Cout) f32.
    """
    patches = []
    for dh in range(3):
        for dw in range(3):
            c0 = _PAD_OFF - 1 + dw
            patches.append(pad_ref[dh:dh + H, c0:c0 + W, :])
    col = jnp.concatenate(patches, axis=-1).reshape(H * W, 9 * Cin)
    acc = jnp.dot(col.astype(jnp.bfloat16), w_ref[...],
                  preferred_element_type=jnp.float32)
    return jnp.maximum(acc * s_ref[...] + b_ref[...], 0.0)


# --------------------------- fused block kernels -----------------------------

def _encoder_block_pool_kernel(x_ref, w1_ref, s1_ref, b1_ref, w2_ref, s2_ref,
                               b2_ref, pool_ref, save_ref,
                               xpad_ref, hpad_ref, *, H, W, Cin, Cout):
    Ho, Wo = H // 2, W // 2
    # conv1 + bn1 + relu (halo built in VMEM, strip-only zeroing)
    _fill_halo(xpad_ref, x_ref[0], H, W)
    h1 = _conv3x3_bn_relu(xpad_ref, w1_ref, s1_ref, b1_ref, H, W, Cin, Cout)
    # conv2 + bn2 + relu; intermediate never leaves VMEM
    _fill_halo(hpad_ref, h1.reshape(H, W, Cout), H, W)
    h2 = _conv3x3_bn_relu(hpad_ref, w2_ref, s2_ref, b2_ref, H, W, Cout, Cout)
    save_ref[0] = h2.reshape(H, W, Cout).astype(save_ref.dtype)
    # register-resident 2x2 maxpool (no store->reload, no strided ds reads)
    h2r = h2.reshape(H, Wo, 2, Cout)
    mw = jnp.maximum(h2r[:, :, 0, :], h2r[:, :, 1, :])       # (H, Wo, Cout)
    mwr = mw.reshape(Ho, 2, Wo, Cout)
    mp = jnp.maximum(mwr[:, 0, :, :], mwr[:, 1, :, :])       # (Ho, Wo, Cout)
    pool_ref[0] = mp.astype(pool_ref.dtype)


def _encoder_block_up_kernel(x_ref, w1_ref, s1_ref, b1_ref, w2_ref, s2_ref,
                             b2_ref, wt_ref, bt_ref, o_ref,
                             xpad_ref, hpad_ref, *, H, W, Cin, Cout, Ctc):
    _fill_halo(xpad_ref, x_ref[0], H, W)
    h1 = _conv3x3_bn_relu(xpad_ref, w1_ref, s1_ref, b1_ref, H, W, Cin, Cout)
    _fill_halo(hpad_ref, h1.reshape(H, W, Cout), H, W)
    h2 = _conv3x3_bn_relu(hpad_ref, w2_ref, s2_ref, b2_ref, H, W, Cout, Cout)
    # ConvTranspose2d(k=2, s=2): one matmul per di with (dj, c) packed on the
    # lane axis; output laid out as (H, 2, W, 2*Ctc) so that the host-side
    # (N, 2H, 2W, Ctc) is a free row-major reshape.
    h2b = h2.astype(jnp.bfloat16)
    for di in range(2):
        y = jnp.dot(h2b, wt_ref[di], preferred_element_type=jnp.float32) + bt_ref[...]
        o_ref[0, :, di, :, :] = y.reshape(H, W, 2 * Ctc).astype(o_ref.dtype)


# --------------------------- wrappers ----------------------------------------

def _rep_spec(shape):
    # replicated (weight-like) input: same block for every grid step
    return pl.BlockSpec(shape, lambda n, _nd=len(shape): (0,) * _nd)


_COMPILER_PARAMS = pltpu.CompilerParams(
    dimension_semantics=("parallel",),        # v7x: 2 TCs split the batch grid
    vmem_limit_bytes=32 * 1024 * 1024,
)


def encoder_block_pool(x, p):
    """EncoderBlock(is_final=False) on NHWC input: returns (pooled, out_save)."""
    N, H, W, Cin = x.shape
    Cout = p['w1'].shape[-1]
    assert H % 2 == 0 and W % 2 == 0 and W % 8 == 0, (H, W)
    Ho, Wo = H // 2, W // 2
    w1p = p['w1'].reshape(9 * Cin, Cout).astype(jnp.bfloat16)
    w2p = p['w2'].reshape(9 * Cout, Cout).astype(jnp.bfloat16)
    kern = functools.partial(_encoder_block_pool_kernel,
                             H=H, W=W, Cin=Cin, Cout=Cout)
    return pl.pallas_call(
        kern,
        out_shape=(jax.ShapeDtypeStruct((N, Ho, Wo, Cout), x.dtype),
                   jax.ShapeDtypeStruct((N, H, W, Cout), x.dtype)),
        grid=(N,),
        in_specs=[
            pl.BlockSpec((1, H, W, Cin), lambda n: (n, 0, 0, 0)),
            _rep_spec((9 * Cin, Cout)),
            _rep_spec((1, Cout)), _rep_spec((1, Cout)),
            _rep_spec((9 * Cout, Cout)),
            _rep_spec((1, Cout)), _rep_spec((1, Cout)),
        ],
        out_specs=(pl.BlockSpec((1, Ho, Wo, Cout), lambda n: (n, 0, 0, 0)),
                   pl.BlockSpec((1, H, W, Cout), lambda n: (n, 0, 0, 0))),
        scratch_shapes=[
            pltpu.VMEM((H + 2, W + 2 * _PAD_OFF, Cin), jnp.float32),
            pltpu.VMEM((H + 2, W + 2 * _PAD_OFF, Cout), jnp.float32),
        ],
        compiler_params=_COMPILER_PARAMS,
    )(x, w1p, p['s1'], p['b1'], w2p, p['s2'], p['b2'])


def encoder_block_up(x, p):
    """EncoderBlock(is_final=True) on NHWC input: returns the trans_conv output."""
    N, H, W, Cin = x.shape
    Cout = p['w1'].shape[-1]
    Ctc = p['wt'].shape[-1]                    # == block in_channels
    assert W % 8 == 0, (H, W)
    w1p = p['w1'].reshape(9 * Cin, Cout).astype(jnp.bfloat16)
    w2p = p['w2'].reshape(9 * Cout, Cout).astype(jnp.bfloat16)
    # (di, dj, ci, co) -> (di, ci, dj, co) -> (2, Cout, 2*Ctc)
    wtp = (p['wt'].transpose(0, 2, 1, 3)
                 .reshape(2, Cout, 2 * Ctc).astype(jnp.bfloat16))
    btp = jnp.tile(p['bt'], (1, 2))            # (1, 2*Ctc): [b, b]
    kern = functools.partial(_encoder_block_up_kernel,
                             H=H, W=W, Cin=Cin, Cout=Cout, Ctc=Ctc)
    out = pl.pallas_call(
        kern,
        out_shape=jax.ShapeDtypeStruct((N, H, 2, W, 2 * Ctc), x.dtype),
        grid=(N,),
        in_specs=[
            pl.BlockSpec((1, H, W, Cin), lambda n: (n, 0, 0, 0)),
            _rep_spec((9 * Cin, Cout)),
            _rep_spec((1, Cout)), _rep_spec((1, Cout)),
            _rep_spec((9 * Cout, Cout)),
            _rep_spec((1, Cout)), _rep_spec((1, Cout)),
            _rep_spec((2, Cout, 2 * Ctc)),
            _rep_spec((1, 2 * Ctc)),
        ],
        out_specs=pl.BlockSpec((1, H, 2, W, 2 * Ctc), lambda n: (n, 0, 0, 0, 0)),
        scratch_shapes=[
            pltpu.VMEM((H + 2, W + 2 * _PAD_OFF, Cin), jnp.float32),
            pltpu.VMEM((H + 2, W + 2 * _PAD_OFF, Cout), jnp.float32),
        ],
        compiler_params=_COMPILER_PARAMS,
    )(x, w1p, p['s1'], p['b1'], w2p, p['s2'], p['b2'], wtp, btp)
    # (N, H, 2, W, 2*Ctc) -> (N, 2H, 2W, Ctc) is a free row-major reshape.
    return out.reshape(N, 2 * H, 2 * W, Ctc)


@functools.partial(jax.jit, static_argnames=("is_final",))
def encoder_block_forward(x_nchw, params, is_final=False):
    # NCHW <-> NHWC only at the module boundary; chain blocks in NHWC directly.
    x = jnp.transpose(x_nchw, (0, 2, 3, 1))
    if is_final:
        out = encoder_block_up(x, params)
        return jnp.transpose(out, (0, 3, 1, 2))
    out, save = encoder_block_pool(x, params)
    return (jnp.transpose(out, (0, 3, 1, 2)),
            jnp.transpose(save, (0, 3, 1, 2)))


# --------------------------- parameters --------------------------------------

def init_params(key, in_channels, out_channels, is_final=False):
    keys = iter(jax.random.split(key, 8))

    def conv_w(cin, cout, k):
        # PyTorch Conv2d default init: U(+-1/sqrt(fan_in)), generated directly
        # in (k, k, cin, cout) layout.
        bound = 1.0 / float(cin * k * k) ** 0.5
        return jax.random.uniform(next(keys), (k, k, cin, cout),
                                  jnp.float32, -bound, bound)

    def bn_scale_shift(c):
        gamma = jnp.ones((c,), jnp.float32)
        beta = jnp.zeros((c,), jnp.float32)
        mean = jnp.zeros((c,), jnp.float32)
        var = jnp.ones((c,), jnp.float32)
        scale = gamma / jnp.sqrt(var + _EPS)
        return scale.reshape(1, c), (beta - mean * scale).reshape(1, c)

    p = {'w1': conv_w(in_channels, out_channels, 3),
         'w2': conv_w(out_channels, out_channels, 3)}
    p['s1'], p['b1'] = bn_scale_shift(out_channels)
    p['s2'], p['b2'] = bn_scale_shift(out_channels)
    if is_final:
        # ConvTranspose2d(out_channels -> in_channels, k=2, s=2), default init;
        # weight stored as (di, dj, c_in(=out_channels), c_out(=in_channels)).
        bound = 1.0 / float(in_channels * 4) ** 0.5
        p['wt'] = jax.random.uniform(next(keys), (2, 2, out_channels, in_channels),
                                     jnp.float32, -bound, bound)
        p['bt'] = jax.random.uniform(next(keys), (1, in_channels),
                                     jnp.float32, -bound, bound)
    return p


# --------------------------- main ---------------------------------------------

if __name__ == "__main__":
    key = jax.random.PRNGKey(0)
    kp, ku, kx = jax.random.split(key, 3)
    N, Cin, Cout, H, W = 2, 4, 16, 16, 16
    x = jax.random.normal(kx, (N, Cin, H, W), jnp.float32)

    # EncoderBlock(4, 16, is_final=False): returns (maxpooled out, out_save)
    p_pool = init_params(kp, Cin, Cout, is_final=False)
    out, out_save = encoder_block_forward(x, p_pool, is_final=False)
    out, out_save = jax.block_until_ready((out, out_save))
    assert out.shape == (N, Cout, H // 2, W // 2), out.shape
    assert out_save.shape == (N, Cout, H, W), out_save.shape

    # EncoderBlock(4, 16, is_final=True): returns the trans_conv output only
    p_up = init_params(ku, Cin, Cout, is_final=True)
    up = encoder_block_forward(x, p_up, is_final=True)
    up = jax.block_until_ready(up)
    assert up.shape == (N, Cin, 2 * H, 2 * W), up.shape

    assert bool(jnp.all(jnp.isfinite(out)))
    assert bool(jnp.all(jnp.isfinite(out_save)))
    assert bool(jnp.all(jnp.isfinite(up)))
    print("KERNEL_OK")
</pallas_src>

<mosaic_0001>
module attributes {stable_mosaic.version = 11 : i64} {
  func.func @_encoder_block_pool_kernel(%arg0: i32, %arg1: memref<1x16x16x4xf32, #tpu.memory_space<vmem>>, %arg2: memref<36x16xbf16, #tpu.memory_space<vmem>>, %arg3: memref<1x16xf32, #tpu.memory_space<vmem>>, %arg4: memref<1x16xf32, #tpu.memory_space<vmem>>, %arg5: memref<144x16xbf16, #tpu.memory_space<vmem>>, %arg6: memref<1x16xf32, #tpu.memory_space<vmem>>, %arg7: memref<1x16xf32, #tpu.memory_space<vmem>>, %arg8: memref<1x8x8x16xf32, #tpu.memory_space<vmem>>, %arg9: memref<1x16x16x16xf32, #tpu.memory_space<vmem>>, %arg10: memref<18x32x4xf32, #tpu.memory_space<vmem>>, %arg11: memref<18x32x16xf32, #tpu.memory_space<vmem>>) attributes {dimension_semantics = [#tpu.dimension_semantics<parallel>], iteration_bounds = array<i64: 2>, scalar_prefetch = 0 : i64, scratch_operands = 2 : i64, tpu.core_type = #tpu.core_type<tc>, window_params = [{transform_indices = @transform_0, window_bounds = array<i64: 1, 16, 16, 4>}, {pipeline_mode = #tpu.pipeline_mode<synchronous>, transform_indices = @transform_1, window_bounds = array<i64: 36, 16>}, {pipeline_mode = #tpu.pipeline_mode<synchronous>, transform_indices = @transform_2, window_bounds = array<i64: 1, 16>}, {pipeline_mode = #tpu.pipeline_mode<synchronous>, transform_indices = @transform_3, window_bounds = array<i64: 1, 16>}, {pipeline_mode = #tpu.pipeline_mode<synchronous>, transform_indices = @transform_4, window_bounds = array<i64: 144, 16>}, {pipeline_mode = #tpu.pipeline_mode<synchronous>, transform_indices = @transform_5, window_bounds = array<i64: 1, 16>}, {pipeline_mode = #tpu.pipeline_mode<synchronous>, transform_indices = @transform_6, window_bounds = array<i64: 1, 16>}, {transform_indices = @transform_7, window_bounds = array<i64: 1, 8, 8, 16>}, {transform_indices = @transform_8, window_bounds = array<i64: 1, 16, 16, 16>}]} {
    %c0 = arith.constant 0 : index
    %c0_0 = arith.constant 0 : index
    %c0_1 = arith.constant 0 : index
    %c0_2 = arith.constant 0 : index
    %0 = vector.load %arg1[%c0, %c0_0, %c0_1, %c0_2] : memref<1x16x16x4xf32, #tpu.memory_space<vmem>>, vector<1x16x16x4xf32>
    %1 = vector.shape_cast %0 : vector<1x16x16x4xf32> to vector<16x16x4xf32>
    %cst = arith.constant 0.000000e+00 : f32
    %2 = vector.broadcast %cst : f32 to vector<32x4xf32>
    %cst_3 = arith.constant 0.000000e+00 : f32
    %3 = vector.broadcast %cst_3 : f32 to vector<16x8x4xf32>
    %c0_4 = arith.constant 0 : index
    %c0_5 = arith.constant 0 : index
    %c0_6 = arith.constant 0 : index
    %4 = vector.load %arg10[%c0_4, %c0_5, %c0_6] : memref<18x32x4xf32, #tpu.memory_space<vmem>>, vector<1x32x4xf32>
    %5 = vector.shape_cast %4 : vector<1x32x4xf32> to vector<32x4xf32>
    %6 = vector.shape_cast %2 : vector<32x4xf32> to vector<1x32x4xf32>
    tpu.vector_store %arg10[%c0_4, %c0_5, %c0_6], %6 {strides = array<i32>} : memref<18x32x4xf32, #tpu.memory_space<vmem>>, vector<1x32x4xf32>,
    %c17 = arith.constant 17 : index
    %c0_7 = arith.constant 0 : index
    %c0_8 = arith.constant 0 : index
    %7 = vector.load %arg10[%c17, %c0_7, %c0_8] : memref<18x32x4xf32, #tpu.memory_space<vmem>>, vector<1x32x4xf32>
    %8 = vector.shape_cast %7 : vector<1x32x4xf32> to vector<32x4xf32>
    %9 = vector.shape_cast %2 : vector<32x4xf32> to vector<1x32x4xf32>
    tpu.vector_store %arg10[%c17, %c0_7, %c0_8], %9 {strides = array<i32>} : memref<18x32x4xf32, #tpu.memory_space<vmem>>, vector<1x32x4xf32>,
    %c1 = arith.constant 1 : index
    %c0_9 = arith.constant 0 : index
    %c0_10 = arith.constant 0 : index
    %10 = vector.load %arg10[%c1, %c0_9, %c0_10] : memref<18x32x4xf32, #tpu.memory_space<vmem>>, vector<16x8x4xf32>
    tpu.vector_store %arg10[%c1, %c0_9, %c0_10], %3 {strides = array<i32>} : memref<18x32x4xf32, #tpu.memory_space<vmem>>, vector<16x8x4xf32>,
    %c1_11 = arith.constant 1 : index
    %c24 = arith.constant 24 : index
    %c0_12 = arith.constant 0 : index
    %11 = vector.load %arg10[%c1_11, %c24, %c0_12] : memref<18x32x4xf32, #tpu.memory_space<vmem>>, vector<16x8x4xf32>
    tpu.vector_store %arg10[%c1_11, %c24, %c0_12], %3 {strides = array<i32>} : memref<18x32x4xf32, #tpu.memory_space<vmem>>, vector<16x8x4xf32>,
    %c1_13 = arith.constant 1 : index
    %c8 = arith.constant 8 : index
    %c0_14 = arith.constant 0 : index
    %12 = vector.load %arg10[%c1_13, %c8, %c0_14] : memref<18x32x4xf32, #tpu.memory_space<vmem>>, vector<16x16x4xf32>
    tpu.vector_store %arg10[%c1_13, %c8, %c0_14], %1 {strides = array<i32>} : memref<18x32x4xf32, #tpu.memory_space<vmem>>, vector<16x16x4xf32>,
    %c0_15 = arith.constant 0 : index
    %c7 = arith.constant 7 : index
    %c0_16 = arith.constant 0 : index
    %13 = vector.load %arg10[%c0_15, %c7, %c0_16] : memref<18x32x4xf32, #tpu.memory_space<vmem>>, vector<16x16x4xf32>
    %c0_17 = arith.constant 0 : index
    %c8_18 = arith.constant 8 : index
    %c0_19 = arith.constant 0 : index
    %14 = vector.load %arg10[%c0_17, %c8_18, %c0_19] : memref<18x32x4xf32, #tpu.memory_space<vmem>>, vector<16x16x4xf32>
    %c0_20 = arith.constant 0 : index
    %c9 = arith.constant 9 : index
    %c0_21 = arith.constant 0 : index
    %15 = vector.load %arg10[%c0_20, %c9, %c0_21] : memref<18x32x4xf32, #tpu.memory_space<vmem>>, vector<16x16x4xf32>
    %c1_22 = arith.constant 1 : index
    %c7_23 = arith.constant 7 : index
    %c0_24 = arith.constant 0 : index
    %16 = vector.load %arg10[%c1_22, %c7_23, %c0_24] : memref<18x32x4xf32, #tpu.memory_space<vmem>>, vector<16x16x4xf32>
    %c1_25 = arith.constant 1 : index
    %c8_26 = arith.constant 8 : index
    %c0_27 = arith.constant 0 : index
    %17 = vector.load %arg10[%c1_25, %c8_26, %c0_27] : memref<18x32x4xf32, #tpu.memory_space<vmem>>, vector<16x16x4xf32>
    %c1_28 = arith.constant 1 : index
    %c9_29 = arith.constant 9 : index
    %c0_30 = arith.constant 0 : index
    %18 = vector.load %arg10[%c1_28, %c9_29, %c0_30] : memref<18x32x4xf32, #tpu.memory_space<vmem>>, vector<16x16x4xf32>
    %c2 = arith.constant 2 : index
    %c7_31 = arith.constant 7 : index
    %c0_32 = arith.constant 0 : index
    %19 = vector.load %arg10[%c2, %c7_31, %c0_32] : memref<18x32x4xf32, #tpu.memory_space<vmem>>, vector<16x16x4xf32>
    %c2_33 = arith.constant 2 : index
    %c8_34 = arith.constant 8 : index
    %c0_35 = arith.constant 0 : index
    %20 = vector.load %arg10[%c2_33, %c8_34, %c0_35] : memref<18x32x4xf32, #tpu.memory_space<vmem>>, vector<16x16x4xf32>
    %c2_36 = arith.constant 2 : index
    %c9_37 = arith.constant 9 : index
    %c0_38 = arith.constant 0 : index
    %21 = vector.load %arg10[%c2_36, %c9_37, %c0_38] : memref<18x32x4xf32, #tpu.memory_space<vmem>>, vector<16x16x4xf32>
    %22 = tpu.concatenate %13, %14, %15, %16, %17, %18, %19, %20, %21 in 2 : vector<16x16x4xf32>, vector<16x16x4xf32>, vector<16x16x4xf32>, vector<16x16x4xf32>, vector<16x16x4xf32>, vector<16x16x4xf32>, vector<16x16x4xf32>, vector<16x16x4xf32>, vector<16x16x4xf32> -> vector<16x16x36xf32>
    %23 = vector.shape_cast %22 : vector<16x16x36xf32> to vector<256x36xf32>
    %24 = arith.truncf %23 : vector<256x36xf32> to vector<256x36xbf16>
    %c0_39 = arith.constant 0 : index
    %c0_40 = arith.constant 0 : index
    %25 = vector.load %arg2[%c0_39, %c0_40] : memref<36x16xbf16, #tpu.memory_space<vmem>>, vector<36x16xbf16>
    %cst_41 = arith.constant dense<0.000000e+00> : vector<256x16xf32>
    %26 = tpu.matmul %24, %25, %cst_41 {dimension_numbers = #tpu.dot_dimension_numbers<[1], [0], [0], [1], [0, 0, 1, 1], [], []>} : vector<256x36xbf16>, vector<36x16xbf16>, vector<256x16xf32> -> vector<256x16xf32>
    %c0_42 = arith.constant 0 : index
    %c0_43 = arith.constant 0 : index
    %27 = vector.load %arg3[%c0_42, %c0_43] : memref<1x16xf32, #tpu.memory_space<vmem>>, vector<1x16xf32>
    %28 = vector.broadcast %27 : vector<1x16xf32> to vector<256x16xf32>
    %29 = arith.mulf %26, %28 : vector<256x16xf32>
    %c0_44 = arith.constant 0 : index
    %c0_45 = arith.constant 0 : index
    %30 = vector.load %arg4[%c0_44, %c0_45] : memref<1x16xf32, #tpu.memory_space<vmem>>, vector<1x16xf32>
    %31 = vector.broadcast %30 : vector<1x16xf32> to vector<256x16xf32>
    %32 = arith.addf %29, %31 : vector<256x16xf32>
    %cst_46 = arith.constant 0.000000e+00 : f32
    %33 = vector.broadcast %cst_46 : f32 to vector<256x16xf32>
    %34 = arith.maximumf %32, %33 : vector<256x16xf32>
    %35 = vector.shape_cast %34 : vector<256x16xf32> to vector<16x16x16xf32>
    %cst_47 = arith.constant 0.000000e+00 : f32
    %36 = vector.broadcast %cst_47 : f32 to vector<32x16xf32>
    %cst_48 = arith.constant 0.000000e+00 : f32
    %37 = vector.broadcast %cst_48 : f32 to vector<16x8x16xf32>
    %c0_49 = arith.constant 0 : index
    %c0_50 = arith.constant 0 : index
    %c0_51 = arith.constant 0 : index
    %38 = vector.load %arg11[%c0_49, %c0_50, %c0_51] : memref<18x32x16xf32, #tpu.memory_space<vmem>>, vector<1x32x16xf32>
    %39 = vector.shape_cast %38 : vector<1x32x16xf32> to vector<32x16xf32>
    %40 = vector.shape_cast %36 : vector<32x16xf32> to vector<1x32x16xf32>
    tpu.vector_store %arg11[%c0_49, %c0_50, %c0_51], %40 {strides = array<i32>} : memref<18x32x16xf32, #tpu.memory_space<vmem>>, vector<1x32x16xf32>,
    %c17_52 = arith.constant 17 : index
    %c0_53 = arith.constant 0 : index
    %c0_54 = arith.constant 0 : index
    %41 = vector.load %arg11[%c17_52, %c0_53, %c0_54] : memref<18x32x16xf32, #tpu.memory_space<vmem>>, vector<1x32x16xf32>
    %42 = vector.shape_cast %41 : vector<1x32x16xf32> to vector<32x16xf32>
    %43 = vector.shape_cast %36 : vector<32x16xf32> to vector<1x32x16xf32>
    tpu.vector_store %arg11[%c17_52, %c0_53, %c0_54], %43 {strides = array<i32>} : memref<18x32x16xf32, #tpu.memory_space<vmem>>, vector<1x32x16xf32>,
    %c1_55 = arith.constant 1 : index
    %c0_56 = arith.constant 0 : index
    %c0_57 = arith.constant 0 : index
    %44 = vector.load %arg11[%c1_55, %c0_56, %c0_57] : memref<18x32x16xf32, #tpu.memory_space<vmem>>, vector<16x8x16xf32>
    tpu.vector_store %arg11[%c1_55, %c0_56, %c0_57], %37 {strides = array<i32>} : memref<18x32x16xf32, #tpu.memory_space<vmem>>, vector<16x8x16xf32>,
    %c1_58 = arith.constant 1 : index
    %c24_59 = arith.constant 24 : index
    %c0_60 = arith.constant 0 : index
    %45 = vector.load %arg11[%c1_58, %c24_59, %c0_60] : memref<18x32x16xf32, #tpu.memory_space<vmem>>, vector<16x8x16xf32>
    tpu.vector_store %arg11[%c1_58, %c24_59, %c0_60], %37 {strides = array<i32>} : memref<18x32x16xf32, #tpu.memory_space<vmem>>, vector<16x8x16xf32>,
    %c1_61 = arith.constant 1 : index
    %c8_62 = arith.constant 8 : index
    %c0_63 = arith.constant 0 : index
    %46 = vector.load %arg11[%c1_61, %c8_62, %c0_63] : memref<18x32x16xf32, #tpu.memory_space<vmem>>, vector<16x16x16xf32>
    tpu.vector_store %arg11[%c1_61, %c8_62, %c0_63], %35 {strides = array<i32>} : memref<18x32x16xf32, #tpu.memory_space<vmem>>, vector<16x16x16xf32>,
    %c0_64 = arith.constant 0 : index
    %c7_65 = arith.constant 7 : index
    %c0_66 = arith.constant 0 : index
    %47 = vector.load %arg11[%c0_64, %c7_65, %c0_66] : memref<18x32x16xf32, #tpu.memory_space<vmem>>, vector<16x16x16xf32>
    %c0_67 = arith.constant 0 : index
    %c8_68 = arith.constant 8 : index
    %c0_69 = arith.constant 0 : index
    %48 = vector.load %arg11[%c0_67, %c8_68, %c0_69] : memref<18x32x16xf32, #tpu.memory_space<vmem>>, vector<16x16x16xf32>
    %c0_70 = arith.constant 0 : index
    %c9_71 = arith.constant 9 : index
    %c0_72 = arith.constant 0 : index
    %49 = vector.load %arg11[%c0_70, %c9_71, %c0_72] : memref<18x32x16xf32, #tpu.memory_space<vmem>>, vector<16x16x16xf32>
    %c1_73 = arith.constant 1 : index
    %c7_74 = arith.constant 7 : index
    %c0_75 = arith.constant 0 : index
    %50 = vector.load %arg11[%c1_73, %c7_74, %c0_75] : memref<18x32x16xf32, #tpu.memory_space<vmem>>, vector<16x16x16xf32>
    %c1_76 = arith.constant 1 : index
    %c8_77 = arith.constant 8 : index
    %c0_78 = arith.constant 0 : index
    %51 = vector.load %arg11[%c1_76, %c8_77, %c0_78] : memref<18x32x16xf32, #tpu.memory_space<vmem>>, vector<16x16x16xf32>
    %c1_79 = arith.constant 1 : index
    %c9_80 = arith.constant 9 : index
    %c0_81 = arith.constant 0 : index
    %52 = vector.load %arg11[%c1_79, %c9_80, %c0_81] : memref<18x32x16xf32, #tpu.memory_space<vmem>>, vector<16x16x16xf32>
    %c2_82 = arith.constant 2 : index
    %c7_83 = arith.constant 7 : index
    %c0_84 = arith.constant 0 : index
    %53 = vector.load %arg11[%c2_82, %c7_83, %c0_84] : memref<18x32x16xf32, #tpu.memory_space<vmem>>, vector<16x16x16xf32>
    %c2_85 = arith.constant 2 : index
    %c8_86 = arith.constant 8 : index
    %c0_87 = arith.constant 0 : index
    %54 = vector.load %arg11[%c2_85, %c8_86, %c0_87] : memref<18x32x16xf32, #tpu.memory_space<vmem>>, vector<16x16x16xf32>
    %c2_88 = arith.constant 2 : index
    %c9_89 = arith.constant 9 : index
    %c0_90 = arith.constant 0 : index
    %55 = vector.load %arg11[%c2_88, %c9_89, %c0_90] : memref<18x32x16xf32, #tpu.memory_space<vmem>>, vector<16x16x16xf32>
    %56 = tpu.concatenate %47, %48, %49, %50, %51, %52, %53, %54, %55 in 2 : vector<16x16x16xf32>, vector<16x16x16xf32>, vector<16x16x16xf32>, vector<16x16x16xf32>, vector<16x16x16xf32>, vector<16x16x16xf32>, vector<16x16x16xf32>, vector<16x16x16xf32>, vector<16x16x16xf32> -> vector<16x16x144xf32>
    %57 = vector.shape_cast %56 : vector<16x16x144xf32> to vector<256x144xf32>
    %58 = arith.truncf %57 : vector<256x144xf32> to vector<256x144xbf16>
    %c0_91 = arith.constant 0 : index
    %c0_92 = arith.constant 0 : index
    %59 = vector.load %arg5[%c0_91, %c0_92] : memref<144x16xbf16, #tpu.memory_space<vmem>>, vector<144x16xbf16>
    %cst_93 = arith.constant dense<0.000000e+00> : vector<256x16xf32>
    %60 = tpu.matmul %58, %59, %cst_93 {dimension_numbers = #tpu.dot_dimension_numbers<[1], [0], [0], [1], [0, 0, 1, 1], [], []>} : vector<256x144xbf16>, vector<144x16xbf16>, vector<256x16xf32> -> vector<256x16xf32>
    %c0_94 = arith.constant 0 : index
    %c0_95 = arith.constant 0 : index
    %61 = vector.load %arg6[%c0_94, %c0_95] : memref<1x16xf32, #tpu.memory_space<vmem>>, vector<1x16xf32>
    %62 = vector.broadcast %61 : vector<1x16xf32> to vector<256x16xf32>
    %63 = arith.mulf %60, %62 : vector<256x16xf32>
    %c0_96 = arith.constant 0 : index
    %c0_97 = arith.constant 0 : index
    %64 = vector.load %arg7[%c0_96, %c0_97] : memref<1x16xf32, #tpu.memory_space<vmem>>, vector<1x16xf32>
    %65 = vector.broadcast %64 : vector<1x16xf32> to vector<256x16xf32>
    %66 = arith.addf %63, %65 : vector<256x16xf32>
    %cst_98 = arith.constant 0.000000e+00 : f32
    %67 = vector.broadcast %cst_98 : f32 to vector<256x16xf32>
    %68 = arith.maximumf %66, %67 : vector<256x16xf32>
    %69 = vector.shape_cast %68 : vector<256x16xf32> to vector<16x16x16xf32>
    %c0_99 = arith.constant 0 : index
    %c0_100 = arith.constant 0 : index
    %c0_101 = arith.constant 0 : index
    %c0_102 = arith.constant 0 : index
    %70 = vector.load %arg9[%c0_99, %c0_100, %c0_101, %c0_102] : memref<1x16x16x16xf32, #tpu.memory_space<vmem>>, vector<1x16x16x16xf32>
    %71 = vector.shape_cast %70 : vector<1x16x16x16xf32> to vector<16x16x16xf32>
    %72 = vector.shape_cast %69 : vector<16x16x16xf32> to vector<1x16x16x16xf32>
    tpu.vector_store %arg9[%c0_99, %c0_100, %c0_101, %c0_102], %72 {strides = array<i32>} : memref<1x16x16x16xf32, #tpu.memory_space<vmem>>, vector<1x16x16x16xf32>,
    %73 = vector.shape_cast %68 : vector<256x16xf32> to vector<16x8x2x16xf32>
    %74 = vector.extract_strided_slice %73 {offsets = [0, 0, 0, 0], sizes = [16, 8, 1, 16], strides = [1, 1, 1, 1]} : vector<16x8x2x16xf32> to vector<16x8x1x16xf32>
    %75 = vector.shape_cast %74 : vector<16x8x1x16xf32> to vector<16x8x16xf32>
    %76 = vector.extract_strided_slice %73 {offsets = [0, 0, 1, 0], sizes = [16, 8, 1, 16], strides = [1, 1, 1, 1]} : vector<16x8x2x16xf32> to vector<16x8x1x16xf32>
    %77 = vector.shape_cast %76 : vector<16x8x1x16xf32> to vector<16x8x16xf32>
    %78 = arith.maximumf %75, %77 : vector<16x8x16xf32>
    %79 = vector.shape_cast %78 : vector<16x8x16xf32> to vector<8x2x8x16xf32>
    %80 = vector.extract_strided_slice %79 {offsets = [0, 0, 0, 0], sizes = [8, 1, 8, 16], strides = [1, 1, 1, 1]} : vector<8x2x8x16xf32> to vector<8x1x8x16xf32>
    %81 = vector.shape_cast %80 : vector<8x1x8x16xf32> to vector<8x8x16xf32>
    %82 = vector.extract_strided_slice %79 {offsets = [0, 1, 0, 0], sizes = [8, 1, 8, 16], strides = [1, 1, 1, 1]} : vector<8x2x8x16xf32> to vector<8x1x8x16xf32>
    %83 = vector.shape_cast %82 : vector<8x1x8x16xf32> to vector<8x8x16xf32>
    %84 = arith.maximumf %81, %83 : vector<8x8x16xf32>
    %c0_103 = arith.constant 0 : index
    %c0_104 = arith.constant 0 : index
    %c0_105 = arith.constant 0 : index
    %c0_106 = arith.constant 0 : index
    %85 = vector.load %arg8[%c0_103, %c0_104, %c0_105, %c0_106] : memref<1x8x8x16xf32, #tpu.memory_space<vmem>>, vector<1x8x8x16xf32>
    %86 = vector.shape_cast %85 : vector<1x8x8x16xf32> to vector<8x8x16xf32>
    %87 = vector.shape_cast %84 : vector<8x8x16xf32> to vector<1x8x8x16xf32>
    tpu.vector_store %arg8[%c0_103, %c0_104, %c0_105, %c0_106], %87 {strides = array<i32>} : memref<1x8x8x16xf32, #tpu.memory_space<vmem>>, vector<1x8x8x16xf32>,
    return
  }
  func.func @transform_0(%arg0: i32) -> (i32, i32, i32, i32) {
    %c0_i32 = arith.constant 0 : i32
    %c0_i32_0 = arith.constant 0 : i32
    %c0_i32_1 = arith.constant 0 : i32
    %c0_i32_2 = arith.constant 0 : i32
    return %arg0, %c0_i32, %c0_i32_0, %c0_i32_1 : i32, i32, i32, i32
  }
  func.func @transform_1(%arg0: i32) -> (i32, i32) {
    %c0_i32 = arith.constant 0 : i32
    %c0_i32_0 = arith.constant 0 : i32
    %c0_i32_1 = arith.constant 0 : i32
    return %c0_i32, %c0_i32_0 : i32, i32
  }
  func.func @transform_2(%arg0: i32) -> (i32, i32) {
    %c0_i32 = arith.constant 0 : i32
    %c0_i32_0 = arith.constant 0 : i32
    %c0_i32_1 = arith.constant 0 : i32
    return %c0_i32, %c0_i32_0 : i32, i32
  }
  func.func @transform_3(%arg0: i32) -> (i32, i32) {
    %c0_i32 = arith.constant 0 : i32
    %c0_i32_0 = arith.constant 0 : i32
    %c0_i32_1 = arith.constant 0 : i32
    return %c0_i32, %c0_i32_0 : i32, i32
  }
  func.func @transform_4(%arg0: i32) -> (i32, i32) {
    %c0_i32 = arith.constant 0 : i32
    %c0_i32_0 = arith.constant 0 : i32
    %c0_i32_1 = arith.constant 0 : i32
    return %c0_i32, %c0_i32_0 : i32, i32
  }
  func.func @transform_5(%arg0: i32) -> (i32, i32) {
    %c0_i32 = arith.constant 0 : i32
    %c0_i32_0 = arith.constant 0 : i32
    %c0_i32_1 = arith.constant 0 : i32
    return %c0_i32, %c0_i32_0 : i32, i32
  }
  func.func @transform_6(%arg0: i32) -> (i32, i32) {
    %c0_i32 = arith.constant 0 : i32
    %c0_i32_0 = arith.constant 0 : i32
    %c0_i32_1 = arith.constant 0 : i32
    return %c0_i32, %c0_i32_0 : i32, i32
  }
  func.func @transform_7(%arg0: i32) -> (i32, i32, i32, i32) {
    %c0_i32 = arith.constant 0 : i32
    %c0_i32_0 = arith.constant 0 : i32
    %c0_i32_1 = arith.constant 0 : i32
    %c0_i32_2 = arith.constant 0 : i32
    return %arg0, %c0_i32, %c0_i32_0, %c0_i32_1 : i32, i32, i32, i32
  }
  func.func @transform_8(%arg0: i32) -> (i32, i32, i32, i32) {
    %c0_i32 = arith.constant 0 : i32
    %c0_i32_0 = arith.constant 0 : i32
    %c0_i32_1 = arith.constant 0 : i32
    %c0_i32_2 = arith.constant 0 : i32
    return %arg0, %c0_i32, %c0_i32_0, %c0_i32_1 : i32, i32, i32, i32
  }
}

</mosaic_0001>

<bundles_post_ra>
// kernel: encoder_block_forward.1
= control target key start
LH: loop header
LB: loop body
LE: loop exit
PB: predicated region body
PF: predicated region fallthrough
CT: control target
= control target key end

     0   :  { %14 = vsyncpa [#allocation5], 0  ;;  %s10555_s0 = inlined_call_operand.vmem [shape: f32[2,16,16,4], index: 0, kind: input, shape index: {}]   ;;  %s10556_s1 = inlined_call_operand.vmem [shape: bf16[36,16], index: 1, kind: input, shape index: {}]   ;;  %s10557_s2 = inlined_call_operand.vmem [shape: f32[1,16], index: 2, kind: input, shape index: {}]   ;;  %s10558_s3 = inlined_call_operand.vmem [shape: f32[1,16], index: 3, kind: input, shape index: {}]   ;;  %s10559_s4 = inlined_call_operand.vmem [shape: bf16[144,16], index: 4, kind: input, shape index: {}]   ;;  %s10560_s5 = inlined_call_operand.vmem [shape: f32[1,16], index: 5, kind: input, shape index: {}]   ;;  %s10561_s6 = inlined_call_operand.vmem [shape: f32[1,16], index: 6, kind: input, shape index: {}]   ;;  %s10562_s7 = inlined_call_operand.hbm [shape: f32[2,8,8,16], index: 7, kind: output, shape index: {0}]   ;;  %s10563_s8 = inlined_call_operand.vmem [shape: f32[2,16,16,16], index: 8, kind: output, shape index: {1}]  }
   0x1   :  { %16 = vsyncpa [#allocation5 + $0x1], 0  ;;  %s7774_s27 = smov 0   ;;  %s7776_s28 = smov 0  }
   0x2   :  { %s7778_s29 = smov 0   ;;  %s7780_s30 = smov 0  }
   0x3 LB: > { %s7795_s9 = sadd.s32 4294967295, %s7709_s30   ;;  %s6092_s10 = sadd.s32 4294967294, %s7709_s30   ;;  %s7709_s30 = sphi %s7780_s30, %s10647_s30   ;;  %s7705_s29 = sphi %s7778_s29, %s10646_s29   ;;  %s7701_s28 = sphi %s7776_s28, %s10645_s28   ;;  %s7697_s27 = sphi %s7774_s27, %s10644_s27  }
   0x4   : > { %s7799_s11 = sadd.s32 1, %s7709_s30   ;;  %s181_s12 = sadd.s32 1, %s7705_s29 }
   0x5   : > { %s178_s13 = ssub.s32 %s7709_s30, %s7799_s11  ;;  %p191_p0 = scmp.ne.s32.totalorder %s7705_s29, %s7701_s28 }
   0x6   : > { %p179_p1 = scmp.eq.s32.totalorder %s178_s13, 0  ;;  %p192_p2 = scmp.eq.s32.totalorder %s7795_s9, 1 }
   0x7   : > { %p197_p3 = scmp.ne.s32.totalorder %s7701_s28, %s7697_s27  ;;  %p198_p4 = scmp.eq.s32.totalorder %s6092_s10, 1 }
   0x8   : > { %s7810_s14 = scalar_select %p179_p1, %s7705_s29, %s181_s12  }
   0x9   : > { %p7812_p5 = por %p192_p2, %p191_p0  ;;  %p7816_p6 = por %p198_p4, %p197_p3 }
   0xa   : > { %p6095_p7 = scmp.ge.s32.totalorder %s7709_s30, 1  ;;  %p268_p8 = scmp.lt.s32.totalorder %s7709_s30, 3 }
   0xc   : > { %p269_p9 = pnand %p6095_p7, %p268_p8 }
   0xe   : > { %272 = sbr.rel (%p269_p9) target bundleno = 1166 (0x48e), region = 48 }
  0x15   : > { %vm350_vm0 = vcmask 31744   ;;  %p307_p10 = scmp.lt.s32.totalorder %s7795_s9, 1  ;;  %v7711_v0 = vmov 0.0   ;;  %s7712_s22 = smov 4   ;;  %vm1836_vm1 = vcmask 130048   ;;  %vm2086_vm2 = vcmask 1041408  }
  0x16   : > { %352 = vst.msk [vmem:[#allocation2 + $0x8] sm:$0xff] %vm350_vm0, %v7711_v0  ;;  %353 = vst.msk [vmem:[#allocation2 + $0x10] sm:$0xff] %vm350_vm0, %v7711_v0  ;;  %s10584_s23 = smov 8   ;;  %s7714_s24 = smov 12   ;;  %vm1770_vm3 = vcmask 64512   ;;  %vm1803_vm4 = vcmask 97280  }
  0x17   : > { %351 = vst.msk [vmem:[#allocation2] sm:$0xff] %vm350_vm0, %v7711_v0  ;;  %354 = vst.msk [vmem:[#allocation2 + $0x18] sm:$0xff] %vm350_vm0, %v7711_v0  ;;  %s7906_s17 = scalar_select %p307_p10, %s7795_s9, 1  ;;  %vm1869_vm5 = vcmask 162816   ;;  %vm1902_vm6 = vcmask 195584   ;;  %vm1935_vm7 = vcmask 228352  }
  0x18   : > { %356 = vst.msk [vmem:[#allocation2 + $0x220] sm:$0xff] %vm350_vm0, %v7711_v0  ;;  %357 = vst.msk [vmem:[#allocation2 + $0x228] sm:$0xff] %vm350_vm0, %v7711_v0  ;;  %s7715_s25 = smov 16   ;;  %s7716_s19 = smov 20   ;;  %vm1968_vm8 = vcmask 261120   ;;  %vm2037_vm9 = vcmask 293888  }
  0x19   : > { %358 = vst.msk [vmem:[#allocation2 + $0x230] sm:$0xff] %vm350_vm0, %v7711_v0  ;;  %359 = vst.msk [vmem:[#allocation2 + $0x238] sm:$0xff] %vm350_vm0, %v7711_v0  ;;  %s6282_s18 = sshll.u32 %s7906_s17, 8  ;;  %s7719_s26 = smov 32   ;;  %vm3684_vm10 = vcmask 392192   ;;  %vm3717_vm11 = vcmask 523264  }
  0x1a   : > { %361 = vst.msk [vmem:[#allocation2 + $0x20] sm:$0xff] %vm350_vm0, %v7711_v0  ;;  %362 = vst.msk [vmem:[#allocation2 + $0x40] sm:$0xff] %vm350_vm0, %v7711_v0  ;;  %s7914_s21 = scalar_lea.vmem %s10555_s0, %s6282_s18  ;;  %s7721_s13 = smov 96   ;;  %vm3750_vm12 = vcmask 654336   ;;  %vm3783_vm13 = vcmask 785408   ;;  %vm3816_vm14 = vcmask 916480  }
  0x1b   : > { %363 = vst.msk [vmem:[#allocation2 + $0x60] sm:$0xff] %vm350_vm0, %v7711_v0  ;;  %364 = vst.msk [vmem:[#allocation2 + $0x80] sm:$0xff] %vm350_vm0, %v7711_v0  ;;  %v320_v1 = vld [vmem:[%s7914_s21 + $0x10] sm:$0xff]  ;;  %v321_v2 = vld [vmem:[%s7914_s21 + $0x18] sm:$0xff]  ;;  %s7723_s10 = smov 48   ;;  %s7724_s20 = smov 64  }
  0x1c   : > { %365 = vst.msk [vmem:[#allocation2 + $0xa0] sm:$0xff] %vm350_vm0, %v7711_v0  ;;  %366 = vst.msk [vmem:[#allocation2 + $0xc0] sm:$0xff] %vm350_vm0, %v7711_v0  ;;  %v318_v3 = vld [vmem:[%s7914_s21] sm:$0xff]  ;;  %v319_v4 = vld [vmem:[%s7914_s21 + $0x8] sm:$0xff]  ;;  %s7725_s12 = smov 80   ;;  %vm5904_vm15 = vcmask 1041409  }
  0x1d   : > { %367 = vst.msk [vmem:[#allocation2 + $0xe0] sm:$0xff] %vm350_vm0, %v7711_v0  ;;  %368 = vst.msk [vmem:[#allocation2 + $0x100] sm:$0xff] %vm350_vm0, %v7711_v0  ;;  %v322_v5 = vld [vmem:[%s7914_s21 + $0x20] sm:$0xff]  ;;  %v323_v6 = vld [vmem:[%s7914_s21 + $0x28] sm:$0xff]  ;;  %s297_s17 = sand.u32 1, %s7701_s28  }
  0x1e   : > { %369 = vst.msk [vmem:[#allocation2 + $0x120] sm:$0xff] %vm350_vm0, %v7711_v0  ;;  %370 = vst.msk [vmem:[#allocation2 + $0x140] sm:$0xff] %vm350_vm0, %v7711_v0  ;;  %v457_v7 = vld [vmem:[#allocation2 + $0x8] sm:$0xff]  ;;  %v458_v8 = vld [vmem:[#allocation2 + $0x10] sm:$0xff] }
  0x1f   : > { %371 = vst.msk [vmem:[#allocation2 + $0x160] sm:$0xff] %vm350_vm0, %v7711_v0  ;;  %372 = vst.msk [vmem:[#allocation2 + $0x180] sm:$0xff] %vm350_vm0, %v7711_v0  ;;  %v324_v9 = vld [vmem:[%s7914_s21 + $0x30] sm:$0xff]  ;;  %v6417_v10 = vpack.i.bf16 %v458_v8, %v457_v7  ;;  %v325_v11 = vld [vmem:[%s7914_s21 + $0x38] sm:$0xff] }
  0x20   : > { %373 = vst.msk [vmem:[#allocation2 + $0x1a0] sm:$0xff] %vm350_vm0, %v7711_v0  ;;  %374 = vst.msk [vmem:[#allocation2 + $0x1c0] sm:$0xff] %vm350_vm0, %v7711_v0  ;;  %v326_v12 = vld [vmem:[%s7914_s21 + $0x40] sm:$0xff]  ;;  %v327_v13 = vld [vmem:[%s7914_s21 + $0x48] sm:$0xff] }
  0x21   : > { %375 = vst.msk [vmem:[#allocation2 + $0x1e0] sm:$0xff] %vm350_vm0, %v7711_v0  ;;  %376 = vst.msk [vmem:[#allocation2 + $0x200] sm:$0xff] %vm350_vm0, %v7711_v0  ;;  %v328_v14 = vld [vmem:[%s7914_s21 + $0x50] sm:$0xff]  ;;  %v329_v15 = vld [vmem:[%s7914_s21 + $0x58] sm:$0xff]  ;;  %6418 = vrot.lane.b32.xlu0 %v6417_v10, %s7712_s22 }
  0x22   : > { %377 = vst.msk [vmem:[#allocation2 + $0x38] sm:$0xff] %vm350_vm0, %v7711_v0  ;;  %378 = vst.msk [vmem:[#allocation2 + $0x58] sm:$0xff] %vm350_vm0, %v7711_v0  ;;  %v330_v16 = vld [vmem:[%s7914_s21 + $0x60] sm:$0xff]  ;;  %v331_v17 = vld [vmem:[%s7914_s21 + $0x68] sm:$0xff] }
  0x23   : > { %379 = vst.msk [vmem:[#allocation2 + $0x78] sm:$0xff] %vm350_vm0, %v7711_v0  ;;  %380 = vst.msk [vmem:[#allocation2 + $0x98] sm:$0xff] %vm350_vm0, %v7711_v0  ;;  %v332_v18 = vld [vmem:[%s7914_s21 + $0x70] sm:$0xff]  ;;  %v333_v19 = vld [vmem:[%s7914_s21 + $0x78] sm:$0xff] }
  0x24   : > { %381 = vst.msk [vmem:[#allocation2 + $0xb8] sm:$0xff] %vm350_vm0, %v7711_v0  ;;  %382 = vst.msk [vmem:[#allocation2 + $0xd8] sm:$0xff] %vm350_vm0, %v7711_v0  ;;  %v334_v20 = vld [vmem:[%s7914_s21 + $0x80] sm:$0xff]  ;;  %v335_v21 = vld [vmem:[%s7914_s21 + $0x88] sm:$0xff] }
  0x25   : > { %383 = vst.msk [vmem:[#allocation2 + $0xf8] sm:$0xff] %vm350_vm0, %v7711_v0  ;;  %384 = vst.msk [vmem:[#allocation2 + $0x118] sm:$0xff] %vm350_vm0, %v7711_v0  ;;  %v336_v22 = vld [vmem:[%s7914_s21 + $0x90] sm:$0xff]  ;;  %v337_v23 = vld [vmem:[%s7914_s21 + $0x98] sm:$0xff] }
  0x26   : > { %385 = vst.msk [vmem:[#allocation2 + $0x138] sm:$0xff] %vm350_vm0, %v7711_v0  ;;  %386 = vst.msk [vmem:[#allocation2 + $0x158] sm:$0xff] %vm350_vm0, %v7711_v0  ;;  %v338_v24 = vld [vmem:[%s7914_s21 + $0xa0] sm:$0xff]  ;;  %v339_v25 = vld [vmem:[%s7914_s21 + $0xa8] sm:$0xff] }
  0x27   : > { %387 = vst.msk [vmem:[#allocation2 + $0x178] sm:$0xff] %vm350_vm0, %v7711_v0  ;;  %388 = vst.msk [vmem:[#allocation2 + $0x198] sm:$0xff] %vm350_vm0, %v7711_v0  ;;  %v340_v35 = vld [vmem:[%s7914_s21 + $0xb0] sm:$0xff]  ;;  %v341_v36 = vld [vmem:[%s7914_s21 + $0xb8] sm:$0xff] }
  0x28   : > { %389 = vst.msk [vmem:[#allocation2 + $0x1b8] sm:$0xff] %vm350_vm0, %v7711_v0  ;;  %390 = vst.msk [vmem:[#allocation2 + $0x1d8] sm:$0xff] %vm350_vm0, %v7711_v0  ;;  %v342_v50 = vld [vmem:[%s7914_s21 + $0xc0] sm:$0xff]  ;;  %v343_v51 = vld [vmem:[%s7914_s21 + $0xc8] sm:$0xff] }
  0x29   : > { %391 = vst.msk [vmem:[#allocation2 + $0x1f8] sm:$0xff] %vm350_vm0, %v7711_v0  ;;  %392 = vst.msk [vmem:[#allocation2 + $0x218] sm:$0xff] %vm350_vm0, %v7711_v0  ;;  %v344_v52 = vld [vmem:[%s7914_s21 + $0xd0] sm:$0xff]  ;;  %v345_v53 = vld [vmem:[%s7914_s21 + $0xd8] sm:$0xff] }
  0x2a   : > { %395 = vst.msk [vmem:[#allocation2 + $0x48] sm:$0xff] %vm350_vm0, %v320_v1  ;;  %396 = vst.msk [vmem:[#allocation2 + $0x50] sm:$0xff] %vm350_vm0, %v321_v2  ;;  %v346_v54 = vld [vmem:[%s7914_s21 + $0xe0] sm:$0xff]  ;;  %v347_v55 = vld [vmem:[%s7914_s21 + $0xe8] sm:$0xff] }
  0x2b   : > { %393 = vst.msk [vmem:[#allocation2 + $0x28] sm:$0xff] %vm350_vm0, %v318_v3  ;;  %394 = vst.msk [vmem:[#allocation2 + $0x30] sm:$0xff] %vm350_vm0, %v319_v4 }
  0x2c   : > { %397 = vst.msk [vmem:[#allocation2 + $0x68] sm:$0xff] %vm350_vm0, %v322_v5  ;;  %398 = vst.msk [vmem:[#allocation2 + $0x70] sm:$0xff] %vm350_vm0, %v323_v6 }
  0x2d   : > { %399 = vst.msk [vmem:[#allocation2 + $0x88] sm:$0xff] %vm350_vm0, %v324_v9  ;;  %400 = vst.msk [vmem:[#allocation2 + $0x90] sm:$0xff] %vm350_vm0, %v325_v11 }
  0x2e   : > { %401 = vst.msk [vmem:[#allocation2 + $0xa8] sm:$0xff] %vm350_vm0, %v326_v12  ;;  %402 = vst.msk [vmem:[#allocation2 + $0xb0] sm:$0xff] %vm350_vm0, %v327_v13 }
  0x2f   : > { %403 = vst.msk [vmem:[#allocation2 + $0xc8] sm:$0xff] %vm350_vm0, %v328_v14  ;;  %404 = vst.msk [vmem:[#allocation2 + $0xd0] sm:$0xff] %vm350_vm0, %v329_v15  ;;  %v489_v15 = vld [vmem:[#allocation2 + $0x9] sm:$0xff] }
  0x30   : > { %405 = vst.msk [vmem:[#allocation2 + $0xe8] sm:$0xff] %vm350_vm0, %v330_v16  ;;  %406 = vst.msk [vmem:[#allocation2 + $0xf0] sm:$0xff] %vm350_vm0, %v331_v17  ;;  %v490_v16 = vld [vmem:[#allocation2 + $0x11] sm:$0xff] }
  0x31   : > { %407 = vst.msk [vmem:[#allocation2 + $0x108] sm:$0xff] %vm350_vm0, %v332_v18  ;;  %408 = vst.msk [vmem:[#allocation2 + $0x110] sm:$0xff] %vm350_vm0, %v333_v19  ;;  %v461_v26 = vld [vmem:[#allocation2 + $0x48] sm:$0xff]  ;;  %v462_v27 = vld [vmem:[#allocation2 + $0x50] sm:$0xff]  ;;  %v6497_v18 = vpack.i.bf16 %v490_v16, %v489_v15 }
  0x32   : > { %409 = vst.msk [vmem:[#allocation2 + $0x128] sm:$0xff] %vm350_vm0, %v334_v20  ;;  %410 = vst.msk [vmem:[#allocation2 + $0x130] sm:$0xff] %vm350_vm0, %v335_v21  ;;  %v459_v28 = vld [vmem:[#allocation2 + $0x28] sm:$0xff]  ;;  %v7961_v29 = vpack.i.bf16 %v462_v27, %v461_v26  ;;  %v460_v30 = vld [vmem:[#allocation2 + $0x30] sm:$0xff] }
  0x33   : > { %411 = vst.msk [vmem:[#allocation2 + $0x148] sm:$0xff] %vm350_vm0, %v336_v22  ;;  %412 = vst.msk [vmem:[#allocation2 + $0x150] sm:$0xff] %vm350_vm0, %v337_v23  ;;  %v463_v31 = vld [vmem:[#allocation2 + $0x68] sm:$0xff]  ;;  %v464_v32 = vld [vmem:[#allocation2 + $0x70] sm:$0xff]  ;;  %v7963_v33 = vpack.i.bf16 %v460_v30, %v459_v28 }
  0x34   : > { %413 = vst.msk [vmem:[#allocation2 + $0x168] sm:$0xff] %vm350_vm0, %v338_v24  ;;  %414 = vst.msk [vmem:[#allocation2 + $0x170] sm:$0xff] %vm350_vm0, %v339_v25  ;;  %v465_v34 = vld [vmem:[#allocation2 + $0x88] sm:$0xff]  ;;  %6428 = vrot.lane.b32.xlu1 %v7961_v29, %s7712_s22  ;;  %v7969_v37 = vpack.i.bf16 %v464_v32, %v463_v31  ;;  %v466_v38 = vld [vmem:[#allocation2 + $0x90] sm:$0xff] }
  0x35   : > { %415 = vst.msk [vmem:[#allocation2 + $0x188] sm:$0xff] %vm350_vm0, %v340_v35  ;;  %416 = vst.msk [vmem:[#allocation2 + $0x190] sm:$0xff] %vm350_vm0, %v341_v36  ;;  %6423 = vrot.lane.b32.xlu0 %v7963_v33, %s7712_s22  ;;  %v7975_v39 = vpack.i.bf16 %v466_v38, %v465_v34  ;;  %v467_v40 = vld [vmem:[#allocation2 + $0xa8] sm:$0xff]  ;;  %v468_v41 = vld [vmem:[#allocation2 + $0xb0] sm:$0xff] }
  0x36   : > { %v469_v42 = vld [vmem:[#allocation2 + $0xc8] sm:$0xff]  ;;  %v470_v43 = vld [vmem:[#allocation2 + $0xd0] sm:$0xff]  ;;  %v7979_v45 = vpack.i.bf16 %v468_v41, %v467_v40  ;;  %417 = vst.msk [vmem:[#allocation2 + $0x1a8] sm:$0xff] %vm350_vm0, %v342_v50  ;;  %418 = vst.msk [vmem:[#allocation2 + $0x1b0] sm:$0xff] %vm350_vm0, %v343_v51 }
  0x37   : > { %v471_v44 = vld [vmem:[#allocation2 + $0xe8] sm:$0xff]  ;;  %v472_v46 = vld [vmem:[#allocation2 + $0xf0] sm:$0xff]  ;;  %v7983_v49 = vpack.i.bf16 %v470_v43, %v469_v42  ;;  %419 = vst.msk [vmem:[#allocation2 + $0x1c8] sm:$0xff] %vm350_vm0, %v344_v52  ;;  %420 = vst.msk [vmem:[#allocation2 + $0x1d0] sm:$0xff] %vm350_vm0, %v345_v53 }
  0x38   : > { %6433 = vrot.lane.b32.xlu1 %v7969_v37, %s7712_s22  ;;  %v473_v47 = vld [vmem:[#allocation2 + $0x108] sm:$0xff]  ;;  %v474_v48 = vld [vmem:[#allocation2 + $0x110] sm:$0xff]  ;;  %421 = vst.msk [vmem:[#allocation2 + $0x1e8] sm:$0xff] %vm350_vm0, %v346_v54  ;;  %422 = vst.msk [vmem:[#allocation2 + $0x1f0] sm:$0xff] %vm350_vm0, %v347_v55  ;;  %v7999_v56 = vpack.i.bf16 %v472_v46, %v471_v44 }
  0x39   : > { %6438 = vrot.lane.b32.xlu0 %v7975_v39, %s7712_s22  ;;  %v8003_v57 = vpack.i.bf16 %v474_v48, %v473_v47  ;;  %v475_v58 = vld [vmem:[#allocation2 + $0x128] sm:$0xff]  ;;  %v476_v59 = vld [vmem:[#allocation2 + $0x130] sm:$0xff]  ;;  %v349_v31 = vld [vmem:[%s7914_s21 + $0xf8] sm:$0xff]  ;;  %2361 = vst.msk [vmem:[#allocation3] sm:$0xff] %vm1836_vm1, %v7711_v0 }
  0x3a   : > { %v477_v60 = vld [vmem:[#allocation2 + $0x148] sm:$0xff]  ;;  %v478_v61 = vld [vmem:[#allocation2 + $0x150] sm:$0xff]  ;;  %v8007_v62 = vpack.i.bf16 %v476_v59, %v475_v58  ;;  %424 = vst.msk [vmem:[#allocation2 + $0x210] sm:$0xff] %vm350_vm0, %v349_v31 }
  0x3b   : > { %v8011_v63 = vpack.i.bf16 %v478_v61, %v477_v60  ;;  %v479_v1 = vld [vmem:[#allocation2 + $0x168] sm:$0xff]  ;;  %v480_v2 = vld [vmem:[#allocation2 + $0x170] sm:$0xff]  ;;  %2362 = vst.msk [vmem:[#allocation3 + $0x8] sm:$0xff] %vm1836_vm1, %v7711_v0  ;;  %2363 = vst.msk [vmem:[#allocation3 + $0x10] sm:$0xff] %vm1836_vm1, %v7711_v0 }
  0x3c   : > { %6443 = vrot.lane.b32.xlu1 %v7979_v45, %s7712_s22  ;;  %v481_v3 = vld [vmem:[#allocation2 + $0x188] sm:$0xff]  ;;  %v482_v4 = vld [vmem:[#allocation2 + $0x190] sm:$0xff]  ;;  %v8015_v5 = vpack.i.bf16 %v480_v2, %v479_v1  ;;  %2364 = vst.msk [vmem:[#allocation3 + $0x18] sm:$0xff] %vm1836_vm1, %v7711_v0  ;;  %2366 = vst.msk [vmem:[#allocation3 + $0x220] sm:$0xff] %vm1836_vm1, %v7711_v0 }
  0x3d   : > { %6448 = vrot.lane.b32.xlu0 %v7983_v49, %s7712_s22  ;;  %v8019_v6 = vpack.i.bf16 %v482_v4, %v481_v3  ;;  %v483_v7 = vld [vmem:[#allocation2 + $0x1a8] sm:$0xff]  ;;  %v484_v8 = vld [vmem:[#allocation2 + $0x1b0] sm:$0xff]  ;;  %2367 = vst.msk [vmem:[#allocation3 + $0x228] sm:$0xff] %vm1836_vm1, %v7711_v0  ;;  %2368 = vst.msk [vmem:[#allocation3 + $0x230] sm:$0xff] %vm1836_vm1, %v7711_v0 }
  0x3e   : > { %v485_v9 = vld [vmem:[#allocation2 + $0x1c8] sm:$0xff]  ;;  %v486_v10 = vld [vmem:[#allocation2 + $0x1d0] sm:$0xff]  ;;  %v8023_v11 = vpack.i.bf16 %v484_v8, %v483_v7  ;;  %2369 = vst.msk [vmem:[#allocation3 + $0x238] sm:$0xff] %vm1836_vm1, %v7711_v0  ;;  %2371 = vst.msk [vmem:[#allocation3 + $0x20] sm:$0xff] %vm1836_vm1, %v7711_v0 }
  0x3f   : > { %v8027_v12 = vpack.i.bf16 %v486_v10, %v485_v9  ;;  %v487_v13 = vld [vmem:[#allocation2 + $0x1e8] sm:$0xff]  ;;  %v488_v14 = vld [vmem:[#allocation2 + $0x1f0] sm:$0xff]  ;;  %2372 = vst.msk [vmem:[#allocation3 + $0x40] sm:$0xff] %vm1836_vm1, %v7711_v0  ;;  %2373 = vst.msk [vmem:[#allocation3 + $0x60] sm:$0xff] %vm1836_vm1, %v7711_v0 }
  0x40   : > { %6453 = vrot.lane.b32.xlu1 %v7999_v56, %s7712_s22  ;;  %v8031_v17 = vpack.i.bf16 %v488_v14, %v487_v13  ;;  %v491_v19 = vld [vmem:[#allocation2 + $0x29] sm:$0xff]  ;;  %v492_v20 = vld [vmem:[#allocation2 + $0x31] sm:$0xff]  ;;  %2374 = vst.msk [vmem:[#allocation3 + $0x80] sm:$0xff] %vm1836_vm1, %v7711_v0  ;;  %2375 = vst.msk [vmem:[#allocation3 + $0xa0] sm:$0xff] %vm1836_vm1, %v7711_v0 }
  0x41   : > { %6458 = vrot.lane.b32.xlu0 %v8003_v57, %s7712_s22  ;;  %v493_v21 = vld [vmem:[#allocation2 + $0x49] sm:$0xff]  ;;  %v494_v22 = vld [vmem:[#allocation2 + $0x51] sm:$0xff]  ;;  %v8037_v23 = vpack.i.bf16 %v492_v20, %v491_v19  ;;  %2376 = vst.msk [vmem:[#allocation3 + $0xc0] sm:$0xff] %vm1836_vm1, %v7711_v0  ;;  %2377 = vst.msk [vmem:[#allocation3 + $0xe0] sm:$0xff] %vm1836_vm1, %v7711_v0 }
  0x42   : > { %v8040_v24 = vpack.i.bf16 %v494_v22, %v493_v21  ;;  %v495_v25 = vld [vmem:[#allocation2 + $0x69] sm:$0xff]  ;;  %v496_v26 = vld [vmem:[#allocation2 + $0x71] sm:$0xff]  ;;  %2378 = vst.msk [vmem:[#allocation3 + $0x100] sm:$0xff] %vm1836_vm1, %v7711_v0  ;;  %2379 = vst.msk [vmem:[#allocation3 + $0x120] sm:$0xff] %vm1836_vm1, %v7711_v0 }
  0x43   : > { %v497_v27 = vld [vmem:[#allocation2 + $0x89] sm:$0xff]  ;;  %v498_v28 = vld [vmem:[#allocation2 + $0x91] sm:$0xff]  ;;  %v8048_v35 = vpack.i.bf16 %v496_v26, %v495_v25  ;;  %2380 = vst.msk [vmem:[#allocation3 + $0x140] sm:$0xff] %vm1836_vm1, %v7711_v0  ;;  %2381 = vst.msk [vmem:[#allocation3 + $0x160] sm:$0xff] %vm1836_vm1, %v7711_v0 }
  0x44   : > { %6463 = vrot.lane.b32.xlu1 %v8007_v62, %s7712_s22  ;;  %v348_v30 = vld [vmem:[%s7914_s21 + $0xf0] sm:$0xff]  ;;  %v8052_v36 = vpack.i.bf16 %v498_v28, %v497_v27  ;;  %v8078_v16 = vld [vmem:[#allocation2 + $0x27] sm:$0xff]  ;;  %2382 = vst.msk [vmem:[#allocation3 + $0x180] sm:$0xff] %vm1836_vm1, %v7711_v0  ;;  %2383 = vst.msk [vmem:[#allocation3 + $0x1a0] sm:$0xff] %vm1836_vm1, %v7711_v0  ;;  %s7722_s21 = smov 112  }
  0x45   : > { %6468 = vrot.lane.b32.xlu0 %v8011_v63, %s7712_s22  ;;  %v499_v32 = vld [vmem:[#allocation2 + $0xa9] sm:$0xff]  ;;  %v500_v34 = vld [vmem:[#allocation2 + $0xb1] sm:$0xff]  ;;  %423 = vst.msk [vmem:[#allocation2 + $0x208] sm:$0xff] %vm350_vm0, %v348_v30 }
  0x46   : > { %v501_v38 = vld [vmem:[#allocation2 + $0xc9] sm:$0xff]  ;;  %v502_v40 = vld [vmem:[#allocation2 + $0xd1] sm:$0xff]  ;;  %v8056_v41 = vpack.i.bf16 %v500_v34, %v499_v32  ;;  %2384 = vst.msk [vmem:[#allocation3 + $0x1c0] sm:$0xff] %vm1836_vm1, %v7711_v0  ;;  %2385 = vst.msk [vmem:[#allocation3 + $0x1e0] sm:$0xff] %vm1836_vm1, %v7711_v0 }
  0x47   : > { %v8060_v42 = vpack.i.bf16 %v502_v40, %v501_v38  ;;  %v503_v43 = vld [vmem:[#allocation2 + $0xe9] sm:$0xff]  ;;  %v504_v44 = vld [vmem:[#allocation2 + $0xf1] sm:$0xff]  ;;  %2386 = vst.msk [vmem:[#allocation3 + $0x200] sm:$0xff] %vm1836_vm1, %v7711_v0  ;;  %2387 = vst.msk [vmem:[#allocation3 + $0x38] sm:$0xff] %vm1836_vm1, %v7711_v0 }
  0x48   : > { %6473 = vrot.lane.b32.xlu1 %v8015_v5, %s7712_s22  ;;  %v505_v46 = vld [vmem:[#allocation2 + $0x109] sm:$0xff]  ;;  %v506_v47 = vld [vmem:[#allocation2 + $0x111] sm:$0xff]  ;;  %v8064_v48 = vpack.i.bf16 %v504_v44, %v503_v43  ;;  %2388 = vst.msk [vmem:[#allocation3 + $0x58] sm:$0xff] %vm1836_vm1, %v7711_v0  ;;  %2389 = vst.msk [vmem:[#allocation3 + $0x78] sm:$0xff] %vm1836_vm1, %v7711_v0 }
  0x49   : > { %6478 = vrot.lane.b32.xlu0 %v8019_v6, %s7712_s22  ;;  %v8068_v50 = vpack.i.bf16 %v506_v47, %v505_v46  ;;  %v507_v51 = vld [vmem:[#allocation2 + $0x129] sm:$0xff]  ;;  %v508_v52 = vld [vmem:[#allocation2 + $0x131] sm:$0xff]  ;;  %2390 = vst.msk [vmem:[#allocation3 + $0x98] sm:$0xff] %vm1836_vm1, %v7711_v0  ;;  %2391 = vst.msk [vmem:[#allocation3 + $0xb8] sm:$0xff] %vm1836_vm1, %v7711_v0 }
  0x4a   : > { %v509_v53 = vld [vmem:[#allocation2 + $0x149] sm:$0xff]  ;;  %v510_v54 = vld [vmem:[#allocation2 + $0x151] sm:$0xff]  ;;  %v6542_v55 = vpack.i.bf16 %v508_v52, %v507_v51  ;;  %2392 = vst.msk [vmem:[#allocation3 + $0xd8] sm:$0xff] %vm1836_vm1, %v7711_v0  ;;  %2393 = vst.msk [vmem:[#allocation3 + $0xf8] sm:$0xff] %vm1836_vm1, %v7711_v0 }
  0x4b   : > { %v6547_v58 = vpack.i.bf16 %v510_v54, %v509_v53  ;;  %v511_v59 = vld [vmem:[#allocation2 + $0x169] sm:$0xff]  ;;  %v512_v60 = vld [vmem:[#allocation2 + $0x171] sm:$0xff]  ;;  %2394 = vst.msk [vmem:[#allocation3 + $0x118] sm:$0xff] %vm1836_vm1, %v7711_v0  ;;  %2395 = vst.msk [vmem:[#allocation3 + $0x138] sm:$0xff] %vm1836_vm1, %v7711_v0 }
  0x4c   : > { %6483 = vrot.lane.b32.xlu1 %v8023_v11, %s7712_s22  ;;  %v513_v61 = vld [vmem:[#allocation2 + $0x189] sm:$0xff]  ;;  %v514_v1 = vld [vmem:[#allocation2 + $0x191] sm:$0xff]  ;;  %v6552_v2 = vpack.i.bf16 %v512_v60, %v511_v59  ;;  %2396 = vst.msk [vmem:[#allocation3 + $0x158] sm:$0xff] %vm1836_vm1, %v7711_v0  ;;  %2397 = vst.msk [vmem:[#allocation3 + $0x178] sm:$0xff] %vm1836_vm1, %v7711_v0 }
  0x4d   : > { %6488 = vrot.lane.b32.xlu0 %v8027_v12, %s7712_s22  ;;  %v6557_v3 = vpack.i.bf16 %v514_v1, %v513_v61  ;;  %v515_v4 = vld [vmem:[#allocation2 + $0x1a9] sm:$0xff]  ;;  %v516_v7 = vld [vmem:[#allocation2 + $0x1b1] sm:$0xff]  ;;  %2398 = vst.msk [vmem:[#allocation3 + $0x198] sm:$0xff] %vm1836_vm1, %v7711_v0  ;;  %2399 = vst.msk [vmem:[#allocation3 + $0x1b8] sm:$0xff] %vm1836_vm1, %v7711_v0 }
  0x4e   : > { %v517_v8 = vld [vmem:[#allocation2 + $0x1c9] sm:$0xff]  ;;  %v518_v9 = vld [vmem:[#allocation2 + $0x1d1] sm:$0xff]  ;;  %v6562_v10 = vpack.i.bf16 %v516_v7, %v515_v4  ;;  %2400 = vst.msk [vmem:[#allocation3 + $0x1d8] sm:$0xff] %vm1836_vm1, %v7711_v0  ;;  %2401 = vst.msk [vmem:[#allocation3 + $0x1f8] sm:$0xff] %vm1836_vm1, %v7711_v0 }
  0x4f   : > { %v6567_v13 = vpack.i.bf16 %v518_v9, %v517_v8  ;;  %v519_v14 = vld [vmem:[#allocation2 + $0x1e9] sm:$0xff]  ;;  %v520_v15 = vld [vmem:[#allocation2 + $0x1f1] sm:$0xff]  ;;  %2402 = vst.msk [vmem:[#allocation3 + $0x218] sm:$0xff] %vm1836_vm1, %v7711_v0 }
  0x50   : > { %6493 = vrot.lane.b32.xlu1 %v8031_v17, %s7712_s22  ;;  %v6572_v19 = vpack.i.bf16 %v520_v15, %v519_v14  ;;  %v8086_v21 = vld [vmem:[#allocation2 + $0x47] sm:$0xff]  ;;  %v8088_v22 = vld [vmem:[#allocation2 + $0x4f] sm:$0xff]  ;;  %s7717_s22 = smov 24  }
  0x51   : > { %6498 = vrot.lane.b32.xlu0 %v6497_v18, %s10584_s23  ;;  %v8080_v18 = vld [vmem:[#allocation2 + $0x2f] sm:$0xff]  ;;  %v525_v25 = vld [vmem:[#allocation2 + $0x67] sm:$0xff]  ;;  %v8093_v27 = vpack.i.bf16 %v8088_v22, %v8086_v21 }
  0x52   : > { %10587 = vst [vmem:[#allocation7_spill] sm:$0xff] %v8080_v18  ;;  %v6577_v20 = vpack.i.bf16 %v8080_v18, %v8078_v16  ;;  %v526_v26 = vld [vmem:[#allocation2 + $0x6f] sm:$0xff]  ;;  %v527_v30 = vld [vmem:[#allocation2 + $0x87] sm:$0xff] }
  0x53   : > { %v8096_v28 = vpack.i.bf16 %v526_v26, %v525_v25  ;;  %v528_v31 = vld [vmem:[#allocation2 + $0x8f] sm:$0xff]  ;;  %v529_v32 = vld [vmem:[#allocation2 + $0xa7] sm:$0xff] }
  0x54   : > { %6503 = vrot.lane.b32.xlu1 %v8037_v23, %s10584_s23  ;;  %v530_v34 = vld [vmem:[#allocation2 + $0xaf] sm:$0xff]  ;;  %v8100_v38 = vpack.i.bf16 %v528_v31, %v527_v30  ;;  %v531_v43 = vld [vmem:[#allocation2 + $0xc7] sm:$0xff] }
  0x55   : > { %6508 = vrot.lane.b32.xlu0 %v8040_v24, %s10584_s23  ;;  %v8104_v40 = vpack.i.bf16 %v530_v34, %v529_v32  ;;  %v532_v44 = vld [vmem:[#allocation2 + $0xcf] sm:$0xff]  ;;  %v533_v46 = vld [vmem:[#allocation2 + $0xe7] sm:$0xff] }
  0x56   : > { %v534_v47 = vld [vmem:[#allocation2 + $0xef] sm:$0xff]  ;;  %v8108_v51 = vpack.i.bf16 %v532_v44, %v531_v43  ;;  %v8114_v53 = vld [vmem:[#allocation2 + $0x107] sm:$0xff] }
  0x57   : > { %v8112_v52 = vpack.i.bf16 %v534_v47, %v533_v46  ;;  %v8116_v54 = vld [vmem:[#allocation2 + $0x10f] sm:$0xff]  ;;  %v8134_v61 = vld [vmem:[#allocation2 + $0x147] sm:$0xff] }
  0x58   : > { %6513 = vrot.lane.b32.xlu1 %v8048_v35, %s10584_s23  ;;  %v8126_v59 = vpack.i.bf16 %v8116_v54, %v8114_v53  ;;  %v8136_v1 = vld [vmem:[#allocation2 + $0x14f] sm:$0xff]  ;;  %v8154_v8 = vld [vmem:[#allocation2 + $0x187] sm:$0xff] }
  0x59   : > { %6518 = vrot.lane.b32.xlu0 %v8052_v36, %s10584_s23  ;;  %v8146_v4 = vpack.i.bf16 %v8136_v1, %v8134_v61  ;;  %v8156_v9 = vld [vmem:[#allocation2 + $0x18f] sm:$0xff]  ;;  %v8174_v25 = vld [vmem:[#allocation2 + $0x1e7] sm:$0xff] }
  0x5a   : > { %v6632_v14 = vpack.i.bf16 %v8156_v9, %v8154_v8  ;;  %v8176_v26 = vld [vmem:[#allocation2 + $0x1ef] sm:$0xff]  ;;  %v551_v32 = vld [vmem:[#allocation2 + $0x207] sm:$0xff] }
  0x5b   : > { %v6647_v31 = vpack.i.bf16 %v8176_v26, %v8174_v25  ;;  %v552_v34 = vld [vmem:[#allocation2 + $0x20f] sm:$0xff] }
  0x5c   : > { %6523 = vrot.lane.b32.xlu1 %v8056_v41, %s10584_s23  ;;  %v6652_v43 = vpack.i.bf16 %v552_v34, %v551_v32  ;;  %v7618_v46 = vld [vmem:[%s10556_s1 + $0x8] sm:$0xff]   ;;  %v7619_v47 = vld [vmem:[%s10556_s1 + $0x10] ss:$0 sps:$4 sm:$0x33]  }
  0x5d   : > { %6528 = vrot.lane.b32.xlu0 %v8060_v42, %s10584_s23 }
  0x60   : > { %6533 = vrot.lane.b32.xlu1 %v8064_v48, %s10584_s23 }
  0x61   : > { %6538 = vrot.lane.b32.xlu0 %v8068_v50, %s10584_s23 }
  0x64   : > { %6543 = vrot.lane.b32.xlu1 %v6542_v55, %s10584_s23  ;;  %v8118_v55 = vld [vmem:[#allocation2 + $0x127] sm:$0xff] }
  0x65   : > { %6548 = vrot.lane.b32.xlu0 %v6547_v58, %s10584_s23  ;;  %v8120_v58 = vld [vmem:[#allocation2 + $0x12f] sm:$0xff] }
  0x66   : > { %v8132_v60 = vpack.i.bf16 %v8120_v58, %v8118_v55 }
  0x68   : > { %6553 = vrot.lane.b32.xlu1 %v6552_v2, %s10584_s23  ;;  %v8138_v2 = vld [vmem:[#allocation2 + $0x167] sm:$0xff] }
  0x69   : > { %6558 = vrot.lane.b32.xlu0 %v6557_v3, %s10584_s23  ;;  %v8140_v3 = vld [vmem:[#allocation2 + $0x16f] sm:$0xff] }
  0x6a   : > { %v8152_v7 = vpack.i.bf16 %v8140_v3, %v8138_v2 }
  0x6c   : > { %6563 = vrot.lane.b32.xlu1 %v6562_v10, %s10584_s23  ;;  %v8158_v10 = vld [vmem:[#allocation2 + $0x1a7] sm:$0xff] }
  0x6d   : > { %6568 = vrot.lane.b32.xlu0 %v6567_v13, %s10584_s23  ;;  %v8160_v13 = vld [vmem:[#allocation2 + $0x1af] sm:$0xff] }
  0x6e   : > { %v6637_v15 = vpack.i.bf16 %v8160_v13, %v8158_v10 }
  0x70   : > { %6573 = vrot.lane.b32.xlu1 %v6572_v19, %s10584_s23  ;;  %v8170_v19 = vld [vmem:[#allocation2 + $0x1c7] sm:$0xff] }
  0x71   : > { %6578 = vrot.lane.b32.xlu0 %v6577_v20, %s7714_s24  ;;  %v8172_v20 = vld [vmem:[#allocation2 + $0x1cf] sm:$0xff] }
  0x72   : > { %v6642_v30 = vpack.i.bf16 %v8172_v20, %v8170_v19 }
  0x74   : > { %6583 = vrot.lane.b32.xlu1 %v8093_v27, %s7714_s24 }
  0x75   : > { %6588 = vrot.lane.b32.xlu0 %v8096_v28, %s7714_s24 }
  0x78   : > { %6593 = vrot.lane.b32.xlu1 %v8100_v38, %s7714_s24 }
  0x79   : > { %6598 = vrot.lane.b32.xlu0 %v8104_v40, %s7714_s24 }
  0x7c   : > { %6603 = vrot.lane.b32.xlu1 %v8108_v51, %s7714_s24 }
  0x7d   : > { %6608 = vrot.lane.b32.xlu0 %v8112_v52, %s7714_s24 }
  0x80   : > { %6613 = vrot.lane.b32.xlu1 %v8126_v59, %s7714_s24 }
  0x81   : > { %6618 = vrot.lane.b32.xlu0 %v8132_v60, %s7714_s24 }
  0x84   : > { %6623 = vrot.lane.b32.xlu1 %v8146_v4, %s7714_s24 }
  0x85   : > { %6628 = vrot.lane.b32.xlu0 %v8152_v7, %s7714_s24 }
  0x88   : > { %6633 = vrot.lane.b32.xlu1 %v6632_v14, %s7714_s24 }
  0x89   : > { %6638 = vrot.lane.b32.xlu0 %v6637_v15, %s7714_s24 }
  0x8c   : > { %6643 = vrot.lane.b32.xlu1 %v6642_v30, %s7714_s24 }
  0x8d   : > { %6648 = vrot.lane.b32.xlu0 %v6647_v31, %s7714_s24 }
  0x90   : > { %6653 = vrot.lane.b32.xlu1 %v6652_v43, %s7714_s24  ;;  %s7718_s24 = smov 28  }
  0x91   : > { %6658 = vrot.lane.b32.xlu0 %v7963_v33, %s7715_s25 }
  0x93   : > { %v8285_v0 = vpop.permute.xlu0 %6418 }
  0x94   : > { %6663 = vrot.lane.b32.xlu1 %v7961_v29, %s7715_s25 }
  0x95   : > { %6668 = vrot.lane.b32.xlu0 %v7969_v37, %s7715_s25 }
  0x98   : > { %6673 = vrot.lane.b32.xlu1 %v7975_v39, %s7715_s25 }
  0x99   : > { %6678 = vrot.lane.b32.xlu0 %v7979_v45, %s7715_s25 }
  0x9c   : > { %6683 = vrot.lane.b32.xlu1 %v7983_v49, %s7715_s25 }
  0x9d   : > { %6688 = vrot.lane.b32.xlu0 %v7999_v56, %s7715_s25  ;;  %v583_v56 = vld [vmem:[#allocation2 + $0x208] sm:$0xff] }
  0xa0   : > { %6693 = vrot.lane.b32.xlu1 %v8003_v57, %s7715_s25  ;;  %v584_v57 = vld [vmem:[#allocation2 + $0x210] sm:$0xff] }
  0xa1   : > { %6698 = vrot.lane.b32.xlu0 %v8007_v62, %s7715_s25 }
  0xa4   : > { %6703 = vrot.lane.b32.xlu1 %v8011_v63, %s7715_s25  ;;  %v7617_v63 = vld [vmem:[%s10556_s1] sm:$0xff]  }
  0xa5   : > { %6708 = vrot.lane.b32.xlu0 %v8015_v5, %s7715_s25  ;;  %v6732_v5 = vpack.i.bf16 %v584_v57, %v583_v56  ;;  %6304 = vmatprep.subr.bf16.mxu0 %v7617_v63  ;;  %v659_v56 = vld [vmem:[#allocation2 + $0xd0] sm:$0xff] }
  0xa6   : > { %v8291_v33 = vpop.permute.xlu1 %6428  ;;  %6305 = vmatpush3.bf16.msra.mxu0 %v7617_v63  ;;  %v661_v63 = vld [vmem:[#allocation2 + $0xf0] sm:$0xff] }
  0xa7   : > { %v8293_v49 = vpop.permute.xlu0 %6423  ;;  %6306 = vmatprep.subr.bf16.mxu0 %v7618_v46 }
  0xa8   : > { %6713 = vrot.lane.b32.xlu1 %v8019_v6, %s7715_s25 }
  0xa9   : > { %6718 = vrot.lane.b32.xlu0 %v8023_v11, %s7715_s25 }
  0xaa   : > { %v8299_v62 = vpop.permute.xlu1 %6433  ;;  %6307 = vmatpush3.bf16.msra.mxu0 %v7618_v46 }
  0xab   : > { %10588 = vst [vmem:[#allocation8_spill] sm:$0xff] %v8299_v62  ;;  %v8301_v44 = vpop.permute.xlu0 %6438  ;;  %6360 = vmatprep.subr.msk.bf16.mxu0 %vm2086_vm2, %v7619_v47 }
  0xac   : > { %10589 = vst [vmem:[#allocation9_spill] sm:$0xff] %v8301_v44  ;;  %6723 = vrot.lane.b32.xlu1 %v8027_v12, %s7715_s25 }
  0xad   : > { %6728 = vrot.lane.b32.xlu0 %v8031_v17, %s7715_s25 }
  0xae   : > { %v8310_v6 = vpop.permute.xlu1 %6443 }
  0xaf   : > { %10590 = vst [vmem:[#allocation10_spill] sm:$0xff] %v8310_v6  ;;  %v8312_v11 = vpop.permute.xlu0 %6448 }
  0xb0   : > { %10591 = vst [vmem:[#allocation11_spill] sm:$0xff] %v8312_v11  ;;  %6733 = vrot.lane.b32.xlu1 %v6732_v5, %s7715_s25  ;;  %v603_v11 = vld [vmem:[#allocation2 + $0x149] sm:$0xff] }
  0xb1   : > { %6738 = vrot.lane.b32.xlu0 %v8037_v23, %s7716_s19  ;;  %v2088_v23 = vsel %vm2086_vm2, %v7619_v47, 0  ;;  %vm5908_vm2 = vcmask 1043459  }
  0xb2   : > { %v8320_v12 = vpop.permute.xlu1 %6453  ;;  %6309 = vmatpush3.bf16.msra.mxu0 %v2088_v23 }
  0xb3   : > { %10592 = vst [vmem:[#allocation12_spill] sm:$0xff] %v8320_v12  ;;  %v8322_v17 = vpop.permute.xlu0 %6458  ;;  %v697_v12 = vld [vmem:[#allocation2 + $0x131] sm:$0xff] }
  0xb4   : > { %6743 = vrot.lane.b32.xlu1 %v8040_v24, %s7716_s19 }
  0xb5   : > { %6748 = vrot.lane.b32.xlu0 %v8093_v27, %s7717_s22 }
  0xb6   : > { %v8331_v14 = vpop.permute.xlu1 %6463 }
  0xb7   : > { %v8333_v15 = vpop.permute.xlu0 %6468  ;;  %v6466_v18 = vunpack.i.h.bf16 %v8331_v14 }
  0xb8   : > { %6753 = vrot.lane.b32.xlu1 %v8096_v28, %s7717_s22 }
  0xb9   : > { %6758 = vrot.lane.b32.xlu0 %v7961_v29, %s7718_s24 }
  0xba   : > { %v8339_v30 = vpop.permute.xlu1 %6473 }
  0xbb   : > { %v8341_v31 = vpop.permute.xlu0 %6478 }
  0xbc   : > { %6763 = vrot.lane.b32.xlu1 %v7969_v37, %s7718_s24 }
  0xbd   : > { %6768 = vrot.lane.b32.xlu0 %v8040_v24, %s7719_s26 }
  0xbe   : > { %v8347_v27 = vpop.permute.xlu1 %6483 }
  0xbf   : > { %v8349_v32 = vpop.permute.xlu0 %6488 }
  0xc0   : > { %6773 = vrot.lane.b32.xlu1 %v8048_v35, %s7719_s26 }
  0xc1   : > { %6778 = vrot.lane.b32.xlu0 %v8048_v35, %s7716_s19 }
  0xc2   : > { %v8355_v29 = vpop.permute.xlu1 %6493 }
  0xc3   : > { %v8357_v28 = vpop.permute.xlu0 %6498 }
  0xc4   : > { %10593 = vst [vmem:[#allocation13_spill] sm:$0xff] %v8357_v28  ;;  %6783 = vrot.lane.b32.xlu1 %v8052_v36, %s7716_s19  ;;  %v8444_v28 = vld [vmem:[#allocation2 + $0x18f] sm:$0xff] }
  0xc5   : > { %6788 = vrot.lane.b32.xlu0 %v8100_v38, %s7717_s22 }
  0xc6   : > { %v8363_v37 = vpop.permute.xlu1 %6503 }
  0xc7   : > { %10594 = vst [vmem:[#allocation14_spill] sm:$0xff] %v8363_v37  ;;  %v8365_v24 = vpop.permute.xlu0 %6508  ;;  %v8442_v37 = vld [vmem:[#allocation2 + $0x187] sm:$0xff] }
  0xc8   : > { %10595 = vst [vmem:[#allocation15_spill] sm:$0xff] %v8365_v24  ;;  %6793 = vrot.lane.b32.xlu1 %v8104_v40, %s7717_s22  ;;  %v658_v40 = vld [vmem:[#allocation2 + $0xc8] sm:$0xff]  ;;  %v701_v24 = vld [vmem:[#allocation2 + $0x171] sm:$0xff] }
  0xc9   : > { %6798 = vrot.lane.b32.xlu0 %v7975_v39, %s7718_s24 }
  0xca   : > { %v8371_v35 = vpop.permute.xlu1 %6513 }
  0xcb   : > { %10596 = vst [vmem:[#allocation16_spill] sm:$0xff] %v8371_v35  ;;  %v8373_v34 = vpop.permute.xlu0 %6518  ;;  %v8433_v35 = vld [vmem:[#allocation2 + $0x150] sm:$0xff] }
  0xcc   : > { %10597 = vst [vmem:[#allocation17_spill] sm:$0xff] %v8373_v34  ;;  %6803 = vrot.lane.b32.xlu1 %v7979_v45, %s7718_s24  ;;  %v6837_v45 = vpack.i.bf16 %v659_v56, %v658_v40  ;;  %v662_v56 = vld [vmem:[#allocation2 + $0x108] sm:$0xff] }
  0xcd   : > { %6808 = vrot.lane.b32.xlu0 %v8052_v36, %s7719_s26  ;;  %v660_v36 = vld [vmem:[#allocation2 + $0xe8] sm:$0xff] }
  0xce   : > { %v8379_v38 = vpop.permute.xlu1 %6523  ;;  %v8429_v34 = vld [vmem:[#allocation2 + $0x148] sm:$0xff] }
  0xcf   : > { %10598 = vst [vmem:[#allocation18_spill] sm:$0xff] %v8379_v38  ;;  %v8381_v43 = vpop.permute.xlu0 %6528  ;;  %v604_v38 = vld [vmem:[#allocation2 + $0x151] sm:$0xff] }
  0xd0   : > { %10599 = vst [vmem:[#allocation19_spill] sm:$0xff] %v8381_v43  ;;  %6813 = vrot.lane.b32.xlu1 %v8056_v41, %s7719_s26  ;;  %v696_v43 = vld [vmem:[#allocation2 + $0x129] sm:$0xff]  ;;  %v8450_v62 = vpack.i.bf16 %v604_v38, %v603_v11  ;;  %v6470_v11 = vunpack.i.l.bf16 %v8333_v15 }
  0xd1   : > { %6818 = vrot.lane.b32.xlu0 %v8056_v41, %s7716_s19  ;;  %v6842_v41 = vpack.i.bf16 %v661_v63, %v660_v36  ;;  %v664_v63 = vld [vmem:[#allocation2 + $0x128] sm:$0xff]  ;;  %v6892_v44 = vpack.i.bf16 %v697_v12, %v696_v43  ;;  %v6465_v12 = vunpack.i.l.bf16 %v8331_v14 }
  0xd2   : > { %v8387_v39 = vpop.permute.xlu1 %6533 }
  0xd3   : > { %10600 = vst [vmem:[#allocation20_spill] sm:$0xff] %v8387_v39  ;;  %v8389_v57 = vpop.permute.xlu0 %6538 }
  0xd4   : > { %6823 = vrot.lane.b32.xlu1 %v8060_v42, %s7716_s19 }
  0xd5   : > { %6828 = vrot.lane.b32.xlu0 %v8108_v51, %s7717_s22 }
  0xd6   : > { %v8395_v5 = vpop.permute.xlu1 %6543 }
  0xd7   : > { %v8397_v46 = vpop.permute.xlu0 %6548 }
  0xd8   : > { %6833 = vrot.lane.b32.xlu1 %v8112_v52, %s7717_s22 }
  0xd9   : > { %6838 = vrot.lane.b32.xlu0 %v6837_v45, %s7718_s24  ;;  %v663_v45 = vld [vmem:[#allocation2 + $0x110] sm:$0xff] }
  0xda   : > { %v8402_v47 = vpop.permute.xlu1 %6553 }
  0xdb   : > { %v8404_v23 = vpop.permute.xlu0 %6558 }
  0xdc   : > { %6843 = vrot.lane.b32.xlu1 %v6842_v41, %s7718_s24  ;;  %v665_v41 = vld [vmem:[#allocation2 + $0x130] sm:$0xff] }
  0xdd   : > { %6848 = vrot.lane.b32.xlu0 %v8060_v42, %s7719_s26  ;;  %v6877_v42 = vpack.i.bf16 %v663_v45, %v662_v56  ;;  %v6882_v6 = vpack.i.bf16 %v665_v41, %v664_v63  ;;  %v8437_v56 = vld [vmem:[#allocation2 + $0x170] sm:$0xff]  ;;  %v6460_v63 = vunpack.i.l.bf16 %v8322_v17 }
  0xde   : > { %v8409_v51 = vpop.permute.xlu1 %6563  ;;  %v700_v45 = vld [vmem:[#allocation2 + $0x169] sm:$0xff] }
  0xdf   : > { %v8411_v40 = vpop.permute.xlu0 %6568 }
  0xe0   : > { %6853 = vrot.lane.b32.xlu1 %v8064_v48, %s7719_s26 }
  0xe1   : > { %6858 = vrot.lane.b32.xlu0 %v8064_v48, %s7716_s19 }
  0xe2   : > { %v8417_v52 = vpop.permute.xlu1 %6573 }
  0xe3   : > { %v8419_v36 = vpop.permute.xlu0 %6578 }
  0xe4   : > { %10601 = vst [vmem:[#allocation21_spill] sm:$0xff] %v8419_v36  ;;  %6863 = vrot.lane.b32.xlu1 %v8068_v50, %s7716_s19  ;;  %v608_v36 = vld [vmem:[#allocation2 + $0x191] sm:$0xff] }
  0xe5   : > { %6868 = vrot.lane.b32.xlu0 %v8126_v59, %s7717_s22  ;;  %v8435_v59 = vld [vmem:[#allocation2 + $0x168] sm:$0xff] }
  0xe6   : > { %v8425_v39 = vpop.permute.xlu1 %6583 }
  0xe7   : > { %10602 = vst [vmem:[#allocation22_spill] sm:$0xff] %v8425_v39  ;;  %v8427_v48 = vpop.permute.xlu0 %6588  ;;  %v607_v39 = vld [vmem:[#allocation2 + $0x189] sm:$0xff] }
  0xe8   : > { %10603 = vst [vmem:[#allocation23_spill] sm:$0xff] %v8427_v48  ;;  %6873 = vrot.lane.b32.xlu1 %v8132_v60, %s7717_s22  ;;  %v6461_v60 = vunpack.i.h.bf16 %v8322_v17  ;;  %v6471_v17 = vunpack.i.h.bf16 %v8333_v15  ;;  %v8465_v38 = vpack.i.bf16 %v608_v36, %v607_v39  ;;  %v6486_v39 = vunpack.i.h.bf16 %v8347_v27 }
  0xe9   : > { %6878 = vrot.lane.b32.xlu0 %v6877_v42, %s7718_s24  ;;  %v6475_v42 = vunpack.i.l.bf16 %v8339_v30  ;;  %v6485_v36 = vunpack.i.l.bf16 %v8347_v27  ;;  %v6541_v27 = vunpack.i.h.bf16 %v8389_v57 }
  0xea   : > { %v8440_v48 = vpop.permute.xlu1 %6593  ;;  %v1755_v15 = vsel %vm350_vm0, %v8116_v54, %v6461_v60  ;;  %v1758_v54 = vsel %vm350_vm0, %v8134_v61, %v6470_v11  ;;  %v6540_v60 = vunpack.i.l.bf16 %v8389_v57  ;;  %v1765_v61 = vsel %vm350_vm0, %v8160_v13, %v6486_v39 }
  0xeb   : > { %10604 = vst [vmem:[#allocation24_spill] sm:$0xff] %v8440_v48  ;;  %v8448_v41 = vpop.permute.xlu0 %6598  ;;  %v8459_v48 = vpack.i.bf16 %v701_v24, %v700_v45  ;;  %v6481_v24 = vunpack.i.h.bf16 %v8341_v31  ;;  %v6480_v45 = vunpack.i.l.bf16 %v8341_v31  ;;  %v1756_v31 = vsel %vm350_vm0, %v8118_v55, %v6465_v12 }
  0xec   : > { %10605 = vst [vmem:[#allocation25_spill] sm:$0xff] %v8448_v41  ;;  %6883 = vrot.lane.b32.xlu1 %v6882_v6, %s7718_s24  ;;  %v6476_v6 = vunpack.i.h.bf16 %v8339_v30  ;;  %v1757_v30 = vsel %vm350_vm0, %v8120_v58, %v6466_v18  ;;  %v6490_v41 = vunpack.i.l.bf16 %v8349_v32  ;;  %v1760_v55 = vsel %vm350_vm0, %v8138_v2, %v6475_v42 }
  0xed   : > { %6888 = vrot.lane.b32.xlu0 %v8068_v50, %s7719_s26  ;;  %v1754_v50 = vsel %vm350_vm0, %v8114_v53, %v6460_v63  ;;  %v1759_v53 = vsel %vm350_vm0, %v8136_v1, %v6471_v17  ;;  %v1763_v58 = vsel %vm350_vm0, %v8156_v9, %v6481_v24  ;;  %v1762_v1 = vsel %vm350_vm0, %v8154_v8, %v6480_v45 }
  0xee   : > { %v8473_v43 = vpop.permute.xlu1 %6603  ;;  %v1761_v18 = vsel %vm350_vm0, %v8140_v3, %v6476_v6  ;;  %v6546_v57 = vunpack.i.h.bf16 %v8395_v5  ;;  %v6545_v3 = vunpack.i.l.bf16 %v8395_v5  ;;  %v8519_v8 = vsel %vm350_vm0, %v8170_v19, %v6490_v41 }
  0xef   : > { %10606 = vst [vmem:[#allocation26_spill] sm:$0xff] %v8473_v43  ;;  %v8481_v14 = vpop.permute.xlu0 %6608  ;;  %v6491_v43 = vunpack.i.h.bf16 %v8349_v32  ;;  %v1788_v13 = vsel %vm1770_vm3, %v1755_v15, %v6541_v27  ;;  %v6551_v5 = vunpack.i.h.bf16 %v8397_v46  ;;  %v6550_v12 = vunpack.i.l.bf16 %v8397_v46 }
  0xf0   : > { %6893 = vrot.lane.b32.xlu1 %v6892_v44, %s7719_s26  ;;  %v6555_v19 = vunpack.i.l.bf16 %v8402_v47  ;;  %v1790_v11 = vsel %vm1770_vm3, %v1757_v30, %v6546_v57  ;;  %v1789_v6 = vsel %vm1770_vm3, %v1756_v31, %v6545_v3  ;;  %v6560_v15 = vunpack.i.l.bf16 %v8404_v23 }
  0xf1   : > { %6898 = vrot.lane.b32.xlu0 %v6892_v44, %s7716_s19  ;;  %v1764_v44 = vsel %vm350_vm0, %v8158_v10, %v6485_v36  ;;  %v8515_v2 = vsel %vm350_vm0, %v8172_v20, %v6491_v43  ;;  %v1787_v10 = vsel %vm1770_vm3, %v1754_v50, %v6540_v60  ;;  %v6556_v20 = vunpack.i.h.bf16 %v8402_v47 }
  0xf2   : > { %v8505_v32 = vpop.permute.xlu1 %6613  ;;  %v1791_v39 = vsel %vm1770_vm3, %v1758_v54, %v6550_v12  ;;  %v1792_v36 = vsel %vm1770_vm3, %v1759_v53, %v6551_v5  ;;  %v10607_v27 = vpack.i.bf16 %v8433_v35, %v8429_v34  ;;  %v1793_v60 = vsel %vm1770_vm3, %v1760_v55, %v6555_v19 }
  0xf3   : > { %v6619_v63 = vpop.permute.xlu0 %6618  ;;  %v6566_v57 = vunpack.i.h.bf16 %v8409_v51  ;;  %v6565_v3 = vunpack.i.l.bf16 %v8409_v51  ;;  %v1795_v35 = vsel %vm1770_vm3, %v1762_v1, %v6560_v15  ;;  %v6570_v5 = vunpack.i.l.bf16 %v8411_v40  ;;  %v641_v15 = vld [vmem:[#allocation2 + $0x1af] sm:$0xff] }
  0xf4   : > { %v6621_v9 = vunpack.i.h.bf16 %v6619_v63  ;;  %v6620_v42 = vunpack.i.l.bf16 %v6619_v63  ;;  %6903 = vrot.lane.b32.xlu1 %v8450_v62, %s7716_s19  ;;  %v6495_v1 = vunpack.i.l.bf16 %v8355_v29 }
  0xf5   : > { %6908 = vrot.lane.b32.xlu0 %v8146_v4, %s7717_s22  ;;  %v6561_v4 = vunpack.i.h.bf16 %v8404_v23  ;;  %v1794_v23 = vsel %vm1770_vm3, %v1761_v18, %v6556_v20  ;;  %v1798_v20 = vsel %vm1770_vm3, %v1765_v61, %v6566_v57  ;;  %v1797_v19 = vsel %vm1770_vm3, %v1764_v44, %v6565_v3 }
  0xf6   : > { %v8532_v41 = vsel %vm1803_vm4, %v1787_v10, %v6620_v42  ;;  %v8535_v43 = vsel %vm1803_vm4, %v1788_v13, %v6621_v9  ;;  %v6624_v17 = vpop.permute.xlu1 %6623  ;;  %v10608_v10 = vpack.i.bf16 %v8437_v56, %v8435_v59  ;;  %v6571_v13 = vunpack.i.h.bf16 %v8411_v40 }
  0xf7   : > { %v6626_v24 = vunpack.i.h.bf16 %v6624_v17  ;;  %v6625_v46 = vunpack.i.l.bf16 %v6624_v17  ;;  %v6629_v45 = vpop.permute.xlu0 %6628  ;;  %v1796_v34 = vsel %vm1770_vm3, %v1763_v58, %v6561_v4  ;;  %v6496_v58 = vunpack.i.h.bf16 %v8355_v29 }
  0xf8   : > { %v6631_v50 = vunpack.i.h.bf16 %v6629_v45  ;;  %v6630_v47 = vunpack.i.l.bf16 %v6629_v45  ;;  %6913 = vrot.lane.b32.xlu1 %v8152_v7, %s7717_s22  ;;  %v1799_v45 = vsel %vm1770_vm3, %v8519_v8, %v6570_v5  ;;  %v1800_v61 = vsel %vm1770_vm3, %v8515_v2, %v6571_v13  ;;  %v671_v2 = vld [vmem:[#allocation2 + $0x190] sm:$0xff] }
  0xf9   : > { %v8546_v30 = vsel %vm1803_vm4, %v1789_v6, %v6625_v46  ;;  %v8549_v31 = vsel %vm1803_vm4, %v1790_v11, %v6626_v24  ;;  %6918 = vrot.lane.b32.xlu0 %v10607_v27, %s7718_s24  ;;  %v6575_v24 = vunpack.i.l.bf16 %v8417_v52  ;;  %v1768_v27 = vsel %vm350_vm0, %v8174_v25, %v6495_v1  ;;  %v705_v13 = vld [vmem:[#allocation2 + $0x1b1] sm:$0xff] }
  0xfa   : > { %v8558_v7 = vsel %vm1803_vm4, %v1791_v39, %v6630_v47  ;;  %v8561_v53 = vsel %vm1803_vm4, %v1792_v36, %v6631_v50  ;;  %v6634_v54 = vpop.permute.xlu1 %6633  ;;  %v670_v39 = vld [vmem:[#allocation2 + $0x188] sm:$0xff]  ;;  %v1769_v36 = vsel %vm350_vm0, %v8176_v26, %v6496_v58  ;;  %v10613_v25 = vpack.i.bf16 %v8444_v28, %v8442_v37  ;;  %v612_v1 = vld [vmem:[#allocation2 + $0x1d1] sm:$0xff] }
  0xfb   : > { %v6636_v63 = vunpack.i.h.bf16 %v6634_v54  ;;  %v6635_v9 = vunpack.i.l.bf16 %v6634_v54  ;;  %v6639_v42 = vpop.permute.xlu0 %6638  ;;  %v1801_v57 = vsel %vm1770_vm3, %v1768_v27, %v6575_v24  ;;  %v611_v37 = vld [vmem:[#allocation2 + $0x1c9] sm:$0xff] }
  0xfc   : > { %v6641_v18 = vunpack.i.h.bf16 %v6639_v42  ;;  %v6640_v55 = vunpack.i.l.bf16 %v6639_v42  ;;  %6923 = vrot.lane.b32.xlu1 %v10608_v10, %s7718_s24  ;;  %v672_v42 = vld [vmem:[#allocation2 + $0x1a8] sm:$0xff] }
  0xfd   : > { %v8574_v51 = vsel %vm1803_vm4, %v1793_v60, %v6635_v9  ;;  %v8577_v12 = vsel %vm1803_vm4, %v1794_v23, %v6636_v63  ;;  %6928 = vrot.lane.b32.xlu0 %v8450_v62, %s7719_s26  ;;  %v6576_v62 = vunpack.i.h.bf16 %v8417_v52  ;;  %v640_v52 = vld [vmem:[#allocation2 + $0x1a7] sm:$0xff]  ;;  %v6957_v9 = vpack.i.bf16 %v671_v2, %v670_v39  ;;  %v645_v24 = vld [vmem:[#allocation2 + $0x1ef] sm:$0xff] }
  0xfe   : > { %v8584_v59 = vsel %vm1803_vm4, %v1795_v35, %v6640_v55  ;;  %v8587_v56 = vsel %vm1803_vm4, %v1796_v34, %v6641_v18  ;;  %v6644_v40 = vpop.permute.xlu1 %6643  ;;  %v6952_v3 = vpack.i.bf16 %v641_v15, %v640_v52  ;;  %v673_v35 = vld [vmem:[#allocation2 + $0x1b0] sm:$0xff]  ;;  %v676_v15 = vld [vmem:[#allocation2 + $0x1e8] sm:$0xff] }
  0xff   : > { %v6646_v17 = vunpack.i.h.bf16 %v6644_v40  ;;  %v6645_v11 = vunpack.i.l.bf16 %v6644_v40  ;;  %v6649_v6 = vpop.permute.xlu0 %6648  ;;  %v1802_v54 = vsel %vm1770_vm3, %v1769_v36, %v6576_v62  ;;  %v6962_v55 = vpack.i.bf16 %v673_v35, %v672_v42  ;;  %v704_v10 = vld [vmem:[#allocation2 + $0x1a9] sm:$0xff] }
 0x100   : > { %v6651_v46 = vunpack.i.h.bf16 %v6649_v6  ;;  %v6650_v29 = vunpack.i.l.bf16 %v6649_v6  ;;  %6933 = vrot.lane.b32.xlu1 %v8459_v48, %s7719_s26  ;;  %v6972_v28 = vpack.i.bf16 %v705_v13, %v704_v10  ;;  %v644_v62 = vld [vmem:[#allocation2 + $0x1e7] sm:$0xff]  ;;  %v6420_v42 = vunpack.i.l.bf16 %v8285_v0  ;;  %v647_v10 = vld [vmem:[#allocation2 + $0x20f] sm:$0xff] }
 0x101   : > { %v8600_v44 = vsel %vm1803_vm4, %v1797_v19, %v6645_v11  ;;  %v8603_v4 = vsel %vm1803_vm4, %v1798_v20, %v6646_v17  ;;  %6938 = vrot.lane.b32.xlu0 %v8459_v48, %s7716_s19  ;;  %v642_v20 = vld [vmem:[#allocation2 + $0x1c7] sm:$0xff]  ;;  %v643_v19 = vld [vmem:[#allocation2 + $0x1cf] sm:$0xff]  ;;  %v6982_v11 = vpack.i.bf16 %v612_v1, %v611_v37  ;;  %v6430_v37 = vunpack.i.l.bf16 %v8291_v33 }
 0x102   : > { %v8608_v50 = vsel %vm1803_vm4, %v1799_v45, %v6650_v29  ;;  %v8611_v47 = vsel %vm1803_vm4, %v1800_v61, %v6651_v46  ;;  %v6654_v8 = vpop.permute.xlu1 %6653  ;;  %v6987_v6 = vpack.i.bf16 %v643_v19, %v642_v20  ;;  %v674_v29 = vld [vmem:[#allocation2 + $0x1c8] sm:$0xff]  ;;  %v6992_v61 = vpack.i.bf16 %v645_v24, %v644_v62 }
 0x103   : > { %10609 = vst [vmem:[#allocation27_spill] sm:$0xff] %v8608_v50  ;;  %10610 = vst [vmem:[#allocation28_spill] sm:$0xff] %v8611_v47  ;;  %v6656_v23 = vunpack.i.h.bf16 %v6654_v8  ;;  %v6655_v60 = vunpack.i.l.bf16 %v6654_v8  ;;  %v8617_v48 = vpop.permute.xlu0 %6658  ;;  %v677_v8 = vld [vmem:[#allocation2 + $0x1f0] sm:$0xff]  ;;  %v425_v13 = vld [vmem:[#allocation2 + $0x7] sm:$0xff]  ;;  %v6431_v19 = vunpack.i.h.bf16 %v8291_v33  ;;  %v8690_v33 = vsel %vm350_vm0, %v8086_v21, %v6430_v37 }
 0x104   : > { %6943 = vrot.lane.b32.xlu1 %v8465_v38, %s7716_s19  ;;  %v7002_v36 = vpack.i.bf16 %v677_v8, %v676_v15  ;;  %v708_v27 = vld [vmem:[#allocation2 + $0x1e9] sm:$0xff] }
 0x105   : > { %v8624_v63 = vsel %vm1803_vm4, %v1801_v57, %v6655_v60  ;;  %v8627_v26 = vsel %vm1803_vm4, %v1802_v54, %v6656_v23  ;;  %6948 = vrot.lane.b32.xlu0 %v10613_v25, %s7717_s22  ;;  %v709_v23 = vld [vmem:[#allocation2 + $0x1f1] sm:$0xff]  ;;  %v648_v20 = vld [vmem:[#allocation2 + $0x227] sm:$0xff] }
 0x106   : > { %10611 = vst [vmem:[#allocation29_spill] sm:$0xff] %v8624_v63  ;;  %10612 = vst [vmem:[#allocation30_spill] sm:$0xff] %v8627_v26  ;;  %v8633_v34 = vpop.permute.xlu1 %6663  ;;  %v7012_v57 = vpack.i.bf16 %v709_v23, %v708_v27  ;;  %v616_v25 = vld [vmem:[#allocation2 + $0x211] sm:$0xff]  ;;  %v678_v24 = vld [vmem:[#allocation2 + $0x208] sm:$0xff] }
 0x107   : > { %v8635_v18 = vpop.permute.xlu0 %6668  ;;  %v649_v62 = vld [vmem:[#allocation2 + $0x22f] sm:$0xff] }
 0x108   : > { %6953 = vrot.lane.b32.xlu1 %v6952_v3, %s7717_s22  ;;  %v615_v3 = vld [vmem:[#allocation2 + $0x209] sm:$0xff]  ;;  %v7032_v8 = vpack.i.bf16 %v649_v62, %v648_v20 }
 0x109   : > { %6958 = vrot.lane.b32.xlu0 %v6957_v9, %s7718_s24  ;;  %v6421_v9 = vunpack.i.h.bf16 %v8285_v0  ;;  %v8681_v0 = vpack.i.bf16 %v616_v25, %v615_v3  ;;  %v680_v27 = vld [vmem:[#allocation2 + $0x228] sm:$0xff]  ;;  %v681_v23 = vld [vmem:[#allocation2 + $0x230] sm:$0xff]  ;;  %v10614_v25 = vld [vmem:[#allocation7_spill] sm:$0xff] }
 0x10a   : > { %v8639_v5 = vpop.permute.xlu1 %6673  ;;  %v712_v21 = vld [vmem:[#allocation2 + $0x229] sm:$0xff] }
 0x10b   : > { %v8641_v58 = vpop.permute.xlu0 %6678 }
 0x10c   : > { %6963 = vrot.lane.b32.xlu1 %v6962_v55, %s7718_s24  ;;  %v646_v55 = vld [vmem:[#allocation2 + $0x207] sm:$0xff] }
 0x10d   : > { %6968 = vrot.lane.b32.xlu0 %v8465_v38, %s7719_s26  ;;  %v675_v38 = vld [vmem:[#allocation2 + $0x1d0] sm:$0xff] }
 0x10e   : > { %v8646_v40 = vpop.permute.xlu1 %6683  ;;  %v6997_v52 = vpack.i.bf16 %v675_v38, %v674_v29  ;;  %v679_v29 = vld [vmem:[#allocation2 + $0x210] sm:$0xff]  ;;  %v7027_v38 = vpack.i.bf16 %v647_v10, %v646_v55  ;;  %v10615_v55 = vld [vmem:[#allocation8_spill] sm:$0xff] }
 0x10f   : > { %v8648_v17 = vpop.permute.xlu0 %6688 }
 0x110   : > { %6973 = vrot.lane.b32.xlu1 %v6972_v28, %s7719_s26 }
 0x111   : > { %6978 = vrot.lane.b32.xlu0 %v6972_v28, %s7716_s19  ;;  %v426_v28 = vld [vmem:[#allocation2 + $0xf] sm:$0xff] }
 0x112   : > { %v8652_v46 = vpop.permute.xlu1 %6693 }
 0x113   : > { %v8654_v45 = vpop.permute.xlu0 %6698 }
 0x114   : > { %6983 = vrot.lane.b32.xlu1 %v6982_v11, %s7716_s19 }
 0x115   : > { %6988 = vrot.lane.b32.xlu0 %v6987_v6, %s7717_s22  ;;  %v6425_v6 = vunpack.i.l.bf16 %v8293_v49 }
 0x116   : > { %v8658_v39 = vpop.permute.xlu1 %6703 }
 0x117   : > { %v8660_v2 = vpop.permute.xlu0 %6708  ;;  %v1740_v3 = vsel %vm350_vm0, %v8078_v16, %v6425_v6  ;;  %v6660_v16 = vunpack.i.l.bf16 %v8617_v48 }
 0x118   : > { %6993 = vrot.lane.b32.xlu1 %v6992_v61, %s7717_s22  ;;  %v1738_v61 = vsel %vm350_vm0, %v425_v13, %v6420_v42  ;;  %v713_v42 = vld [vmem:[#allocation2 + $0x231] sm:$0xff] }
 0x119   : > { %6998 = vrot.lane.b32.xlu0 %v6997_v52, %s7718_s24  ;;  %v1739_v52 = vsel %vm350_vm0, %v426_v28, %v6421_v9  ;;  %v10616_v13 = vld [vmem:[#allocation13_spill] sm:$0xff]  ;;  %v7052_v63 = vpack.i.bf16 %v713_v42, %v712_v21 }
 0x11a   : > { %v8664_v60 = vpop.permute.xlu1 %6713  ;;  %v6501_v28 = vunpack.i.h.bf16 %v10616_v13  ;;  %v6500_v37 = vunpack.i.l.bf16 %v10616_v13  ;;  %v10620_v13 = vld [vmem:[#allocation22_spill] sm:$0xff] }
 0x11b   : > { %v8666_v54 = vpop.permute.xlu0 %6718  ;;  %v6586_v47 = vunpack.i.h.bf16 %v10620_v13  ;;  %v6585_v50 = vunpack.i.l.bf16 %v10620_v13 }
 0x11c   : > { %7003 = vrot.lane.b32.xlu1 %v7002_v36, %s7718_s24  ;;  %v7037_v36 = vpack.i.bf16 %v679_v29, %v678_v24  ;;  %v7042_v24 = vpack.i.bf16 %v681_v23, %v680_v27  ;;  %v10619_v29 = vld [vmem:[#allocation9_spill] sm:$0xff]  ;;  %v1771_v27 = vsel %vm1770_vm3, %v1738_v61, %v6500_v37 }
 0x11d   : > { %7008 = vrot.lane.b32.xlu0 %v6982_v11, %s7719_s26  ;;  %v6426_v11 = vunpack.i.h.bf16 %v8293_v49 }
 0x11e   : > { %v8672_v35 = vpop.permute.xlu1 %6723 }
 0x11f   : > { %v8675_v1 = vpop.permute.xlu0 %6728  ;;  %v1741_v9 = vsel %vm350_vm0, %v10614_v25, %v6426_v11  ;;  %v10618_v11 = vld [vmem:[#allocation21_spill] sm:$0xff] }
 0x120   : > { %7013 = vrot.lane.b32.xlu1 %v7012_v57, %s7719_s26  ;;  %v6580_v6 = vunpack.i.l.bf16 %v10618_v11  ;;  %v6581_v10 = vunpack.i.h.bf16 %v10618_v11 }
 0x121   : > { %7018 = vrot.lane.b32.xlu0 %v7012_v57, %s7716_s19  ;;  %v8694_v57 = vsel %vm350_vm0, %v8088_v22, %v6431_v19  ;;  %v10617_v22 = vld [vmem:[#allocation14_spill] sm:$0xff] }
 0x122   : > { %v8686_v15 = vpop.permute.xlu1 %6733  ;;  %v6505_v20 = vunpack.i.l.bf16 %v10617_v22  ;;  %v6506_v19 = vunpack.i.h.bf16 %v10617_v22  ;;  %v1772_v22 = vsel %vm1770_vm3, %v1739_v52, %v6501_v28  ;;  %v1804_v42 = vsel %vm1803_vm4, %v1771_v27, %v6580_v6 }
 0x123   : > { %v6739_v49 = vpop.permute.xlu0 %6738  ;;  %v1837_v37 = vsel %vm1836_vm1, %v1804_v42, %v6660_v16 }
 0x124   : > { %7023 = vrot.lane.b32.xlu1 %v8681_v0, %s7716_s19  ;;  %v1773_v23 = vsel %vm1770_vm3, %v1740_v3, %v6505_v20  ;;  %v1774_v21 = vsel %vm1770_vm3, %v1741_v9, %v6506_v19  ;;  %v6741_v11 = vunpack.i.h.bf16 %v6739_v49  ;;  %v6740_v13 = vunpack.i.l.bf16 %v6739_v49 }
 0x125   : > { %7028 = vrot.lane.b32.xlu0 %v7027_v38, %s7717_s22  ;;  %v6661_v38 = vunpack.i.h.bf16 %v8617_v48  ;;  %v1805_v48 = vsel %vm1803_vm4, %v1772_v22, %v6581_v10  ;;  %v1806_v3 = vsel %vm1803_vm4, %v1773_v23, %v6585_v50  ;;  %v6666_v49 = vunpack.i.h.bf16 %v8633_v34 }
 0x126   : > { %v6744_v62 = vpop.permute.xlu1 %6743 }
 0x127   : > { %v6749_v26 = vpop.permute.xlu0 %6748  ;;  %v1838_v9 = vsel %vm1836_vm1, %v1805_v48, %v6661_v38  ;;  %v6745_v20 = vunpack.i.l.bf16 %v6744_v62  ;;  %v6746_v6 = vunpack.i.h.bf16 %v6744_v62 }
 0x128   : > { %7033 = vrot.lane.b32.xlu1 %v7032_v8, %s7717_s22  ;;  %v6665_v8 = vunpack.i.l.bf16 %v8633_v34  ;;  %v6751_v52 = vunpack.i.h.bf16 %v6749_v26  ;;  %v6750_v28 = vunpack.i.l.bf16 %v6749_v26  ;;  %v1870_v26 = vsel %vm1869_vm5, %v1837_v37, %v6740_v13 }
 0x129   : > { %7038 = vrot.lane.b32.xlu0 %v7037_v36, %s7718_s24  ;;  %v1807_v36 = vsel %vm1803_vm4, %v1774_v21, %v6586_v47  ;;  %v1871_v50 = vsel %vm1869_vm5, %v1838_v9, %v6741_v11 }
 0x12a   : > { %v6754_v25 = vpop.permute.xlu1 %6753  ;;  %v1839_v16 = vsel %vm1836_vm1, %v1806_v3, %v6665_v8  ;;  %v1904_v34 = vsel %vm1902_vm6, %v1871_v50, %v6751_v52 }
 0x12b   : > { %v6759_v61 = vpop.permute.xlu0 %6758  ;;  %v6755_v47 = vunpack.i.l.bf16 %v6754_v25  ;;  %v6756_v38 = vunpack.i.h.bf16 %v6754_v25  ;;  %v1872_v62 = vsel %vm1869_vm5, %v1839_v16, %v6745_v20  ;;  %v10621_v20 = vld [vmem:[#allocation15_spill] sm:$0xff] }
 0x12c   : > { %7043 = vrot.lane.b32.xlu1 %v7042_v24, %s7718_s24  ;;  %v6761_v19 = vunpack.i.h.bf16 %v6759_v61  ;;  %v6760_v10 = vunpack.i.l.bf16 %v6759_v61  ;;  %v1903_v24 = vsel %vm1902_vm6, %v1870_v26, %v6750_v28  ;;  %v6510_v50 = vunpack.i.l.bf16 %v10621_v20 }
 0x12d   : > { %7048 = vrot.lane.b32.xlu0 %v8681_v0, %s7719_s26  ;;  %v1840_v0 = vsel %vm1836_vm1, %v1807_v36, %v6666_v49  ;;  %v1905_v8 = vsel %vm1902_vm6, %v1872_v62, %v6755_v47  ;;  %v6440_v49 = vunpack.i.l.bf16 %v10619_v29  ;;  %v10625_v62 = vunpack.i.l.bf16 %v10615_v55 }
 0x12e   : > { %v6764_v22 = vpop.permute.xlu1 %6763  ;;  %v1936_v11 = vsel %vm1935_vm7, %v1903_v24, %v6760_v10  ;;  %v1937_v13 = vsel %vm1935_vm7, %v1904_v34, %v6761_v19  ;;  %v1873_v25 = vsel %vm1869_vm5, %v1840_v0, %v6746_v6  ;;  %v6511_v10 = vunpack.i.h.bf16 %v10621_v20  ;;  %v10622_v6 = vld [vmem:[#allocation16_spill] sm:$0xff] }
 0x12f   : > { %v6769_v27 = vpop.permute.xlu0 %6768  ;;  %v6766_v23 = vunpack.i.h.bf16 %v6764_v22  ;;  %v6765_v21 = vunpack.i.l.bf16 %v6764_v22  ;;  %v1906_v3 = vsel %vm1902_vm6, %v1873_v25, %v6756_v38  ;;  %v6516_v47 = vunpack.i.h.bf16 %v10622_v6  ;;  %v7629_v38 = vld [vmem:[#allocation2 + $0x6f] sm:$0xff]  ;;  %v7630_v0 = vld [vmem:[#allocation2 + $0x67] sm:$0xff] }
 0x130   : > { %v6771_v42 = vunpack.i.h.bf16 %v6769_v27  ;;  %v6770_v48 = vunpack.i.l.bf16 %v6769_v27  ;;  %7053 = vrot.lane.b32.xlu1 %v7052_v63, %s7719_s26  ;;  %v10623_v27 = vunpack.i.h.bf16 %v10615_v55  ;;  %v6515_v34 = vunpack.i.l.bf16 %v10622_v6 }
 0x131   : > { %v1938_v19 = vsel %vm1935_vm7, %v1905_v8, %v6765_v21  ;;  %v1939_v26 = vsel %vm1935_vm7, %v1906_v3, %v6766_v23  ;;  %v10624_v21 = vld [vmem:[#allocation23_spill] sm:$0xff]  ;;  %v10626_v25 = vunpack.i.h.bf16 %v10619_v29  ;;  %v6671_v20 = vunpack.i.h.bf16 %v8635_v18 }
 0x132   : > { %v6774_v28 = vpop.permute.xlu1 %6773  ;;  %v1969_v52 = vsel %vm1968_vm8, %v1936_v11, %v6770_v48  ;;  %v1970_v61 = vsel %vm1968_vm8, %v1937_v13, %v6771_v42  ;;  %v1745_v24 = vsel %vm350_vm0, %v7629_v38, %v10623_v27  ;;  %v6590_v42 = vunpack.i.l.bf16 %v10624_v21  ;;  %v7631_v13 = vld [vmem:[#allocation2 + $0x8f] sm:$0xff] }
 0x133   : > { %v6776_v63 = vunpack.i.h.bf16 %v6774_v28  ;;  %v6775_v37 = vunpack.i.l.bf16 %v6774_v28  ;;  %v6779_v36 = vpop.permute.xlu0 %6778  ;;  %v2001_v9 = vpack.c.bf16 %v1970_v61, %v1969_v52  ;;  %v1744_v11 = vsel %vm350_vm0, %v7630_v0, %v10625_v62  ;;  %v10627_v28 = vld [vmem:[#allocation10_spill] sm:$0xff] }
 0x134   : > { %v8768_v8 = vsel %vm350_vm0, %v7631_v13, %v10626_v25  ;;  %v6446_v52 = vunpack.i.h.bf16 %v10627_v28  ;;  %v6591_v61 = vunpack.i.h.bf16 %v10624_v21  ;;  %v6670_v55 = vunpack.i.l.bf16 %v8635_v18 }
 0x135   : > { %v1971_v22 = vsel %vm1968_vm8, %v1938_v19, %v6775_v37  ;;  %v1972_v16 = vsel %vm1968_vm8, %v1939_v26, %v6776_v63  ;;  %6310 = vmatprep.mubr.msk.bf16.mxu0 %vm2037_vm9, %v2001_v9  ;;  %v10628_v63 = vld [vmem:[#allocation24_spill] sm:$0xff]  ;;  %v6445_v19 = vunpack.i.l.bf16 %v10627_v28  ;;  %v1776_v26 = vsel %vm1770_vm3, %v8694_v57, %v6511_v10 }
 0x136   : > { %v6784_v23 = vpop.permute.xlu1 %6783  ;;  %v2002_v48 = vpack.c.bf16 %v1972_v16, %v1971_v22  ;;  %v6596_v37 = vunpack.i.h.bf16 %v10628_v63  ;;  %v6595_v9 = vunpack.i.l.bf16 %v10628_v63  ;;  %v1775_v6 = vsel %vm1770_vm3, %v8690_v33, %v6510_v50 }
 0x137   : > { %v6789_v3 = vpop.permute.xlu0 %6788  ;;  %v1778_v22 = vsel %vm1770_vm3, %v1745_v24, %v6516_v47  ;;  %v1777_v16 = vsel %vm1770_vm3, %v1744_v11, %v6515_v34  ;;  %v1808_v38 = vsel %vm1803_vm4, %v1775_v6, %v6590_v42  ;;  %v6781_v27 = vunpack.i.h.bf16 %v6779_v36 }
 0x138   : > { %6311 = vmatmul.mubr.msk.bf16.vlgmr.msra.gmra.mrb[0].mxu0 %vm2037_vm9, %v2002_v48  ;;  %v6780_v21 = vunpack.i.l.bf16 %v6779_v36  ;;  %v1809_v18 = vsel %vm1803_vm4, %v1776_v26, %v6591_v61  ;;  %v6675_v48 = vunpack.i.l.bf16 %v8639_v5  ;;  %v6791_v62 = vunpack.i.h.bf16 %v6789_v3 }
 0x139   : > { %v6790_v13 = vunpack.i.l.bf16 %v6789_v3  ;;  %v1810_v57 = vsel %vm1803_vm4, %v1777_v16, %v6595_v9  ;;  %v1811_v33 = vsel %vm1803_vm4, %v1778_v22, %v6596_v37  ;;  %v1841_v10 = vsel %vm1836_vm1, %v1808_v38, %v6670_v55 }
 0x13a   : > { %v6794_v0 = vpop.permute.xlu1 %6793  ;;  %v1842_v50 = vsel %vm1836_vm1, %v1809_v18, %v6671_v20  ;;  %v6676_v47 = vunpack.i.h.bf16 %v8639_v5  ;;  %v6785_v24 = vunpack.i.l.bf16 %v6784_v23  ;;  %v1874_v42 = vsel %vm1869_vm5, %v1841_v10, %v6780_v21 }
 0x13b   : > { %v6799_v25 = vpop.permute.xlu0 %6798  ;;  %v1875_v11 = vsel %vm1869_vm5, %v1842_v50, %v6781_v27  ;;  %v6786_v61 = vunpack.i.h.bf16 %v6784_v23  ;;  %v6795_v3 = vunpack.i.l.bf16 %v6794_v0  ;;  %v1843_v9 = vsel %vm1836_vm1, %v1810_v57, %v6675_v48 }
 0x13c   : > { %v6801_v36 = vunpack.i.h.bf16 %v6799_v25  ;;  %v6800_v34 = vunpack.i.l.bf16 %v6799_v25  ;;  %v1907_v37 = vsel %vm1902_vm6, %v1874_v42, %v6790_v13  ;;  %v1908_v55 = vsel %vm1902_vm6, %v1875_v11, %v6791_v62 }
 0x13d   : > { %v6796_v26 = vunpack.i.h.bf16 %v6794_v0  ;;  %v1844_v38 = vsel %vm1836_vm1, %v1811_v33, %v6676_v47  ;;  %v1876_v21 = vsel %vm1869_vm5, %v1843_v9, %v6785_v24  ;;  %v7632_v47 = vld [vmem:[#allocation2 + $0x87] sm:$0xff] }
 0x13e   : > { %v6804_v63 = vpop.permute.xlu1 %6803  ;;  %v1940_v23 = vsel %vm1935_vm7, %v1907_v37, %v6800_v34  ;;  %v1941_v27 = vsel %vm1935_vm7, %v1908_v55, %v6801_v36  ;;  %v1877_v18 = vsel %vm1869_vm5, %v1844_v38, %v6786_v61  ;;  %v1909_v48 = vsel %vm1902_vm6, %v1876_v21, %v6795_v3  ;;  %v10629_v36 = vld [vmem:[#allocation17_spill] sm:$0xff]  ;;  %v10630_v3 = vld [vmem:[#allocation18_spill] sm:$0xff]  ;;  %v10631_v55 = vld [vmem:[#allocation11_spill] sm:$0xff] }
 0x13f   : > { %v6809_v20 = vpop.permute.xlu0 %6808  ;;  %v6806_v6 = vunpack.i.h.bf16 %v6804_v63  ;;  %v6805_v5 = vunpack.i.l.bf16 %v6804_v63  ;;  %v1910_v25 = vsel %vm1902_vm6, %v1877_v18, %v6796_v26  ;;  %v1746_v24 = vsel %vm350_vm0, %v7632_v47, %v6440_v49  ;;  %v10632_v26 = vld [vmem:[#allocation25_spill] sm:$0xff]  ;;  %v7634_v38 = vld [vmem:[#allocation2 + $0xa7] sm:$0xff] }
 0x140   : > { %v6811_v22 = vunpack.i.h.bf16 %v6809_v20  ;;  %v6810_v16 = vunpack.i.l.bf16 %v6809_v20  ;;  %v6521_v34 = vunpack.i.h.bf16 %v10629_v36  ;;  %v6520_v61 = vunpack.i.l.bf16 %v10629_v36 }
 0x141   : > { %v1942_v42 = vsel %vm1935_vm7, %v1909_v48, %v6805_v5  ;;  %v1943_v11 = vsel %vm1935_vm7, %v1910_v25, %v6806_v6  ;;  %v6526_v63 = vunpack.i.h.bf16 %v10630_v3  ;;  %v6451_v29 = vunpack.i.h.bf16 %v10631_v55  ;;  %v10633_v48 = vld [vmem:[#allocation26_spill] sm:$0xff] }
 0x142   : > { %v1973_v62 = vsel %vm1968_vm8, %v1940_v23, %v6810_v16  ;;  %v1974_v0 = vsel %vm1968_vm8, %v1941_v27, %v6811_v22  ;;  %v6814_v13 = vpop.permute.xlu1 %6813  ;;  %v6525_v49 = vunpack.i.l.bf16 %v10630_v3  ;;  %v6600_v20 = vunpack.i.l.bf16 %v10632_v26  ;;  %v7633_v16 = vld [vmem:[#allocation2 + $0xaf] sm:$0xff] }
 0x143   : > { %v6816_v57 = vunpack.i.h.bf16 %v6814_v13  ;;  %v6815_v10 = vunpack.i.l.bf16 %v6814_v13  ;;  %v6819_v33 = vpop.permute.xlu0 %6818  ;;  %v2003_v50 = vpack.c.bf16 %v1974_v0, %v1973_v62  ;;  %v1749_v6 = vsel %vm350_vm0, %v7633_v16, %v6446_v52  ;;  %v10634_v52 = vld [vmem:[#allocation12_spill] sm:$0xff] }
 0x144   : > { %v1748_v21 = vsel %vm350_vm0, %v7634_v38, %v6445_v19  ;;  %v6450_v23 = vunpack.i.l.bf16 %v10631_v55  ;;  %v6601_v27 = vunpack.i.h.bf16 %v10632_v26  ;;  %v6606_v62 = vunpack.i.h.bf16 %v10633_v48  ;;  %v7638_v55 = vld [vmem:[#allocation2 + $0xe7] sm:$0xff] }
 0x145   : > { %v1975_v9 = vsel %vm1968_vm8, %v1942_v42, %v6815_v10  ;;  %v1976_v37 = vsel %vm1968_vm8, %v1943_v11, %v6816_v57  ;;  %6314 = vmatprep.mubr.msk.bf16.mxu0 %vm2037_vm9, %v2003_v50  ;;  %v6605_v0 = vunpack.i.l.bf16 %v10633_v48  ;;  %v6681_v13 = vunpack.i.h.bf16 %v8641_v58 }
 0x146   : > { %v6824_v22 = vpop.permute.xlu1 %6823  ;;  %v2004_v5 = vpack.c.bf16 %v1976_v37, %v1975_v9  ;;  %v6680_v25 = vunpack.i.l.bf16 %v8641_v58  ;;  %v6456_v57 = vunpack.i.h.bf16 %v10634_v52  ;;  %v1779_v28 = vsel %vm1770_vm3, %v1746_v24, %v6520_v61 }
 0x147   : > { %v6829_v18 = vpop.permute.xlu0 %6828  ;;  %v1780_v19 = vsel %vm1770_vm3, %v8768_v8, %v6521_v34  ;;  %v1782_v10 = vsel %vm1770_vm3, %v1749_v6, %v6526_v63  ;;  %v1781_v50 = vsel %vm1770_vm3, %v1748_v21, %v6525_v49  ;;  %v1812_v47 = vsel %vm1803_vm4, %v1779_v28, %v6600_v20 }
 0x148   : > { %6315 = vmatmul.mubr.msk.bf16.gmra.mrb[4].mxu0 %vm2037_vm9, %v2004_v5  ;;  %v6821_v36 = vunpack.i.h.bf16 %v6819_v33  ;;  %v6820_v42 = vunpack.i.l.bf16 %v6819_v33  ;;  %v1813_v58 = vsel %vm1803_vm4, %v1780_v19, %v6601_v27  ;;  %v6685_v3 = vunpack.i.l.bf16 %v8646_v40 }
 0x149   : > { %v6831_v9 = vunpack.i.h.bf16 %v6829_v18  ;;  %v6830_v37 = vunpack.i.l.bf16 %v6829_v18  ;;  %v1814_v24 = vsel %vm1803_vm4, %v1781_v50, %v6605_v0  ;;  %v1815_v8 = vsel %vm1803_vm4, %v1782_v10, %v6606_v62 }
 0x14a   : > { %v6834_v11 = vpop.permute.xlu1 %6833  ;;  %v1845_v34 = vsel %vm1836_vm1, %v1812_v47, %v6680_v25  ;;  %v1846_v61 = vsel %vm1836_vm1, %v1813_v58, %v6681_v13  ;;  %v6686_v63 = vunpack.i.h.bf16 %v8646_v40  ;;  %v6825_v49 = vunpack.i.l.bf16 %v6824_v22 }
 0x14b   : > { %v6839_v26 = vpop.permute.xlu0 %6838  ;;  %v1878_v5 = vsel %vm1869_vm5, %v1845_v34, %v6820_v42  ;;  %v1879_v16 = vsel %vm1869_vm5, %v1846_v61, %v6821_v36  ;;  %v6826_v6 = vunpack.i.h.bf16 %v6824_v22  ;;  %v6835_v38 = vunpack.i.l.bf16 %v6834_v11  ;;  %v10635_v34 = vld [vmem:[#allocation19_spill] sm:$0xff] }
 0x14c   : > { %v6841_v33 = vunpack.i.h.bf16 %v6839_v26  ;;  %v6840_v20 = vunpack.i.l.bf16 %v6839_v26  ;;  %v1847_v27 = vsel %vm1836_vm1, %v1814_v24, %v6685_v3  ;;  %v1911_v18 = vsel %vm1902_vm6, %v1878_v5, %v6830_v37 }
 0x14d   : > { %v1912_v48 = vsel %vm1902_vm6, %v1879_v16, %v6831_v9  ;;  %v6836_v62 = vunpack.i.h.bf16 %v6834_v11  ;;  %v1848_v19 = vsel %vm1836_vm1, %v1815_v8, %v6686_v63  ;;  %v1880_v10 = vsel %vm1869_vm5, %v1847_v27, %v6825_v49 }
 0x14e   : > { %v6844_v21 = vpop.permute.xlu1 %6843  ;;  %v1944_v22 = vsel %vm1935_vm7, %v1911_v18, %v6840_v20  ;;  %v1945_v50 = vsel %vm1935_vm7, %v1912_v48, %v6841_v33  ;;  %v1881_v47 = vsel %vm1869_vm5, %v1848_v19, %v6826_v6  ;;  %v1913_v36 = vsel %vm1902_vm6, %v1880_v10, %v6835_v38  ;;  %v10636_v20 = vld [vmem:[#allocation20_spill] sm:$0xff] }
 0x14f   : > { %v6849_v0 = vpop.permute.xlu0 %6848  ;;  %v6846_v13 = vunpack.i.h.bf16 %v6844_v21  ;;  %v6845_v40 = vunpack.i.l.bf16 %v6844_v21  ;;  %v1914_v3 = vsel %vm1902_vm6, %v1881_v47, %v6836_v62  ;;  %v6455_v8 = vunpack.i.l.bf16 %v10634_v52  ;;  %v7635_v48 = vld [vmem:[#allocation2 + $0xcf] sm:$0xff] }
 0x150   : > { %v6851_v25 = vunpack.i.h.bf16 %v6849_v0  ;;  %v6850_v28 = vunpack.i.l.bf16 %v6849_v0  ;;  %v6531_v61 = vunpack.i.h.bf16 %v10635_v34  ;;  %v6530_v33 = vunpack.i.l.bf16 %v10635_v34  ;;  %v7636_v0 = vld [vmem:[#allocation2 + $0xc7] sm:$0xff] }
 0x151   : > { %v1946_v63 = vsel %vm1935_vm7, %v1913_v36, %v6845_v40  ;;  %v1947_v49 = vsel %vm1935_vm7, %v1914_v3, %v6846_v13  ;;  %v6536_v5 = vunpack.i.h.bf16 %v10636_v20  ;;  %v6535_v38 = vunpack.i.l.bf16 %v10636_v20  ;;  %v7637_v40 = vld [vmem:[#allocation2 + $0xef] sm:$0xff] }
 0x152   : > { %v1977_v42 = vsel %vm1968_vm8, %v1944_v22, %v6850_v28  ;;  %v1978_v11 = vsel %vm1968_vm8, %v1945_v50, %v6851_v25  ;;  %v6854_v58 = vpop.permute.xlu1 %6853  ;;  %v6610_v21 = vunpack.i.l.bf16 %v8481_v14  ;;  %v1751_v62 = vsel %vm350_vm0, %v7635_v48, %v6451_v29 }
 0x153   : > { %v6856_v9 = vunpack.i.h.bf16 %v6854_v58  ;;  %v6855_v37 = vunpack.i.l.bf16 %v6854_v58  ;;  %v6859_v26 = vpop.permute.xlu0 %6858  ;;  %v2005_v24 = vpack.c.bf16 %v1978_v11, %v1977_v42  ;;  %v1750_v13 = vsel %vm350_vm0, %v7636_v0, %v6450_v23 }
 0x154   : > { %v1753_v25 = vsel %vm350_vm0, %v7637_v40, %v6456_v57  ;;  %v6611_v28 = vunpack.i.h.bf16 %v8481_v14  ;;  %v6616_v10 = vunpack.i.h.bf16 %v8505_v32  ;;  %v6615_v22 = vunpack.i.l.bf16 %v8505_v32 }
 0x155   : > { %v1979_v16 = vsel %vm1968_vm8, %v1946_v63, %v6855_v37  ;;  %v1980_v6 = vsel %vm1968_vm8, %v1947_v49, %v6856_v9  ;;  %6318 = vmatprep.mubr.msk.bf16.mxu0 %vm2037_vm9, %v2005_v24  ;;  %v6691_v50 = vunpack.i.h.bf16 %v8648_v17  ;;  %v6690_v29 = vunpack.i.l.bf16 %v8648_v17 }
 0x156   : > { %v6864_v27 = vpop.permute.xlu1 %6863  ;;  %v2006_v18 = vpack.c.bf16 %v1980_v6, %v1979_v16  ;;  %v1752_v23 = vsel %vm350_vm0, %v7638_v55, %v6455_v8  ;;  %v1783_v52 = vsel %vm1770_vm3, %v1750_v13, %v6530_v33  ;;  %v1784_v57 = vsel %vm1770_vm3, %v1751_v62, %v6531_v61 }
 0x157   : > { %v6869_v19 = vpop.permute.xlu0 %6868  ;;  %v1786_v14 = vsel %vm1770_vm3, %v1753_v25, %v6536_v5  ;;  %v1785_v47 = vsel %vm1770_vm3, %v1752_v23, %v6535_v38  ;;  %v1816_v36 = vsel %vm1803_vm4, %v1783_v52, %v6610_v21  ;;  %v6861_v32 = vunpack.i.h.bf16 %v6859_v26 }
 0x158   : > { %6319 = vmatmul.mubr.msk.bf16.gmra.mrb[8].mxu0 %vm2037_vm9, %v2006_v18  ;;  %v6860_v42 = vunpack.i.l.bf16 %v6859_v26  ;;  %v1817_v17 = vsel %vm1803_vm4, %v1784_v57, %v6611_v28  ;;  %v6695_v58 = vunpack.i.l.bf16 %v8652_v46  ;;  %v6871_v3 = vunpack.i.h.bf16 %v6869_v19 }
 0x159   : > { %v6870_v9 = vunpack.i.l.bf16 %v6869_v19  ;;  %v1818_v24 = vsel %vm1803_vm4, %v1785_v47, %v6615_v22  ;;  %v1819_v8 = vsel %vm1803_vm4, %v1786_v14, %v6616_v10  ;;  %v1849_v34 = vsel %vm1836_vm1, %v1816_v36, %v6690_v29 }
 0x15a   : > { %v6874_v11 = vpop.permute.xlu1 %6873  ;;  %v1850_v61 = vsel %vm1836_vm1, %v1817_v17, %v6691_v50  ;;  %v6696_v63 = vunpack.i.h.bf16 %v8652_v46  ;;  %v6865_v49 = vunpack.i.l.bf16 %v6864_v27  ;;  %v1882_v20 = vsel %vm1869_vm5, %v1849_v34, %v6860_v42 }
 0x15b   : > { %v6879_v37 = vpop.permute.xlu0 %6878  ;;  %v1883_v5 = vsel %vm1869_vm5, %v1850_v61, %v6861_v32  ;;  %v6866_v16 = vunpack.i.h.bf16 %v6864_v27  ;;  %v6875_v6 = vunpack.i.l.bf16 %v6874_v11  ;;  %v1851_v21 = vsel %vm1836_vm1, %v1818_v24, %v6695_v58 }
 0x15c   : > { %v6881_v26 = vunpack.i.h.bf16 %v6879_v37  ;;  %v6880_v33 = vunpack.i.l.bf16 %v6879_v37  ;;  %v1915_v18 = vsel %vm1902_vm6, %v1882_v20, %v6870_v9  ;;  %v1916_v48 = vsel %vm1902_vm6, %v1883_v5, %v6871_v3 }
 0x15d   : > { %v6876_v62 = vunpack.i.h.bf16 %v6874_v11  ;;  %v1852_v28 = vsel %vm1836_vm1, %v1819_v8, %v6696_v63  ;;  %v1884_v19 = vsel %vm1869_vm5, %v1851_v21, %v6865_v49  ;;  %v6701_v37 = vunpack.i.h.bf16 %v8654_v45 }
 0x15e   : > { %v6884_v38 = vpop.permute.xlu1 %6883  ;;  %v1948_v27 = vsel %vm1935_vm7, %v1915_v18, %v6880_v33  ;;  %v1949_v10 = vsel %vm1935_vm7, %v1916_v48, %v6881_v26  ;;  %v1885_v22 = vsel %vm1869_vm5, %v1852_v28, %v6866_v16  ;;  %v1917_v50 = vsel %vm1902_vm6, %v1884_v19, %v6875_v6 }
 0x15f   : > { %v6889_v0 = vpop.permute.xlu0 %6888  ;;  %v6886_v13 = vunpack.i.h.bf16 %v6884_v38  ;;  %v6885_v46 = vunpack.i.l.bf16 %v6884_v38  ;;  %v1918_v52 = vsel %vm1902_vm6, %v1885_v22, %v6876_v62  ;;  %v6700_v24 = vunpack.i.l.bf16 %v8654_v45 }
 0x160   : > { %v6891_v40 = vunpack.i.h.bf16 %v6889_v0  ;;  %v6890_v25 = vunpack.i.l.bf16 %v6889_v0  ;;  %v6705_v63 = vunpack.i.l.bf16 %v8658_v39  ;;  %v1854_v5 = vsel %vm1836_vm1, %v8535_v43, %v6701_v37 }
 0x161   : > { %v1950_v32 = vsel %vm1935_vm7, %v1917_v50, %v6885_v46  ;;  %v1951_v42 = vsel %vm1935_vm7, %v1918_v52, %v6886_v13  ;;  %v1853_v20 = vsel %vm1836_vm1, %v8532_v41, %v6700_v24  ;;  %v6706_v16 = vunpack.i.h.bf16 %v8658_v39 }
 0x162   : > { %v1981_v29 = vsel %vm1968_vm8, %v1948_v27, %v6890_v25  ;;  %v1982_v55 = vsel %vm1968_vm8, %v1949_v10, %v6891_v40  ;;  %v6894_v23 = vpop.permute.xlu1 %6893  ;;  %v1855_v13 = vsel %vm1836_vm1, %v8546_v30, %v6705_v63  ;;  %v6711_v37 = vunpack.i.h.bf16 %v8660_v2 }
 0x163   : > { %v6896_v57 = vunpack.i.h.bf16 %v6894_v23  ;;  %v6895_v14 = vunpack.i.l.bf16 %v6894_v23  ;;  %v6899_v47 = vpop.permute.xlu0 %6898  ;;  %v2007_v36 = vpack.c.bf16 %v1982_v55, %v1981_v29  ;;  %v1856_v27 = vsel %vm1836_vm1, %v8549_v31, %v6706_v16 }
 0x164   : > { %v6901_v8 = vunpack.i.h.bf16 %v6899_v47  ;;  %v6900_v34 = vunpack.i.l.bf16 %v6899_v47  ;;  %v6710_v24 = vunpack.i.l.bf16 %v8660_v2  ;;  %v6715_v63 = vunpack.i.l.bf16 %v8664_v60 }
 0x165   : > { %v1983_v11 = vsel %vm1968_vm8, %v1950_v32, %v6895_v14  ;;  %v1984_v17 = vsel %vm1968_vm8, %v1951_v42, %v6896_v57  ;;  %6322 = vmatprep.mubr.msk.bf16.mxu0 %vm2037_vm9, %v2007_v36  ;;  %v6716_v16 = vunpack.i.h.bf16 %v8664_v60  ;;  %vm5906_vm0 = vcmask 1042434  }
 0x166   : > { %v6904_v58 = vpop.permute.xlu1 %6903  ;;  %v2008_v3 = vpack.c.bf16 %v1984_v17, %v1983_v11  ;;  %v1886_v21 = vsel %vm1869_vm5, %v1853_v20, %v6900_v34  ;;  %v1887_v18 = vsel %vm1869_vm5, %v1854_v5, %v6901_v8  ;;  %v1857_v20 = vsel %vm1836_vm1, %v8558_v7, %v6710_v24 }
 0x167   : > { %v6909_v9 = vpop.permute.xlu0 %6908  ;;  %v6905_v6 = vunpack.i.l.bf16 %v6904_v58  ;;  %v6906_v48 = vunpack.i.h.bf16 %v6904_v58  ;;  %v1858_v5 = vsel %vm1836_vm1, %v8561_v53, %v6711_v37  ;;  %vm5910_vm3 = vcmask 1044484  }
 0x168   : > { %6323 = vmatmul.mubr.msk.bf16.gmra.mrb[12].mxu0 %vm2037_vm9, %v2008_v3  ;;  %v6911_v49 = vunpack.i.h.bf16 %v6909_v9  ;;  %v6910_v26 = vunpack.i.l.bf16 %v6909_v9  ;;  %vm5912_vm4 = vcmask 1045509  }
 0x169   : > { %v1888_v10 = vsel %vm1869_vm5, %v1855_v13, %v6905_v6  ;;  %v1889_v30 = vsel %vm1869_vm5, %v1856_v27, %v6906_v48 }
 0x16a   : > { %v6914_v61 = vpop.permute.xlu1 %6913  ;;  %v1919_v41 = vsel %vm1902_vm6, %v1886_v21, %v6910_v26  ;;  %v1920_v46 = vsel %vm1902_vm6, %v1887_v18, %v6911_v49 }
 0x16b   : > { %v6919_v33 = vpop.permute.xlu0 %6918  ;;  %v6915_v62 = vunpack.i.l.bf16 %v6914_v61  ;;  %v6916_v43 = vunpack.i.h.bf16 %v6914_v61 }
 0x16c   : > { %v6921_v45 = vunpack.i.h.bf16 %v6919_v33  ;;  %v6920_v38 = vunpack.i.l.bf16 %v6919_v33 }
 0x16d   : > { %v1921_v29 = vsel %vm1902_vm6, %v1888_v10, %v6915_v62  ;;  %v1922_v57 = vsel %vm1902_vm6, %v1889_v30, %v6916_v43 }
 0x16e   : > { %v6924_v0 = vpop.permute.xlu1 %6923  ;;  %v1952_v22 = vsel %vm1935_vm7, %v1919_v41, %v6920_v38  ;;  %v1953_v50 = vsel %vm1935_vm7, %v1920_v46, %v6921_v45 }
 0x16f   : > { %v6929_v40 = vpop.permute.xlu0 %6928  ;;  %v6926_v39 = vunpack.i.h.bf16 %v6924_v0  ;;  %v6925_v25 = vunpack.i.l.bf16 %v6924_v0  ;;  %v1859_v0 = vsel %vm1836_vm1, %v8574_v51, %v6715_v63  ;;  %v6726_v63 = vunpack.i.h.bf16 %v8672_v35 }
 0x170   : > { %v6931_v28 = vunpack.i.h.bf16 %v6929_v40  ;;  %v6930_v19 = vunpack.i.l.bf16 %v6929_v40 }
 0x171   : > { %v1954_v32 = vsel %vm1935_vm7, %v1921_v29, %v6925_v25  ;;  %v1955_v42 = vsel %vm1935_vm7, %v1922_v57, %v6926_v39  ;;  %v1860_v39 = vsel %vm1836_vm1, %v8577_v12, %v6716_v16 }
 0x172   : > { %v1985_v55 = vsel %vm1968_vm8, %v1952_v22, %v6930_v19  ;;  %v1986_v23 = vsel %vm1968_vm8, %v1953_v50, %v6931_v28  ;;  %v6934_v52 = vpop.permute.xlu1 %6933 }
 0x173   : > { %v6936_v14 = vunpack.i.h.bf16 %v6934_v52  ;;  %v6935_v47 = vunpack.i.l.bf16 %v6934_v52  ;;  %v6939_v31 = vpop.permute.xlu0 %6938  ;;  %v2009_v36 = vpack.c.bf16 %v1986_v23, %v1985_v55 }
 0x174   : > { %v6941_v8 = vunpack.i.h.bf16 %v6939_v31  ;;  %v6940_v34 = vunpack.i.l.bf16 %v6939_v31 }
 0x175   : > { %v1987_v11 = vsel %vm1968_vm8, %v1954_v32, %v6935_v47  ;;  %v1988_v17 = vsel %vm1968_vm8, %v1955_v42, %v6936_v14  ;;  %6326 = vmatprep.mubr.msk.bf16.mxu0 %vm2037_vm9, %v2009_v36  ;;  %v6721_v42 = vunpack.i.h.bf16 %v8666_v54 }
 0x176   : > { %v6944_v58 = vpop.permute.xlu1 %6943  ;;  %v2010_v3 = vpack.c.bf16 %v1988_v17, %v1987_v11  ;;  %v1890_v38 = vsel %vm1869_vm5, %v1857_v20, %v6940_v34  ;;  %v1891_v21 = vsel %vm1869_vm5, %v1858_v5, %v6941_v8  ;;  %v6720_v11 = vunpack.i.l.bf16 %v8666_v54 }
 0x177   : > { %v6949_v9 = vpop.permute.xlu0 %6948  ;;  %v6945_v6 = vunpack.i.l.bf16 %v6944_v58  ;;  %v6946_v18 = vunpack.i.h.bf16 %v6944_v58 }
 0x178   : > { %6327 = vmatmul.mubr.msk.bf16.gmra.mrb[16].mxu0 %vm2037_vm9, %v2010_v3  ;;  %v6951_v49 = vunpack.i.h.bf16 %v6949_v9  ;;  %v6950_v26 = vunpack.i.l.bf16 %v6949_v9  ;;  %v6725_v9 = vunpack.i.l.bf16 %v8672_v35  ;;  %v1861_v34 = vsel %vm1836_vm1, %v8584_v59, %v6720_v11 }
 0x179   : > { %v1892_v25 = vsel %vm1869_vm5, %v1859_v0, %v6945_v6  ;;  %v1893_v51 = vsel %vm1869_vm5, %v1860_v39, %v6946_v18 }
 0x17a   : > { %v6954_v61 = vpop.permute.xlu1 %6953  ;;  %v1923_v7 = vsel %vm1902_vm6, %v1890_v38, %v6950_v26  ;;  %v1924_v13 = vsel %vm1902_vm6, %v1891_v21, %v6951_v49 }
 0x17b   : > { %v6959_v33 = vpop.permute.xlu0 %6958  ;;  %v6955_v48 = vunpack.i.l.bf16 %v6954_v61  ;;  %v6956_v53 = vunpack.i.h.bf16 %v6954_v61  ;;  %v1862_v61 = vsel %vm1836_vm1, %v8587_v56, %v6721_v42 }
 0x17c   : > { %v6961_v2 = vunpack.i.h.bf16 %v6959_v33  ;;  %v6960_v45 = vunpack.i.l.bf16 %v6959_v33 }
 0x17d   : > { %v1925_v27 = vsel %vm1902_vm6, %v1892_v25, %v6955_v48  ;;  %v1926_v30 = vsel %vm1902_vm6, %v1893_v51, %v6956_v53  ;;  %v2467_v51 = vld [vmem:[#allocation3 + $0x8] sm:$0xff] }
 0x17e   : > { %v6964_v62 = vpop.permute.xlu1 %6963  ;;  %v1956_v28 = vsel %vm1935_vm7, %v1923_v7, %v6960_v45  ;;  %v1957_v19 = vsel %vm1935_vm7, %v1924_v13, %v6961_v2  ;;  %v1863_v2 = vsel %vm1836_vm1, %v8600_v44, %v6725_v9  ;;  %v10638_v9 = vld [vmem:[#allocation28_spill] sm:$0xff] }
 0x17f   : > { %v6969_v41 = vpop.permute.xlu0 %6968  ;;  %v6966_v60 = vunpack.i.h.bf16 %v6964_v62  ;;  %v6965_v46 = vunpack.i.l.bf16 %v6964_v62  ;;  %v1864_v62 = vsel %vm1836_vm1, %v8603_v4, %v6726_v63 }
 0x180   : > { %v6971_v43 = vunpack.i.h.bf16 %v6969_v41  ;;  %v6970_v40 = vunpack.i.l.bf16 %v6969_v41 }
 0x181   : > { %v1958_v52 = vsel %vm1935_vm7, %v1925_v27, %v6965_v46  ;;  %v1959_v57 = vsel %vm1935_vm7, %v1926_v30, %v6966_v60  ;;  %v2468_v27 = vld [vmem:[#allocation3 + $0x10] sm:$0xff] }
 0x182   : > { %v1989_v10 = vsel %vm1968_vm8, %v1956_v28, %v6970_v40  ;;  %v1990_v22 = vsel %vm1968_vm8, %v1957_v19, %v6971_v43  ;;  %v6974_v50 = vpop.permute.xlu1 %6973  ;;  %v2499_v30 = vld [vmem:[#allocation3 + $0x9] sm:$0xff] }
 0x183   : > { %v6976_v29 = vunpack.i.h.bf16 %v6974_v50  ;;  %v6975_v55 = vunpack.i.l.bf16 %v6974_v50  ;;  %v6979_v12 = vpop.permute.xlu0 %6978  ;;  %v2011_v23 = vpack.c.bf16 %v1990_v22, %v1989_v10  ;;  %v7057_v50 = vpack.i.bf16 %v2468_v27, %v2467_v51  ;;  %v9050_v51 = vld [vmem:[%s10558_s3] ss:$0 sm:$0xff] }
 0x184   : > { %v6981_v17 = vunpack.i.h.bf16 %v6979_v12  ;;  %v6980_v58 = vunpack.i.l.bf16 %v6979_v12 }
 0x185   : > { %v1991_v14 = vsel %vm1968_vm8, %v1958_v52, %v6975_v55  ;;  %v1992_v47 = vsel %vm1968_vm8, %v1959_v57, %v6976_v29  ;;  %6330 = vmatprep.mubr.msk.bf16.mxu0 %vm2037_vm9, %v2011_v23  ;;  %v2500_v29 = vld [vmem:[#allocation3 + $0x11] sm:$0xff]  ;;  %7058 = vrot.lane.b32.xlu0 %v7057_v50, %s7715_s25  ;;  %v6731_v57 = vunpack.i.h.bf16 %v8675_v1 }
 0x186   : > { %v6984_v31 = vpop.permute.xlu1 %6983  ;;  %v2012_v36 = vpack.c.bf16 %v1992_v47, %v1991_v14  ;;  %v1894_v33 = vsel %vm1869_vm5, %v1861_v34, %v6980_v58  ;;  %v1895_v20 = vsel %vm1869_vm5, %v1862_v61, %v6981_v17  ;;  %v7062_v52 = vpack.i.bf16 %v2500_v29, %v2499_v30  ;;  %v10637_v58 = vld [vmem:[#allocation27_spill] sm:$0xff] }
 0x187   : > { %v6989_v32 = vpop.permute.xlu0 %6988  ;;  %v6985_v49 = vunpack.i.l.bf16 %v6984_v31  ;;  %v6986_v5 = vunpack.i.h.bf16 %v6984_v31  ;;  %v6730_v14 = vunpack.i.l.bf16 %v8675_v1  ;;  %v6736_v1 = vunpack.i.h.bf16 %v8686_v15 }
 0x188   : > { %6331 = vmatmul.mubr.msk.bf16.gmra.mrb[20].mxu0 %vm2037_vm9, %v2012_v36  ;;  %v6991_v37 = vunpack.i.h.bf16 %v6989_v32  ;;  %v6990_v24 = vunpack.i.l.bf16 %v6989_v32  ;;  %v6735_v32 = vunpack.i.l.bf16 %v8686_v15 }
 0x189   : > { %v1896_v0 = vsel %vm1869_vm5, %v1863_v2, %v6985_v49  ;;  %v1897_v44 = vsel %vm1869_vm5, %v1864_v62, %v6986_v5  ;;  %7063 = vrot.lane.b32.xlu0 %v7062_v52, %s7719_s26 }
 0x18a   : > { %v6994_v3 = vpop.permute.xlu1 %6993  ;;  %v1927_v59 = vsel %vm1902_vm6, %v1894_v33, %v6990_v24  ;;  %v1928_v45 = vsel %vm1902_vm6, %v1895_v20, %v6991_v37  ;;  %v1866_v37 = vsel %vm1836_vm1, %v10638_v9, %v6731_v57  ;;  %v10639_v33 = vld [vmem:[#allocation29_spill] sm:$0xff] }
 0x18b   : > { %v6999_v8 = vpop.permute.xlu0 %6998  ;;  %v6995_v16 = vunpack.i.l.bf16 %v6994_v3  ;;  %v6996_v56 = vunpack.i.h.bf16 %v6994_v3  ;;  %v1865_v3 = vsel %vm1836_vm1, %v10637_v58, %v6730_v14  ;;  %v1867_v20 = vsel %vm1836_vm1, %v10639_v33, %v6735_v32  ;;  %v7621_v33 = vld [vmem:[%s10559_s4 + $0x8] sm:$0xff]  }
 0x18c   : > { %v7001_v54 = vunpack.i.h.bf16 %v6999_v8  ;;  %v7000_v26 = vunpack.i.l.bf16 %v6999_v8  ;;  %v7720_v32 = vmov 0  }
 0x18d   : > { %v1929_v53 = vsel %vm1902_vm6, %v1896_v0, %v6995_v16  ;;  %v1930_v43 = vsel %vm1902_vm6, %v1897_v44, %v6996_v56  ;;  %4001 = vmatprep.subr.bf16.mxu0 %v7720_v32  ;;  %6342 = vmatprep.subr.bf16.mxu1 %v7720_v32 }
 0x18e   : > { %v7004_v6 = vpop.permute.xlu1 %7003  ;;  %v1960_v7 = vsel %vm1935_vm7, %v1927_v59, %v7000_v26  ;;  %v1961_v13 = vsel %vm1935_vm7, %v1928_v45, %v7001_v54 }
 0x18f   : > { %v7009_v38 = vpop.permute.xlu0 %7008  ;;  %v7006_v35 = vunpack.i.h.bf16 %v7004_v6  ;;  %v7005_v21 = vunpack.i.l.bf16 %v7004_v6 }
 0x190   : > { %v7011_v18 = vunpack.i.h.bf16 %v7009_v38  ;;  %v7010_v48 = vunpack.i.l.bf16 %v7009_v38  ;;  %v10640_v38 = vld [vmem:[#allocation30_spill] sm:$0xff] }
 0x191   : > { %v1962_v28 = vsel %vm1935_vm7, %v1929_v53, %v7005_v21  ;;  %v1963_v19 = vsel %vm1935_vm7, %v1930_v43, %v7006_v35  ;;  %v1868_v35 = vsel %vm1836_vm1, %v10640_v38, %v6736_v1 }
 0x192   : > { %v1993_v41 = vsel %vm1968_vm8, %v1960_v7, %v7010_v48  ;;  %v1994_v60 = vsel %vm1968_vm8, %v1961_v13, %v7011_v18  ;;  %v7014_v46 = vpop.permute.xlu1 %7013 }
 0x193   : > { %v7016_v40 = vunpack.i.h.bf16 %v7014_v46  ;;  %v7015_v39 = vunpack.i.l.bf16 %v7014_v46  ;;  %v7019_v4 = vpop.permute.xlu0 %7018  ;;  %v2013_v25 = vpack.c.bf16 %v1994_v60, %v1993_v41 }
 0x194   : > { %v7021_v47 = vunpack.i.h.bf16 %v7019_v4  ;;  %v7020_v31 = vunpack.i.l.bf16 %v7019_v4 }
 0x195   : > { %v1995_v10 = vsel %vm1968_vm8, %v1962_v28, %v7015_v39  ;;  %v1996_v22 = vsel %vm1968_vm8, %v1963_v19, %v7016_v40  ;;  %6334 = vmatprep.mubr.msk.bf16.mxu0 %vm2037_vm9, %v2013_v25  ;;  %v9045_v28 = vld [vmem:[%s10557_s2] ss:$0 sm:$0xff] }
 0x196   : > { %v7024_v55 = vpop.permute.xlu1 %7023  ;;  %v2014_v12 = vpack.c.bf16 %v1996_v22, %v1995_v10  ;;  %v1898_v61 = vsel %vm1869_vm5, %v1865_v3, %v7020_v31  ;;  %v1899_v63 = vsel %vm1869_vm5, %v1866_v37, %v7021_v47 }
 0x197   : > { %v7029_v23 = vpop.permute.xlu0 %7028  ;;  %v7025_v24 = vunpack.i.l.bf16 %v7024_v55  ;;  %v7026_v49 = vunpack.i.h.bf16 %v7024_v55 }
 0x198   : > { %6335 = vmatmul.mubr.msk.bf16.gmra.mrb[24].mxu0 %vm2037_vm9, %v2014_v12  ;;  %v7031_v42 = vunpack.i.h.bf16 %v7029_v23  ;;  %v7030_v11 = vunpack.i.l.bf16 %v7029_v23 }
 0x199   : > { %v1900_v21 = vsel %vm1869_vm5, %v1867_v20, %v7025_v24  ;;  %v1901_v62 = vsel %vm1869_vm5, %v1868_v35, %v7026_v49  ;;  %vm5914_vm5 = vcmask 1046534  }
 0x19a   : > { %v7034_v36 = vpop.permute.xlu1 %7033  ;;  %v1931_v5 = vsel %vm1902_vm6, %v1898_v61, %v7030_v11  ;;  %v1932_v16 = vsel %vm1902_vm6, %v1899_v63, %v7031_v42  ;;  %v7620_v42 = vld [vmem:[%s10559_s4] sm:$0xff]  }
 0x19b   : > { %v7039_v17 = vpop.permute.xlu0 %7038  ;;  %v7035_v54 = vunpack.i.l.bf16 %v7034_v36  ;;  %v7036_v6 = vunpack.i.h.bf16 %v7034_v36  ;;  %4002 = vmatpush1.bf16.msra.mxu0 %v7620_v42  ;;  %6351 = vmatpush1.bf16.msra.mxu1 %v7620_v42 }
 0x19c   : > { %v7041_v8 = vunpack.i.h.bf16 %v7039_v17  ;;  %v7040_v34 = vunpack.i.l.bf16 %v7039_v17  ;;  %4003 = vmatprep.subr.bf16.mxu0 %v7720_v32  ;;  %6343 = vmatprep.subr.bf16.mxu1 %v7720_v32 }
 0x19d   : > { %v1933_v0 = vsel %vm1902_vm6, %v1900_v21, %v7035_v54  ;;  %v1934_v53 = vsel %vm1902_vm6, %v1901_v62, %v7036_v6  ;;  %v7622_v21 = vld [vmem:[%s10559_s4 + $0x10] sm:$0xff]   ;;  %v7623_v62 = vld [vmem:[%s10559_s4 + $0x18] sm:$0xff]   ;;  %vm5916_vm6 = vcmask 1047559  }
 0x19e   : > { %v7044_v26 = vpop.permute.xlu1 %7043  ;;  %v1964_v18 = vsel %vm1935_vm7, %v1931_v5, %v7040_v34  ;;  %v1965_v48 = vsel %vm1935_vm7, %v1932_v16, %v7041_v8 }
 0x19f   : > { %v7049_v2 = vpop.permute.xlu0 %7048  ;;  %v7046_v15 = vunpack.i.h.bf16 %v7044_v26  ;;  %v7045_v59 = vunpack.i.l.bf16 %v7044_v26  ;;  %4004 = vmatpush1.bf16.msra.mxu0 %v7621_v33  ;;  %6352 = vmatpush1.bf16.msra.mxu1 %v7621_v33 }
 0x1a0   : > { %v7051_v45 = vunpack.i.h.bf16 %v7049_v2  ;;  %v7050_v56 = vunpack.i.l.bf16 %v7049_v2  ;;  %4005 = vmatprep.subr.bf16.mxu0 %v7720_v32  ;;  %6344 = vmatprep.subr.bf16.mxu1 %v7720_v32 }
 0x1a1   : > { %v1966_v43 = vsel %vm1935_vm7, %v1933_v0, %v7045_v59  ;;  %v1967_v40 = vsel %vm1935_vm7, %v1934_v53, %v7046_v15  ;;  %v7624_v0 = vld [vmem:[%s10559_s4 + $0x20] sm:$0xff]  }
 0x1a2   : > { %v1997_v7 = vsel %vm1968_vm8, %v1964_v18, %v7050_v56  ;;  %v1998_v13 = vsel %vm1968_vm8, %v1965_v48, %v7051_v45  ;;  %v7054_v44 = vpop.permute.xlu1 %7053 }
 0x1a3   : > { %v7056_v41 = vunpack.i.h.bf16 %v7054_v44  ;;  %v7055_v60 = vunpack.i.l.bf16 %v7054_v44  ;;  %v2015_v46 = vpack.c.bf16 %v1998_v13, %v1997_v7  ;;  %4006 = vmatpush1.bf16.msra.mxu0 %v7622_v21  ;;  %6353 = vmatpush1.bf16.msra.mxu1 %v7622_v21 }
 0x1a4   : > { %4007 = vmatprep.subr.bf16.mxu0 %v7720_v32  ;;  %6345 = vmatprep.subr.bf16.mxu1 %v7720_v32 }
 0x1a5   : > { %v1999_v39 = vsel %vm1968_vm8, %v1966_v43, %v7055_v60  ;;  %v2000_v4 = vsel %vm1968_vm8, %v1967_v40, %v7056_v41  ;;  %6338 = vmatprep.mubr.msk.bf16.mxu0 %vm2037_vm9, %v2015_v46  ;;  %v7625_v40 = vld [vmem:[%s10559_s4 + $0x28] sm:$0xff]  }
 0x1a6   : > { %v2016_v25 = vpack.c.bf16 %v2000_v4, %v1999_v39 }
 0x1a7   : > { %4008 = vmatpush1.bf16.msra.mxu0 %v7623_v62  ;;  %6354 = vmatpush1.bf16.msra.mxu1 %v7623_v62 }
 0x1a8   : > { %6339 = vmatmul.mubr.msk.bf16.gmra.mrb[28].mxu0 %vm2037_vm9, %v2016_v25  ;;  %4009 = vmatprep.subr.bf16.mxu0 %v7720_v32 }
 0x1a9   : > { %6346 = vmatprep.subr.bf16.mxu1 %v7720_v32 }
 0x1ab   : > { %4010 = vmatpush1.bf16.msra.mxu0 %v7624_v0  ;;  %6355 = vmatpush1.bf16.msra.mxu1 %v7624_v0 }
 0x1ac   : > { %4011 = vmatprep.subr.bf16.mxu0 %v7720_v32  ;;  %6347 = vmatprep.subr.bf16.mxu1 %v7720_v32 }
 0x1af   : > { %4012 = vmatpush1.bf16.msra.mxu0 %v7625_v40  ;;  %6356 = vmatpush1.bf16.msra.mxu1 %v7625_v40 }
 0x1b0   : > { %4013 = vmatprep.subr.bf16.mxu0 %v7720_v32  ;;  %6348 = vmatprep.subr.bf16.mxu1 %v7720_v32 }
 0x20b   : > { %v6312_v19 = vpop.f32.mrb[0].mxu0 }
 0x20c   : > { %v2260_v27 = vmul.f32 %v6312_v19, %v9045_v28  ;;  %v2124_v10 = vpop.f32.mrb[1].mxu0 }
 0x20d   : > { %v2258_v22 = vmul.f32 %v9045_v28, %v2124_v10  ;;  %v6313_v50 = vpop.f32.mrb[2].mxu0 }
 0x20e   : > { %v2299_v30 = vadd.f32 %v9050_v51, %v2260_v27  ;;  %v2261_v29 = vmul.f32 %v6313_v50, %v9045_v28  ;;  %v2127_v55 = vpop.f32.mrb[3].mxu0 }
 0x20f   : > { %v2297_v12 = vadd.f32 %v9050_v51, %v2258_v22  ;;  %v2259_v23 = vmul.f32 %v9045_v28, %v2127_v55  ;;  %v7626_v55 = vld [vmem:[%s10559_s4 + $0x30] sm:$0xff]  }
 0x210   : > { %v2331_v52 = vmax.f32 %v2299_v30, 0.0  ;;  %v2300_v57 = vadd.f32 %v9050_v51, %v2261_v29  ;;  %4014 = vmatpush1.bf16.msra.mxu0 %v7626_v55  ;;  %6357 = vmatpush1.bf16.msra.mxu1 %v7626_v55 }
 0x211   : > { %v2329_v14 = vmax.f32 %v2297_v12, 0.0  ;;  %v2298_v47 = vadd.f32 %v9050_v51, %v2259_v23  ;;  %4015 = vmatprep.subr.bf16.mxu0 %v7720_v32  ;;  %6349 = vmatprep.subr.bf16.mxu1 %v7720_v32 }
 0x212   : > { %2405 = vst.msk [vmem:[#allocation3 + $0x48] sm:$0xff] %vm1836_vm1, %v2331_v52  ;;  %v2332_v31 = vmax.f32 %v2300_v57, 0.0  ;;  %v7627_v57 = vld [vmem:[%s10559_s4 + $0x38] sm:$0xff]  }
 0x213   : > { %2403 = vst.msk [vmem:[#allocation3 + $0x28] sm:$0xff] %vm1836_vm1, %v2329_v14  ;;  %v2330_v36 = vmax.f32 %v2298_v47, 0.0 }
 0x214   : > { %2406 = vst.msk [vmem:[#allocation3 + $0x50] sm:$0xff] %vm1836_vm1, %v2332_v31  ;;  %4016 = vmatpush1.bf16.msra.mxu0 %v7627_v57  ;;  %6358 = vmatpush1.bf16.msra.mxu1 %v7627_v57  ;;  %v7628_v31 = vld [vmem:[%s10559_s4 + $0x40] sm:$0xff]  }
 0x215   : > { %2404 = vst.msk [vmem:[#allocation3 + $0x30] sm:$0xff] %vm1836_vm1, %v2330_v36  ;;  %4017 = vmatprep.subr.bf16.mxu0 %v7720_v32  ;;  %6350 = vmatprep.subr.bf16.mxu1 %v7720_v32 }
 0x218   : > { %4018 = vmatpush1.bf16.msra.mxu0 %v7628_v31  ;;  %6359 = vmatpush1.bf16.msra.mxu1 %v7628_v31 }
 0x219   : > { %v2471_v11 = vld [vmem:[#allocation3 + $0x48] sm:$0xff] }
 0x21a   : > { %v2469_v34 = vld [vmem:[#allocation3 + $0x28] sm:$0xff] }
 0x21b   : > { %v6316_v17 = vpop.f32.mrb[4].mxu0  ;;  %v9069_v58 = vld [vmem:[#allocation3 + $0x49] sm:$0xff]  ;;  %v9071_v3 = vld [vmem:[#allocation3 + $0x51] sm:$0xff] }
 0x21c   : > { %v2472_v9 = vld [vmem:[#allocation3 + $0x50] sm:$0xff]  ;;  %v2264_v37 = vmul.f32 %v6316_v17, %v9045_v28  ;;  %v2140_v1 = vpop.f32.mrb[5].mxu0  ;;  %v3850_v24 = vpack.c.bf16 %v9071_v3, %v9069_v58  ;;  %v9097_v15 = vld [vmem:[#allocation3 + $0x47] sm:$0xff]  ;;  %v7092_v50 = vpack.i.bf16 %v9071_v3, %v9069_v58 }
 0x21d   : > { %v9076_v8 = vpack.i.bf16 %v2472_v9, %v2471_v11  ;;  %v2470_v61 = vld [vmem:[#allocation3 + $0x30] sm:$0xff]  ;;  %v2262_v63 = vmul.f32 %v9045_v28, %v2140_v1  ;;  %v6317_v49 = vpop.f32.mrb[6].mxu0  ;;  %v9165_v14 = vld [vmem:[#allocation3 + $0x27] sm:$0xff] }
 0x21e   : > { %v9080_v54 = vpack.i.bf16 %v2470_v61, %v2469_v34  ;;  %v9082_v26 = vld [vmem:[#allocation3 + $0x4f] sm:$0xff]  ;;  %v2303_v20 = vadd.f32 %v9050_v51, %v2264_v37  ;;  %v2265_v5 = vmul.f32 %v6317_v49, %v9045_v28  ;;  %6131 = vmatprep.mubr.msk.bf16.mxu0 %vm1836_vm1, %v3850_v24  ;;  %v2143_v16 = vpop.f32.mrb[7].mxu0 }
 0x21f   : > { %7068 = vrot.lane.b32.xlu0 %v9076_v8, %s7715_s25  ;;  %v2301_v6 = vadd.f32 %v9050_v51, %v2262_v63  ;;  %v2263_v2 = vmul.f32 %v9045_v28, %v2143_v16  ;;  %v7072_v56 = vpack.i.bf16 %v9082_v26, %v9097_v15  ;;  %v9158_v52 = vld [vmem:[#allocation3 + $0x2f] sm:$0xff] }
 0x220   : > { %7103 = vrot.lane.b32.xlu1 %v9080_v54, %s7715_s25  ;;  %v2335_v59 = vmax.f32 %v2303_v20, 0.0  ;;  %v2304_v45 = vadd.f32 %v9050_v51, %v2265_v5  ;;  %v7107_v47 = vpack.i.bf16 %v9158_v52, %v9165_v14  ;;  %v2595_v9 = vld [vmem:[#allocation3 + $0x29] sm:$0xff]  ;;  %v2596_v24 = vld [vmem:[#allocation3 + $0x31] sm:$0xff] }
 0x221   : > { %v2333_v38 = vmax.f32 %v2301_v6, 0.0  ;;  %v2302_v35 = vadd.f32 %v9050_v51, %v2263_v2  ;;  %v7117_v2 = vpack.i.bf16 %v2596_v24, %v2595_v9 }
 0x222   : > { %2409 = vst.msk [vmem:[#allocation3 + $0x88] sm:$0xff] %vm1836_vm1, %v2335_v59  ;;  %v2336_v18 = vmax.f32 %v2304_v45, 0.0 }
 0x223   : > { %7073 = vrot.lane.b32.xlu0 %v7072_v56, %s7721_s13  ;;  %2407 = vst.msk [vmem:[#allocation3 + $0x68] sm:$0xff] %vm1836_vm1, %v2333_v38  ;;  %v2334_v48 = vmax.f32 %v2302_v35, 0.0 }
 0x224   : > { %2410 = vst.msk [vmem:[#allocation3 + $0x90] sm:$0xff] %vm1836_vm1, %v2336_v18 }
 0x225   : > { %2408 = vst.msk [vmem:[#allocation3 + $0x70] sm:$0xff] %vm1836_vm1, %v2334_v48 }
 0x227   : > { %7078 = vrot.lane.b32.xlu0 %v9076_v8, %s7722_s21 }
 0x229   : > { %v2475_v0 = vld [vmem:[#allocation3 + $0x88] sm:$0xff] }
 0x22a   : > { %v2473_v53 = vld [vmem:[#allocation3 + $0x68] sm:$0xff] }
 0x22b   : > { %7083 = vrot.lane.b32.xlu0 %v7072_v56, %s7723_s10  ;;  %v6320_v7 = vpop.f32.mrb[8].mxu0  ;;  %v2476_v62 = vld [vmem:[#allocation3 + $0x90] sm:$0xff] }
 0x22c   : > { %v2268_v13 = vmul.f32 %v6320_v7, %v9045_v28  ;;  %v2156_v44 = vpop.f32.mrb[9].mxu0  ;;  %v2474_v41 = vld [vmem:[#allocation3 + $0x70] sm:$0xff]  ;;  %v9203_v7 = vpack.i.bf16 %v2476_v62, %v2475_v0 }
 0x22d   : > { %v2266_v60 = vmul.f32 %v9045_v28, %v2156_v44  ;;  %v6321_v46 = vpop.f32.mrb[10].mxu0  ;;  %v9129_v43 = vpack.i.bf16 %v2474_v41, %v2473_v53  ;;  %v2630_v53 = vld [vmem:[#allocation3 + $0x67] sm:$0xff] }
 0x22e   : > { %v2307_v39 = vadd.f32 %v9050_v51, %v2268_v13  ;;  %v2269_v4 = vmul.f32 %v6321_v46, %v9045_v28  ;;  %v2159_v25 = vpop.f32.mrb[11].mxu0  ;;  %v2631_v13 = vld [vmem:[#allocation3 + $0x6f] sm:$0xff] }
 0x22f   : > { %7088 = vrot.lane.b32.xlu0 %v9076_v8, %s7724_s20  ;;  %v2305_v19 = vadd.f32 %v9050_v51, %v2266_v60  ;;  %v2267_v27 = vmul.f32 %v9045_v28, %v2159_v25  ;;  %7133 = vrot.lane.b32.xlu1 %v9129_v43, %s7715_s25 }
 0x230   : > { %v2339_v10 = vmax.f32 %v2307_v39, 0.0  ;;  %v2308_v22 = vadd.f32 %v9050_v51, %v2269_v4  ;;  %v7137_v39 = vpack.i.bf16 %v2631_v13, %v2630_v53 }
 0x231   : > { %v2337_v30 = vmax.f32 %v2305_v19, 0.0  ;;  %v2306_v29 = vadd.f32 %v9050_v51, %v2267_v27 }
 0x232   : > { %2413 = vst.msk [vmem:[#allocation3 + $0xc8] sm:$0xff] %vm1836_vm1, %v2339_v10  ;;  %v2340_v12 = vmax.f32 %v2308_v22, 0.0 }
 0x233   : > { %7093 = vrot.lane.b32.xlu0 %v7092_v50, %s7725_s12  ;;  %2411 = vst.msk [vmem:[#allocation3 + $0xa8] sm:$0xff] %vm1836_vm1, %v2337_v30  ;;  %v2338_v23 = vmax.f32 %v2306_v29, 0.0 }
 0x234   : > { %2414 = vst.msk [vmem:[#allocation3 + $0xd0] sm:$0xff] %vm1836_vm1, %v2340_v12 }
 0x235   : > { %2412 = vst.msk [vmem:[#allocation3 + $0xb0] sm:$0xff] %vm1836_vm1, %v2338_v23 }
 0x237   : > { %7098 = vrot.lane.b32.xlu0 %v7092_v50, %s7719_s26 }
 0x239   : > { %v2541_v42 = vld [vmem:[#allocation3 + $0xc7] sm:$0xff] }
 0x23a   : > { %v2477_v18 = vld [vmem:[#allocation3 + $0xa8] sm:$0xff] }
 0x23b   : > { %7108 = vrot.lane.b32.xlu0 %v7107_v47, %s7723_s10  ;;  %v6324_v36 = vpop.f32.mrb[12].mxu0  ;;  %v2542_v11 = vld [vmem:[#allocation3 + $0xcf] sm:$0xff] }
 0x23c   : > { %v2272_v17 = vmul.f32 %v6324_v36, %v9045_v28  ;;  %v2172_v58 = vpop.f32.mrb[13].mxu0  ;;  %v7157_v3 = vpack.i.bf16 %v2542_v11, %v2541_v42  ;;  %v2605_v8 = vld [vmem:[#allocation3 + $0xc9] sm:$0xff]  ;;  %v2606_v34 = vld [vmem:[#allocation3 + $0xd1] sm:$0xff] }
 0x23d   : > { %v2270_v37 = vmul.f32 %v9045_v28, %v2172_v58  ;;  %v6325_v1 = vpop.f32.mrb[14].mxu0  ;;  %v9182_v49 = vld [vmem:[#allocation3 + $0xa9] sm:$0xff]  ;;  %v9186_v5 = vld [vmem:[#allocation3 + $0xb1] sm:$0xff]  ;;  %v9189_v59 = vpack.i.bf16 %v2606_v34, %v2605_v8 }
 0x23e   : > { %v2311_v32 = vadd.f32 %v9050_v51, %v2272_v17  ;;  %v2273_v61 = vmul.f32 %v6325_v1, %v9045_v28  ;;  %7158 = vrot.lane.b32.xlu1 %v7157_v3, %s7723_s10  ;;  %v2175_v63 = vpop.f32.mrb[15].mxu0  ;;  %v2478_v56 = vld [vmem:[#allocation3 + $0xb0] sm:$0xff]  ;;  %v3856_v38 = vpack.c.bf16 %v9186_v5, %v9182_v49  ;;  %v2479_v8 = vld [vmem:[#allocation3 + $0xc8] sm:$0xff] }
 0x23f   : > { %7113 = vrot.lane.b32.xlu0 %v9080_v54, %s7724_s20  ;;  %v2309_v33 = vadd.f32 %v9050_v51, %v2270_v37  ;;  %v2271_v20 = vmul.f32 %v9045_v28, %v2175_v63  ;;  %v7177_v48 = vpack.i.bf16 %v2478_v56, %v2477_v18  ;;  %v2480_v1 = vld [vmem:[#allocation3 + $0xd0] sm:$0xff] }
 0x240   : > { %v2343_v16 = vmax.f32 %v2311_v32, 0.0  ;;  %v2312_v6 = vadd.f32 %v9050_v51, %v2273_v61  ;;  %v7152_v32 = vpack.i.bf16 %v2480_v1, %v2479_v8  ;;  %v2509_v53 = vld [vmem:[#allocation3 + $0xa9] sm:$0xff] }
 0x241   : > { %v2341_v45 = vmax.f32 %v2309_v33, 0.0  ;;  %v2310_v54 = vadd.f32 %v9050_v51, %v2271_v20 }
 0x242   : > { %2417 = vst.msk [vmem:[#allocation3 + $0x108] sm:$0xff] %vm1836_vm1, %v2343_v16  ;;  %v2344_v35 = vmax.f32 %v2312_v6, 0.0  ;;  %7168 = vrot.lane.b32.xlu1 %v9189_v59, %s7725_s12 }
 0x243   : > { %7118 = vrot.lane.b32.xlu0 %v7117_v2, %s7725_s12  ;;  %2415 = vst.msk [vmem:[#allocation3 + $0xe8] sm:$0xff] %vm1836_vm1, %v2341_v45  ;;  %v2342_v21 = vmax.f32 %v2310_v54, 0.0 }
 0x244   : > { %2418 = vst.msk [vmem:[#allocation3 + $0x110] sm:$0xff] %vm1836_vm1, %v2344_v35 }
 0x245   : > { %2416 = vst.msk [vmem:[#allocation3 + $0xf0] sm:$0xff] %vm1836_vm1, %v2342_v21 }
 0x246   : > { %7178 = vrot.lane.b32.xlu1 %v7177_v48, %s7715_s25 }
 0x247   : > { %7123 = vrot.lane.b32.xlu0 %v7117_v2, %s7719_s26 }
 0x249   : > { %v2672_v41 = vld [vmem:[#allocation3 + $0x108] sm:$0xff] }
 0x24a   : > { %v2545_v57 = vld [vmem:[#allocation3 + $0x107] sm:$0xff] }
 0x24b   : > { %7128 = vrot.lane.b32.xlu0 %v9203_v7, %s7715_s25  ;;  %v6328_v44 = vpop.f32.mrb[16].mxu0  ;;  %v2673_v60 = vld [vmem:[#allocation3 + $0x110] sm:$0xff]  ;;  %v2481_v34 = vld [vmem:[#allocation3 + $0xe8] sm:$0xff] }
 0x24c   : > { %v2276_v46 = vmul.f32 %v6328_v44, %v9045_v28  ;;  %v2188_v40 = vpop.f32.mrb[17].mxu0  ;;  %v9208_v4 = vpack.i.bf16 %v2673_v60, %v2672_v41  ;;  %v9210_v25 = vld [vmem:[#allocation3 + $0xe9] sm:$0xff]  ;;  %v9212_v19 = vld [vmem:[#allocation3 + $0xf1] sm:$0xff] }
 0x24d   : > { %v2274_v27 = vmul.f32 %v9045_v28, %v2188_v40  ;;  %v6329_v10 = vpop.f32.mrb[18].mxu0  ;;  %v3860_v22 = vpack.c.bf16 %v9212_v19, %v9210_v25  ;;  %v2546_v50 = vld [vmem:[#allocation3 + $0x10f] sm:$0xff]  ;;  %v9258_v18 = vld [vmem:[#allocation3 + $0xe7] sm:$0xff] }
 0x24e   : > { %v2315_v30 = vadd.f32 %v9050_v51, %v2276_v46  ;;  %v2277_v29 = vmul.f32 %v6329_v10, %v9045_v28  ;;  %7198 = vrot.lane.b32.xlu1 %v9208_v4, %s7722_s21  ;;  %v2191_v55 = vpop.f32.mrb[19].mxu0  ;;  %v9226_v36 = vpack.i.bf16 %v2546_v50, %v2545_v57  ;;  %v2609_v17 = vld [vmem:[#allocation3 + $0x109] sm:$0xff]  ;;  %v2610_v58 = vld [vmem:[#allocation3 + $0x111] sm:$0xff] }
 0x24f   : > { %7138 = vrot.lane.b32.xlu0 %v7137_v39, %s7721_s13  ;;  %v2313_v12 = vadd.f32 %v9050_v51, %v2274_v27  ;;  %v2275_v23 = vmul.f32 %v9045_v28, %v2191_v55  ;;  %6136 = vmatprep.mubr.msk.bf16.mxu1 %vm1836_vm1, %v3860_v22  ;;  %v9236_v37 = vpack.i.bf16 %v2610_v58, %v2609_v17  ;;  %v2482_v24 = vld [vmem:[#allocation3 + $0xf0] sm:$0xff] }
 0x250   : > { %v2347_v47 = vmax.f32 %v2315_v30, 0.0  ;;  %v2316_v31 = vadd.f32 %v9050_v51, %v2277_v29  ;;  %v9242_v61 = vpack.i.bf16 %v2482_v24, %v2481_v34  ;;  %v9249_v2 = vld [vmem:[#allocation3 + $0xef] sm:$0xff] }
 0x251   : > { %v2345_v42 = vmax.f32 %v2313_v12, 0.0  ;;  %v2314_v11 = vadd.f32 %v9050_v51, %v2275_v23  ;;  %v7237_v0 = vpack.i.bf16 %v9249_v2, %v9258_v18  ;;  %v2510_v41 = vld [vmem:[#allocation3 + $0xb1] sm:$0xff] }
 0x252   : > { %2421 = vst.msk [vmem:[#allocation3 + $0x148] sm:$0xff] %vm1836_vm1, %v2347_v47  ;;  %v2348_v3 = vmax.f32 %v2316_v31, 0.0  ;;  %7203 = vrot.lane.b32.xlu1 %v9226_v36, %s7723_s10  ;;  %v7182_v40 = vpack.i.bf16 %v2510_v41, %v2509_v53 }
 0x253   : > { %7143 = vrot.lane.b32.xlu0 %v9129_v43, %s7722_s21  ;;  %2419 = vst.msk [vmem:[#allocation3 + $0x128] sm:$0xff] %vm1836_vm1, %v2345_v42  ;;  %v2346_v9 = vmax.f32 %v2314_v11, 0.0 }
 0x254   : > { %2422 = vst.msk [vmem:[#allocation3 + $0x150] sm:$0xff] %vm1836_vm1, %v2348_v3 }
 0x255   : > { %2420 = vst.msk [vmem:[#allocation3 + $0x130] sm:$0xff] %vm1836_vm1, %v2346_v9 }
 0x256   : > { %7213 = vrot.lane.b32.xlu1 %v9236_v37, %s7725_s12 }
 0x257   : > { %7148 = vrot.lane.b32.xlu0 %v7137_v39, %s7723_s10  ;;  %v9272_v39 = vpack.i.bf16 %v9212_v19, %v9210_v25 }
 0x259   : > { %v2549_v19 = vld [vmem:[#allocation3 + $0x147] sm:$0xff] }
 0x25a   : > { %7223 = vrot.lane.b32.xlu1 %v9242_v61, %s7715_s25 }
 0x25b   : > { %7153 = vrot.lane.b32.xlu0 %v7152_v32, %s7715_s25  ;;  %v6332_v63 = vpop.f32.mrb[20].mxu0  ;;  %v2677_v27 = vld [vmem:[#allocation3 + $0x150] sm:$0xff] }
 0x25c   : > { %v2280_v33 = vmul.f32 %v6332_v63, %v9045_v28  ;;  %v2204_v20 = vpop.f32.mrb[21].mxu0  ;;  %v2550_v22 = vld [vmem:[#allocation3 + $0x14f] sm:$0xff] }
 0x25d   : > { %v2278_v16 = vmul.f32 %v9045_v28, %v2204_v20  ;;  %v6333_v6 = vpop.f32.mrb[22].mxu0  ;;  %v9285_v29 = vpack.i.bf16 %v2550_v22, %v2549_v19  ;;  %v2613_v23 = vld [vmem:[#allocation3 + $0x149] sm:$0xff]  ;;  %v2614_v57 = vld [vmem:[#allocation3 + $0x151] sm:$0xff] }
 0x25e   : > { %v2319_v45 = vadd.f32 %v9050_v51, %v2280_v33  ;;  %v2281_v54 = vmul.f32 %v6333_v6, %v9045_v28  ;;  %7233 = vrot.lane.b32.xlu1 %v9242_v61, %s7722_s21  ;;  %v2207_v56 = vpop.f32.mrb[23].mxu0  ;;  %v9297_v9 = vpack.i.bf16 %v2614_v57, %v2613_v23  ;;  %v2486_v8 = vld [vmem:[#allocation3 + $0x130] sm:$0xff]  ;;  %v9319_v20 = vld [vmem:[#allocation3 + $0x127] sm:$0xff] }
 0x25f   : > { %7163 = vrot.lane.b32.xlu0 %v7152_v32, %s7724_s20  ;;  %v2317_v35 = vadd.f32 %v9050_v51, %v2278_v16  ;;  %v2279_v21 = vmul.f32 %v9045_v28, %v2207_v56  ;;  %v2485_v32 = vld [vmem:[#allocation3 + $0x128] sm:$0xff] }
 0x260   : > { %v2351_v48 = vmax.f32 %v2319_v45, 0.0  ;;  %v2320_v62 = vadd.f32 %v9050_v51, %v2281_v54  ;;  %v9307_v63 = vpack.i.bf16 %v2486_v8, %v2485_v32 }
 0x261   : > { %v2349_v13 = vmax.f32 %v2317_v35, 0.0  ;;  %v2318_v44 = vadd.f32 %v9050_v51, %v2279_v21  ;;  %v2612_v35 = vld [vmem:[#allocation3 + $0x131] sm:$0xff] }
 0x262   : > { %2425 = vst.msk [vmem:[#allocation3 + $0x188] sm:$0xff] %vm1836_vm1, %v2351_v48  ;;  %v2352_v60 = vmax.f32 %v2320_v62, 0.0  ;;  %7238 = vrot.lane.b32.xlu1 %v7237_v0, %s7723_s10 }
 0x263   : > { %7173 = vrot.lane.b32.xlu0 %v9189_v59, %s7719_s26  ;;  %2423 = vst.msk [vmem:[#allocation3 + $0x168] sm:$0xff] %vm1836_vm1, %v2349_v13  ;;  %v2350_v46 = vmax.f32 %v2318_v44, 0.0  ;;  %v2676_v59 = vld [vmem:[#allocation3 + $0x148] sm:$0xff] }
 0x264   : > { %2426 = vst.msk [vmem:[#allocation3 + $0x190] sm:$0xff] %vm1836_vm1, %v2352_v60  ;;  %v9278_v10 = vpack.i.bf16 %v2677_v27, %v2676_v59 }
 0x265   : > { %2424 = vst.msk [vmem:[#allocation3 + $0x170] sm:$0xff] %vm1836_vm1, %v2350_v46 }
 0x266   : > { %7248 = vrot.lane.b32.xlu1 %v9272_v39, %s7725_s12 }
 0x267   : > { %7183 = vrot.lane.b32.xlu0 %v7182_v40, %s7719_s26 }
 0x26a   : > { %7268 = vrot.lane.b32.xlu1 %v9278_v10, %s7722_s21 }
 0x26b   : > { %7188 = vrot.lane.b32.xlu0 %v9208_v4, %s7715_s25  ;;  %v6336_v25 = vpop.f32.mrb[24].mxu0  ;;  %v2681_v22 = vld [vmem:[#allocation3 + $0x190] sm:$0xff] }
 0x26c   : > { %v2284_v50 = vmul.f32 %v6336_v25, %v9045_v28  ;;  %v2220_v30 = vpop.f32.mrb[25].mxu0  ;;  %v2680_v25 = vld [vmem:[#allocation3 + $0x188] sm:$0xff] }
 0x26d   : > { %v2282_v55 = vmul.f32 %v9045_v28, %v2220_v30  ;;  %v6337_v12 = vpop.f32.mrb[26].mxu0  ;;  %v7337_v19 = vpack.i.bf16 %v2681_v22, %v2680_v25 }
 0x26e   : > { %v2323_v47 = vadd.f32 %v9050_v51, %v2284_v50  ;;  %v2285_v31 = vmul.f32 %v6337_v12, %v9045_v28  ;;  %7273 = vrot.lane.b32.xlu1 %v9285_v29, %s7723_s10  ;;  %v2223_v42 = vpop.f32.mrb[27].mxu0  ;;  %v9346_v50 = vpop.permute.xlu0 %7058  ;;  %v2617_v12 = vld [vmem:[#allocation3 + $0x189] sm:$0xff] }
 0x26f   : > { %7193 = vrot.lane.b32.xlu0 %v9226_v36, %s7721_s13  ;;  %v2321_v11 = vadd.f32 %v9050_v51, %v2282_v55  ;;  %v2283_v17 = vmul.f32 %v9045_v28, %v2223_v42 }
 0x270   : > { %v2355_v58 = vmax.f32 %v2323_v47, 0.0  ;;  %v2324_v3 = vadd.f32 %v9050_v51, %v2285_v31  ;;  %v2618_v47 = vld [vmem:[#allocation3 + $0x191] sm:$0xff] }
 0x271   : > { %v2353_v1 = vmax.f32 %v2321_v11, 0.0  ;;  %v2322_v24 = vadd.f32 %v9050_v51, %v2283_v17 }
 0x272   : > { %2429 = vst.msk [vmem:[#allocation3 + $0x1c8] sm:$0xff] %vm1836_vm1, %v2355_v58  ;;  %v2356_v36 = vmax.f32 %v2324_v3, 0.0  ;;  %7283 = vrot.lane.b32.xlu1 %v9297_v9, %s7725_s12  ;;  %v9355_v55 = vpop.permute.xlu0 %7063  ;;  %v7352_v58 = vpack.i.bf16 %v2618_v47, %v2617_v12 }
 0x273   : > { %7208 = vrot.lane.b32.xlu0 %v9208_v4, %s7724_s20  ;;  %2427 = vst.msk [vmem:[#allocation3 + $0x1a8] sm:$0xff] %vm1836_vm1, %v2353_v1  ;;  %v2354_v34 = vmax.f32 %v2322_v24, 0.0  ;;  %v9314_v4 = vld [vmem:[#allocation3 + $0x12f] sm:$0xff]  ;;  %v7066_v22 = vunpack.i.h.bf16 %v9355_v55 }
 0x274   : > { %2430 = vst.msk [vmem:[#allocation3 + $0x1d0] sm:$0xff] %vm1836_vm1, %v2356_v36  ;;  %v7307_v45 = vpack.i.bf16 %v9314_v4, %v9319_v20  ;;  %v2490_v1 = vld [vmem:[#allocation3 + $0x170] sm:$0xff] }
 0x275   : > { %2428 = vst.msk [vmem:[#allocation3 + $0x1b0] sm:$0xff] %vm1836_vm1, %v2354_v34  ;;  %v9390_v34 = vld [vmem:[#allocation3 + $0x167] sm:$0xff] }
 0x276   : > { %7293 = vrot.lane.b32.xlu1 %v9307_v63, %s7715_s25 }
 0x277   : > { %7218 = vrot.lane.b32.xlu0 %v9236_v37, %s7719_s26  ;;  %v2611_v37 = vld [vmem:[#allocation3 + $0x129] sm:$0xff] }
 0x278   : > { %v7317_v40 = vpack.i.bf16 %v2612_v35, %v2611_v37  ;;  %v7060_v35 = vunpack.i.l.bf16 %v9346_v50 }
 0x27a   : > { %7303 = vrot.lane.b32.xlu1 %v9307_v63, %s7722_s21 }
 0x27b   : > { %7228 = vrot.lane.b32.xlu0 %v7237_v0, %s7721_s13  ;;  %v6340_v33 = vpop.f32.mrb[28].mxu0 }
 0x27c   : > { %v2288_v16 = vmul.f32 %v6340_v33, %v9045_v28  ;;  %v2236_v6 = vpop.f32.mrb[29].mxu0  ;;  %v9325_v21 = vld [vmem:[#allocation3 + $0x1a9] sm:$0xff]  ;;  %v9327_v48 = vld [vmem:[#allocation3 + $0x1b1] sm:$0xff] }
 0x27d   : > { %v2286_v54 = vmul.f32 %v9045_v28, %v2236_v6  ;;  %v6341_v56 = vpop.f32.mrb[30].mxu0  ;;  %v3872_v41 = vpack.c.bf16 %v9327_v48, %v9325_v21  ;;  %v2616_v6 = vld [vmem:[#allocation3 + $0x171] sm:$0xff] }
 0x27e   : > { %v2327_v62 = vadd.f32 %v9050_v51, %v2288_v16  ;;  %v2289_v0 = vmul.f32 %v6341_v56, %v9045_v28  ;;  %7308 = vrot.lane.b32.xlu1 %v7307_v45, %s7723_s10  ;;  %v2239_v13 = vpop.f32.mrb[31].mxu0  ;;  %v2615_v16 = vld [vmem:[#allocation3 + $0x169] sm:$0xff] }
 0x27f   : > { %7243 = vrot.lane.b32.xlu0 %v9242_v61, %s7724_s20  ;;  %v2325_v44 = vadd.f32 %v9050_v51, %v2286_v54  ;;  %v2287_v53 = vmul.f32 %v9045_v28, %v2239_v13  ;;  %v2653_v56 = vld [vmem:[#allocation3 + $0x1cf] sm:$0xff]  ;;  %v2652_v13 = vld [vmem:[#allocation3 + $0x1c7] sm:$0xff] }
 0x280   : > { %v2359_v60 = vmax.f32 %v2327_v62, 0.0  ;;  %v2328_v46 = vadd.f32 %v9050_v51, %v2289_v0  ;;  %v2435_v62 = vld [vmem:[#allocation3 + $0x7] sm:$0xff]  ;;  %v7061_v0 = vunpack.i.h.bf16 %v9346_v50 }
 0x281   : > { %v2357_v27 = vmax.f32 %v2325_v44, 0.0  ;;  %v2326_v59 = vadd.f32 %v9050_v51, %v2287_v53  ;;  %v2554_v51 = vld [vmem:[#allocation3 + $0x18f] sm:$0xff] }
 0x282   : > { %2433 = vst.msk [vmem:[#allocation3 + $0x208] sm:$0xff] %vm1836_vm1, %v2359_v60  ;;  %v2360_v61 = vmax.f32 %v2328_v46, 0.0  ;;  %7318 = vrot.lane.b32.xlu1 %v7317_v40, %s7725_s12  ;;  %v2436_v44 = vld [vmem:[#allocation3 + $0xf] sm:$0xff]  ;;  %v7422_v46 = vpack.i.bf16 %v2653_v56, %v2652_v13 }
 0x283   : > { %7253 = vrot.lane.b32.xlu0 %v9272_v39, %s7719_s26  ;;  %2431 = vst.msk [vmem:[#allocation3 + $0x1e8] sm:$0xff] %vm1836_vm1, %v2357_v27  ;;  %v2358_v28 = vmax.f32 %v2326_v59, 0.0  ;;  %v2553_v39 = vld [vmem:[#allocation3 + $0x187] sm:$0xff]  ;;  %v2685_v27 = vld [vmem:[#allocation3 + $0x1d0] sm:$0xff]  ;;  %v3620_v59 = vsel %vm1836_vm1, %v2435_v62, %v7060_v35 }
 0x284   : > { %2434 = vst.msk [vmem:[#allocation3 + $0x210] sm:$0xff] %vm1836_vm1, %v2360_v61  ;;  %v7342_v30 = vpack.i.bf16 %v2554_v51, %v2553_v39  ;;  %v3621_v61 = vsel %vm1836_vm1, %v2436_v44, %v7061_v0 }
 0x285   : > { %2432 = vst.msk [vmem:[#allocation3 + $0x1f0] sm:$0xff] %vm1836_vm1, %v2358_v28  ;;  %v2684_v28 = vld [vmem:[#allocation3 + $0x1c8] sm:$0xff]  ;;  %v3653_v12 = vsel %vm1968_vm8, %v3621_v61, %v7066_v22 }
 0x286   : > { %7338 = vrot.lane.b32.xlu1 %v7337_v19, %s7722_s21  ;;  %v7427_v50 = vpack.i.bf16 %v2685_v27, %v2684_v28 }
 0x287   : > { %7258 = vrot.lane.b32.xlu0 %v9278_v10, %s7715_s25 }
 0x28a   : > { %7343 = vrot.lane.b32.xlu1 %v7342_v30, %s7723_s10 }
 0x28b   : > { %7263 = vrot.lane.b32.xlu0 %v9285_v29, %s7721_s13  ;;  %v9359_v57 = vld [vmem:[#allocation3 + $0x209] sm:$0xff]  ;;  %v9363_v42 = vld [vmem:[#allocation3 + $0x211] sm:$0xff] }
 0x28c   : > { %v9357_v23 = vld [vmem:[#allocation3 + $0x1e9] sm:$0xff]  ;;  %v9361_v31 = vld [vmem:[#allocation3 + $0x1f1] sm:$0xff] }
 0x28e   : > { %7348 = vrot.lane.b32.xlu1 %v7337_v19, %s7724_s20 }
 0x28f   : > { %7278 = vrot.lane.b32.xlu0 %v9278_v10, %s7724_s20  ;;  %v2489_v10 = vld [vmem:[#allocation3 + $0x168] sm:$0xff] }
 0x290   : > { %v7362_v8 = vpack.i.bf16 %v2490_v1, %v2489_v10 }
 0x291   : > { %v9372_v17 = vpop.permute.xlu0 %7068 }
 0x292   : > { %7353 = vrot.lane.b32.xlu1 %v7352_v58, %s7725_s12  ;;  %v9401_v37 = vpop.permute.xlu1 %7103 }
 0x293   : > { %7288 = vrot.lane.b32.xlu0 %v9297_v9, %s7719_s26  ;;  %v2552_v9 = vld [vmem:[#allocation3 + $0x16f] sm:$0xff]  ;;  %v7105_v1 = vunpack.i.l.bf16 %v9401_v37 }
 0x294   : > { %v7377_v33 = vpack.i.bf16 %v2552_v9, %v9390_v34 }
 0x295   : > { %v9377_v3 = vpop.permute.xlu0 %7073 }
 0x296   : > { %7358 = vrot.lane.b32.xlu1 %v7352_v58, %s7719_s26  ;;  %v7106_v58 = vunpack.i.h.bf16 %v9401_v37  ;;  %v7075_v56 = vunpack.i.l.bf16 %v9377_v3 }
 0x297   : > { %7298 = vrot.lane.b32.xlu0 %v7307_v45, %s7721_s13  ;;  %v7392_v45 = vpack.i.bf16 %v2616_v6, %v2615_v16  ;;  %v2599_v6 = vld [vmem:[#allocation3 + $0x69] sm:$0xff] }
 0x299   : > { %v9381_v24 = vpop.permute.xlu0 %7078 }
 0x29a   : > { %7363 = vrot.lane.b32.xlu1 %v7362_v8, %s7715_s25  ;;  %v7081_v0 = vunpack.i.h.bf16 %v9381_v24  ;;  %v7080_v13 = vunpack.i.l.bf16 %v9381_v24 }
 0x29b   : > { %7313 = vrot.lane.b32.xlu0 %v9307_v63, %s7724_s20 }
 0x29d   : > { %v9386_v36 = vpop.permute.xlu0 %7083 }
 0x29e   : > { %7373 = vrot.lane.b32.xlu1 %v7362_v8, %s7722_s21 }
 0x29f   : > { %7323 = vrot.lane.b32.xlu0 %v7317_v40, %s7719_s26  ;;  %v7065_v40 = vunpack.i.l.bf16 %v9355_v55 }
 0x2a1   : > { %v9392_v32 = vpop.permute.xlu0 %7088  ;;  %v9409_v53 = vpop.permute.xlu1 %7133  ;;  %v3652_v51 = vsel %vm1968_vm8, %v3620_v59, %v7065_v40 }
 0x2a2   : > { %7378 = vrot.lane.b32.xlu1 %v7377_v33, %s7723_s10 }
 0x2a3   : > { %7328 = vrot.lane.b32.xlu0 %v7337_v19, %s7715_s25 }
 0x2a5   : > { %v9397_v63 = vpop.permute.xlu0 %7093 }
 0x2a6   : > { %7393 = vrot.lane.b32.xlu1 %v7392_v45, %s7725_s12 }
 0x2a7   : > { %7333 = vrot.lane.b32.xlu0 %v7342_v30, %s7721_s13 }
 0x2a9   : > { %v9403_v54 = vpop.permute.xlu0 %7098 }
 0x2aa   : > { %7398 = vrot.lane.b32.xlu1 %v7392_v45, %s7719_s26  ;;  %v2600_v45 = vld [vmem:[#allocation3 + $0x71] sm:$0xff] }
 0x2ab   : > { %7368 = vrot.lane.b32.xlu0 %v7377_v33, %s7721_s13  ;;  %v7407_v59 = vpack.i.bf16 %v2600_v45, %v2599_v6 }
 0x2ad   : > { %v7109_v60 = vpop.permute.xlu0 %7108 }
 0x2ae   : > { %7423 = vrot.lane.b32.xlu1 %v7422_v46, %s7721_s13  ;;  %v7111_v39 = vunpack.i.h.bf16 %v7109_v60  ;;  %v7110_v30 = vunpack.i.l.bf16 %v7109_v60 }
 0x2af   : > { %7383 = vrot.lane.b32.xlu0 %v7362_v8, %s7724_s20 }
 0x2b0   : > { %v9417_v19 = vpop.permute.xlu1 %7158  ;;  %v3686_v8 = vsel %vm3684_vm10, %v3653_v12, %v7111_v39  ;;  %v3685_v9 = vsel %vm3684_vm10, %v3652_v51, %v7110_v30  ;;  %v2621_v51 = vld [vmem:[#allocation3 + $0x1c9] sm:$0xff]  ;;  %v2622_v39 = vld [vmem:[#allocation3 + $0x1d1] sm:$0xff]  ;;  %v3622_v30 = vsel %vm1836_vm1, %v9165_v14, %v7105_v1  ;;  %v3623_v12 = vsel %vm1836_vm1, %v9158_v52, %v7106_v58 }
 0x2b1   : > { %v7114_v25 = vpop.permute.xlu0 %7113  ;;  %v7085_v14 = vunpack.i.l.bf16 %v9386_v36  ;;  %v2494_v52 = vld [vmem:[#allocation3 + $0x1b0] sm:$0xff] }
 0x2b2   : > { %v7116_v47 = vunpack.i.h.bf16 %v7114_v25  ;;  %v7115_v55 = vunpack.i.l.bf16 %v7114_v25  ;;  %7428 = vrot.lane.b32.xlu1 %v7427_v50, %s7722_s21  ;;  %v2444_v25 = vld [vmem:[#allocation3 + $0x8f] sm:$0xff] }
 0x2b3   : > { %7388 = vrot.lane.b32.xlu0 %v9129_v43, %s7724_s20  ;;  %v7076_v43 = vunpack.i.h.bf16 %v9377_v3 }
 0x2b4   : > { %v3718_v35 = vsel %vm3717_vm11, %v3685_v9, %v7115_v55  ;;  %v3719_v62 = vsel %vm3717_vm11, %v3686_v8, %v7116_v47  ;;  %v9432_v37 = vpop.permute.xlu1 %7168  ;;  %v2443_v47 = vld [vmem:[#allocation3 + $0x87] sm:$0xff]  ;;  %v3852_v55 = vpack.c.bf16 %v2600_v45, %v2599_v6  ;;  %v7091_v45 = vunpack.i.h.bf16 %v9392_v32 }
 0x2b5   : > { %v7119_v10 = vpop.permute.xlu0 %7118  ;;  %v2493_v6 = vld [vmem:[#allocation3 + $0x1a8] sm:$0xff] }
 0x2b6   : > { %v7121_v33 = vunpack.i.h.bf16 %v7119_v10  ;;  %v7120_v16 = vunpack.i.l.bf16 %v7119_v10  ;;  %7433 = vrot.lane.b32.xlu1 %v7422_v46, %s7723_s10 }
 0x2b7   : > { %7403 = vrot.lane.b32.xlu0 %v7427_v50, %s7715_s25 }
 0x2b8   : > { %v3751_v44 = vsel %vm3750_vm12, %v3718_v35, %v7120_v16  ;;  %v3752_v60 = vsel %vm3750_vm12, %v3719_v62, %v7121_v33  ;;  %v9452_v9 = vpop.permute.xlu1 %7178  ;;  %v7412_v16 = vpack.i.bf16 %v2444_v25, %v2443_v47  ;;  %v7100_v47 = vunpack.i.l.bf16 %v9403_v54 }
 0x2b9   : > { %v3784_v3 = vsel %vm3783_vm13, %v3751_v44, %v7075_v56  ;;  %v3785_v40 = vsel %vm3783_vm13, %v3752_v60, %v7076_v43  ;;  %v7124_v27 = vpop.permute.xlu0 %7123  ;;  %v7086_v43 = vunpack.i.h.bf16 %v9386_v36  ;;  %v7090_v56 = vunpack.i.l.bf16 %v9392_v32 }
 0x2ba   : > { %v3817_v22 = vsel %vm3816_vm14, %v3784_v3, %v7080_v13  ;;  %v3818_v46 = vsel %vm3816_vm14, %v3785_v40, %v7081_v0  ;;  %v7126_v61 = vunpack.i.h.bf16 %v7124_v27  ;;  %v7125_v28 = vunpack.i.l.bf16 %v7124_v27  ;;  %7438 = vrot.lane.b32.xlu1 %v7427_v50, %s7724_s20  ;;  %v9470_v0 = vld [vmem:[#allocation3 + $0x1af] sm:$0xff]  ;;  %v9479_v27 = vld [vmem:[#allocation3 + $0x1a7] sm:$0xff] }
 0x2bb   : > { %v3849_v24 = vpack.c.bf16 %v3818_v46, %v3817_v22  ;;  %7408 = vrot.lane.b32.xlu0 %v7407_v59, %s7725_s12  ;;  %v9456_v50 = vpack.i.bf16 %v2622_v39, %v2621_v51  ;;  %v7447_v36 = vpack.i.bf16 %v2494_v52, %v2493_v6  ;;  %v7096_v40 = vunpack.i.h.bf16 %v9397_v63 }
 0x2bc   : > { %v3654_v10 = vsel %vm1968_vm8, %v3622_v30, %v7125_v28  ;;  %v3655_v8 = vsel %vm1968_vm8, %v3623_v12, %v7126_v61  ;;  %v7095_v32 = vunpack.i.l.bf16 %v9397_v63  ;;  %v7071_v22 = vunpack.i.h.bf16 %v9372_v17  ;;  %v2696_v30 = vld [vmem:[#allocation3 + $0x89] sm:$0xff]  ;;  %v2697_v63 = vld [vmem:[#allocation3 + $0x91] sm:$0xff] }
 0x2bd   : > { %4034 = vmatmul.mubr.bf16.vlgmr.msra.gmra.mrb[32].mxu0 %v3849_v24  ;;  %v9454_v33 = vpop.permute.xlu0 %7128  ;;  %v3687_v58 = vsel %vm3684_vm10, %v3654_v10, %v7085_v14  ;;  %v3688_v1 = vsel %vm3684_vm10, %v3655_v8, %v7086_v43  ;;  %v7070_v46 = vunpack.i.l.bf16 %v9372_v17  ;;  %v7452_v25 = vpack.i.bf16 %v9470_v0, %v9479_v27 }
 0x2be   : > { %6132 = vmatprep.mubr.msk.bf16.mxu0 %vm1836_vm1, %v3852_v55  ;;  %7443 = vrot.lane.b32.xlu1 %v9456_v50, %s7725_s12  ;;  %v3720_v13 = vsel %vm3717_vm11, %v3687_v58, %v7090_v56  ;;  %v3721_v44 = vsel %vm3717_vm11, %v3688_v1, %v7091_v45  ;;  %v7101_v12 = vunpack.i.h.bf16 %v9403_v54  ;;  %v3854_v58 = vpack.c.bf16 %v2697_v63, %v2696_v30 }
 0x2bf   : > { %7413 = vrot.lane.b32.xlu0 %v7412_v16, %s7721_s13  ;;  %v3754_v51 = vsel %vm3750_vm12, %v3721_v44, %v7096_v40  ;;  %v3624_v54 = vsel %vm1836_vm1, %v9097_v15, %v7070_v46  ;;  %v3625_v1 = vsel %vm1836_vm1, %v9082_v26, %v7071_v22  ;;  %v2569_v26 = vld [vmem:[#allocation3 + $0x88] sm:$0xff] }
 0x2c0   : > { %v9468_v62 = vpop.permute.xlu1 %7198  ;;  %v3656_v56 = vsel %vm1968_vm8, %v3624_v54, %v7100_v47  ;;  %v2446_v22 = vld [vmem:[#allocation3 + $0xaf] sm:$0xff]  ;;  %v2445_v46 = vld [vmem:[#allocation3 + $0xa7] sm:$0xff] }
 0x2c1   : > { %v7139_v35 = vpop.permute.xlu0 %7138 }
 0x2c2   : > { %v7141_v60 = vunpack.i.h.bf16 %v7139_v35  ;;  %v7140_v3 = vunpack.i.l.bf16 %v7139_v35  ;;  %7448 = vrot.lane.b32.xlu1 %v7447_v36, %s7715_s25  ;;  %v3657_v35 = vsel %vm1968_vm8, %v3625_v1, %v7101_v12  ;;  %v2654_v1 = vld [vmem:[#allocation3 + $0x1e7] sm:$0xff] }
 0x2c3   : > { %7418 = vrot.lane.b32.xlu0 %v9203_v7, %s7722_s21  ;;  %v3753_v7 = vsel %vm3750_vm12, %v3720_v13, %v7095_v32  ;;  %v7527_v32 = vpack.i.bf16 %v2697_v63, %v2696_v30 }
 0x2c4   : > { %v9483_v28 = vpop.permute.xlu1 %7203  ;;  %v3787_v17 = vsel %vm3783_vm13, %v3754_v51, %v7141_v60  ;;  %v3786_v55 = vsel %vm3783_vm13, %v3753_v7, %v7140_v3  ;;  %v7537_v51 = vpack.i.bf16 %v2446_v22, %v2445_v46 }
 0x2c5   : > { %v7144_v61 = vpop.permute.xlu0 %7143 }
 0x2c6   : > { %v7146_v39 = vunpack.i.h.bf16 %v7144_v61  ;;  %v7145_v24 = vunpack.i.l.bf16 %v7144_v61  ;;  %7453 = vrot.lane.b32.xlu1 %v7452_v25, %s7721_s13 }
 0x2c7   : > { %7498 = vrot.lane.b32.xlu0 %v7407_v59, %s7719_s26  ;;  %v2570_v59 = vld [vmem:[#allocation3 + $0x90] sm:$0xff] }
 0x2c8   : > { %v3819_v10 = vsel %vm3816_vm14, %v3786_v55, %v7145_v24  ;;  %v3820_v8 = vsel %vm3816_vm14, %v3787_v17, %v7146_v39  ;;  %v9497_v14 = vpop.permute.xlu1 %7213  ;;  %v7517_v3 = vpack.i.bf16 %v2570_v59, %v2569_v26  ;;  %v7472_v39 = vpack.i.bf16 %v9327_v48, %v9325_v21  ;;  %v2666_v24 = vld [vmem:[#allocation3 + $0xa8] sm:$0xff] }
 0x2c9   : > { %v7149_v43 = vpop.permute.xlu0 %7148  ;;  %v3851_v52 = vpack.c.bf16 %v3820_v8, %v3819_v10  ;;  %v2497_v55 = vld [vmem:[#allocation3 + $0x1e8] sm:$0xff] }
 0x2ca   : > { %v7151_v6 = vunpack.i.h.bf16 %v7149_v43  ;;  %v7150_v45 = vunpack.i.l.bf16 %v7149_v43  ;;  %7458 = vrot.lane.b32.xlu1 %v7447_v36, %s7722_s21  ;;  %v2655_v8 = vld [vmem:[#allocation3 + $0x1ef] sm:$0xff]  ;;  %v7181_v43 = vunpack.i.h.bf16 %v9452_v9 }
 0x2cb   : > { %4042 = vmatmul.mubr.bf16.gmra.mrb[36].mxu0 %v3851_v52  ;;  %7508 = vrot.lane.b32.xlu0 %v7412_v16, %s7723_s10  ;;  %v7180_v52 = vunpack.i.l.bf16 %v9452_v9  ;;  %v7487_v59 = vpack.i.bf16 %v2655_v8, %v2654_v1 }
 0x2cc   : > { %v9507_v13 = vsel %vm3684_vm10, %v3657_v35, %v7151_v6  ;;  %v9510_v44 = vsel %vm3684_vm10, %v3656_v56, %v7150_v45  ;;  %6133 = vmatprep.mubr.msk.bf16.mxu0 %vm1836_vm1, %v3854_v58  ;;  %v9516_v60 = vpop.permute.xlu1 %7223  ;;  %v3631_v35 = vsel %vm1836_vm1, %v2446_v22, %v7181_v43  ;;  %v7587_v22 = vpack.i.bf16 %v9186_v5, %v9182_v49 }
 0x2cd   : > { %v9514_v15 = vpop.permute.xlu0 %7153  ;;  %v3630_v56 = vsel %vm1836_vm1, %v2445_v46, %v7180_v52  ;;  %v7136_v49 = vunpack.i.h.bf16 %v9409_v53  ;;  %v7135_v5 = vunpack.i.l.bf16 %v9409_v53 }
 0x2ce   : > { %7463 = vrot.lane.b32.xlu1 %v7452_v25, %s7723_s10  ;;  %v2667_v25 = vld [vmem:[#allocation3 + $0xb0] sm:$0xff]  ;;  %v7156_v46 = vunpack.i.h.bf16 %v9514_v15 }
 0x2cf   : > { %7518 = vrot.lane.b32.xlu0 %v7517_v3, %s7724_s20  ;;  %v7547_v12 = vpack.i.bf16 %v2667_v25, %v2666_v24  ;;  %v7160_v25 = vunpack.i.l.bf16 %v9417_v19  ;;  %v7155_v24 = vunpack.i.l.bf16 %v9514_v15  ;;  %v7171_v15 = vunpack.i.h.bf16 %v9432_v37 }
 0x2d0   : > { %v9522_v40 = vpop.permute.xlu1 %7233 }
 0x2d1   : > { %v9520_v16 = vpop.permute.xlu0 %7163 }
 0x2d2   : > { %7468 = vrot.lane.b32.xlu1 %v7447_v36, %s7724_s20  ;;  %v2498_v36 = vld [vmem:[#allocation3 + $0x1f0] sm:$0xff]  ;;  %v7166_v8 = vunpack.i.h.bf16 %v9520_v16  ;;  %v7165_v43 = vunpack.i.l.bf16 %v9520_v16 }
 0x2d3   : > { %7528 = vrot.lane.b32.xlu0 %v7527_v32, %s7725_s12  ;;  %v9542_v10 = vpack.i.bf16 %v2498_v36, %v2497_v55 }
 0x2d4   : > { %v9528_v7 = vpop.permute.xlu1 %7238 }
 0x2d5   : > { %v9526_v61 = vpop.permute.xlu0 %7173 }
 0x2d6   : > { %7473 = vrot.lane.b32.xlu1 %v7472_v39, %s7725_s12  ;;  %v7176_v52 = vunpack.i.h.bf16 %v9526_v61 }
 0x2d7   : > { %7538 = vrot.lane.b32.xlu0 %v7537_v51, %s7721_s13 }
 0x2d8   : > { %v9534_v63 = vpop.permute.xlu1 %7248 }
 0x2d9   : > { %v7184_v30 = vpop.permute.xlu0 %7183 }
 0x2da   : > { %7478 = vrot.lane.b32.xlu1 %v7472_v39, %s7719_s26  ;;  %v7186_v6 = vunpack.i.h.bf16 %v7184_v30  ;;  %v7185_v45 = vunpack.i.l.bf16 %v7184_v30  ;;  %v7161_v39 = vunpack.i.h.bf16 %v9417_v19 }
 0x2db   : > { %7548 = vrot.lane.b32.xlu0 %v7547_v12, %s7722_s21 }
 0x2dc   : > { %v9540_v17 = vpop.permute.xlu1 %7268  ;;  %v3662_v9 = vsel %vm1968_vm8, %v3630_v56, %v7185_v45 }
 0x2dd   : > { %v9538_v47 = vpop.permute.xlu0 %7188  ;;  %v3695_v30 = vsel %vm3684_vm10, %v3662_v9, %v7160_v25 }
 0x2de   : > { %7483 = vrot.lane.b32.xlu1 %v9542_v10, %s7715_s25  ;;  %v3728_v45 = vsel %vm3717_vm11, %v3695_v30, %v7165_v43  ;;  %v2669_v30 = vld [vmem:[#allocation3 + $0xd0] sm:$0xff]  ;;  %s6284_s25 = sshll.u32 %s7795_s9, 10  ;;  %s10513_s9 = scalar_lea.sflag [#allocation5], %s297_s17 }
 0x2df   : > { %7558 = vrot.lane.b32.xlu0 %v7527_v32, %s7719_s26  ;;  %v3663_v32 = vsel %vm1968_vm8, %v3631_v35, %v7186_v6  ;;  %v7175_v6 = vunpack.i.l.bf16 %v9526_v61  ;;  %v7170_v35 = vunpack.i.l.bf16 %v9432_v37  ;;  %v7235_v61 = vunpack.i.l.bf16 %v9522_v40 }
 0x2e0   : > { %v9551_v54 = vpop.permute.xlu1 %7273  ;;  %v3696_v36 = vsel %vm3684_vm10, %v3663_v32, %v7161_v39  ;;  %v7236_v32 = vunpack.i.h.bf16 %v9522_v40  ;;  %v7240_v37 = vunpack.i.l.bf16 %v9528_v7 }
 0x2e1   : > { %v9549_v58 = vpop.permute.xlu0 %7193  ;;  %v3729_v56 = vsel %vm3717_vm11, %v3696_v36, %v7166_v8  ;;  %v2668_v8 = vld [vmem:[#allocation3 + $0xc8] sm:$0xff] }
 0x2e2   : > { %7488 = vrot.lane.b32.xlu1 %v7487_v59, %s7721_s13 }
 0x2e3   : > { %7568 = vrot.lane.b32.xlu0 %v7537_v51, %s7723_s10  ;;  %v2448_v51 = vld [vmem:[#allocation3 + $0xcf] sm:$0xff] }
 0x2e4   : > { %v9559_v3 = vpop.permute.xlu1 %7283  ;;  %v3633_v9 = vsel %vm1836_vm1, %v2448_v51, %v7156_v46 }
 0x2e5   : > { %v9557_v26 = vpop.permute.xlu0 %7208  ;;  %v3665_v36 = vsel %vm1968_vm8, %v3633_v9, %v7176_v52  ;;  %v7607_v52 = vpack.i.bf16 %v2669_v30, %v2668_v8  ;;  %v7195_v30 = vunpack.i.l.bf16 %v9549_v58 }
 0x2e6   : > { %7493 = vrot.lane.b32.xlu1 %v9542_v10, %s7722_s21 }
 0x2e7   : > { %7578 = vrot.lane.b32.xlu0 %v7547_v12, %s7724_s20  ;;  %v2447_v12 = vld [vmem:[#allocation3 + $0xc7] sm:$0xff] }
 0x2e8   : > { %v9576_v19 = vpop.permute.xlu1 %7293  ;;  %v7597_v1 = vpack.i.bf16 %v2448_v51, %v2447_v12  ;;  %v3632_v16 = vsel %vm1836_vm1, %v2447_v12, %v7155_v24  ;;  %v3761_v24 = vsel %vm3750_vm12, %v3728_v45, %v7170_v35  ;;  %v3762_v51 = vsel %vm3750_vm12, %v3729_v56, %v7171_v15  ;;  %v2704_v15 = vld [vmem:[#allocation3 + $0x109] sm:$0xff]  ;;  %v2705_v56 = vld [vmem:[#allocation3 + $0x111] sm:$0xff] }
 0x2e9   : > { %v9574_v55 = vpop.permute.xlu0 %7218  ;;  %v3664_v46 = vsel %vm1968_vm8, %v3632_v16, %v7175_v6 }
 0x2ea   : > { %7503 = vrot.lane.b32.xlu1 %v9456_v50, %s7719_s26  ;;  %v3697_v16 = vsel %vm3684_vm10, %v3664_v46, %v7240_v37  ;;  %v7200_v46 = vunpack.i.l.bf16 %v9468_v62 }
 0x2eb   : > { %7588 = vrot.lane.b32.xlu0 %v7587_v22, %s7725_s12  ;;  %v7241_v22 = vunpack.i.h.bf16 %v9528_v7 }
 0x2ec   : > { %v9592_v25 = vpop.permute.xlu1 %7303 }
 0x2ed   : > { %v7229_v39 = vpop.permute.xlu0 %7228 }
 0x2ee   : > { %v7231_v50 = vunpack.i.h.bf16 %v7229_v39  ;;  %v7230_v11 = vunpack.i.l.bf16 %v7229_v39  ;;  %7513 = vrot.lane.b32.xlu1 %v7487_v59, %s7723_s10  ;;  %v7250_v59 = vunpack.i.l.bf16 %v9534_v63 }
 0x2ef   : > { %7598 = vrot.lane.b32.xlu0 %v7597_v1, %s7721_s13  ;;  %v3698_v1 = vsel %vm3684_vm10, %v3665_v36, %v7241_v22  ;;  %v7196_v22 = vunpack.i.h.bf16 %v9549_v58 }
 0x2f0   : > { %v3795_v12 = vsel %vm3783_vm13, %v3762_v51, %v7231_v50  ;;  %v3794_v40 = vsel %vm3783_vm13, %v3761_v24, %v7230_v11  ;;  %v9605_v39 = vpop.permute.xlu1 %7308  ;;  %v7251_v11 = vunpack.i.h.bf16 %v9534_v63  ;;  %v7201_v51 = vunpack.i.h.bf16 %v9468_v62  ;;  %v2656_v62 = vld [vmem:[#allocation3 + $0x207] sm:$0xff] }
 0x2f1   : > { %v7244_v43 = vpop.permute.xlu0 %7243  ;;  %v3827_v7 = vsel %vm3816_vm14, %v3794_v40, %v7235_v61  ;;  %v3828_v45 = vsel %vm3816_vm14, %v3795_v12, %v7236_v32  ;;  %v3862_v32 = vpack.c.bf16 %v2705_v56, %v2704_v15  ;;  %v2657_v12 = vld [vmem:[#allocation3 + $0x20f] sm:$0xff] }
 0x2f2   : > { %v7246_v6 = vunpack.i.h.bf16 %v7244_v43  ;;  %v7245_v35 = vunpack.i.l.bf16 %v7244_v43  ;;  %v3859_v9 = vpack.c.bf16 %v3828_v45, %v3827_v7  ;;  %7523 = vrot.lane.b32.xlu1 %v9542_v10, %s7724_s20  ;;  %v7532_v10 = vpack.i.bf16 %v9361_v31, %v9357_v23  ;;  %v2706_v45 = vld [vmem:[#allocation3 + $0x129] sm:$0xff]  ;;  %v2707_v15 = vld [vmem:[#allocation3 + $0x131] sm:$0xff] }
 0x2f3   : > { %7608 = vrot.lane.b32.xlu0 %v7607_v52, %s7722_s21  ;;  %v7542_v56 = vpack.i.bf16 %v2657_v12, %v2656_v62  ;;  %v7205_v12 = vunpack.i.l.bf16 %v9483_v28  ;;  %v7211_v62 = vunpack.i.h.bf16 %v9557_v26 }
 0x2f4   : > { %v3730_v50 = vsel %vm3717_vm11, %v3697_v16, %v7245_v35  ;;  %v3731_v61 = vsel %vm3717_vm11, %v3698_v1, %v7246_v6  ;;  %4074 = vmatmul.mubr.bf16.vlgmr.msra.gmra.mrb[0].mxu1 %v3859_v9  ;;  %v9622_v24 = vpop.permute.xlu1 %7318  ;;  %v2689_v6 = vld [vmem:[#allocation3 + $0x210] sm:$0xff]  ;;  %v3864_v35 = vpack.c.bf16 %v2707_v15, %v2706_v45  ;;  %v7226_v16 = vunpack.i.h.bf16 %v9516_v60 }
 0x2f5   : > { %v3763_v36 = vsel %vm3750_vm12, %v3730_v50, %v7250_v59  ;;  %v3764_v37 = vsel %vm3750_vm12, %v3731_v61, %v7251_v11  ;;  %v7254_v63 = vpop.permute.xlu0 %7253  ;;  %6137 = vmatprep.mubr.msk.bf16.mxu1 %vm1836_vm1, %v3862_v32  ;;  %v7225_v11 = vunpack.i.l.bf16 %v9516_v60  ;;  %v2688_v50 = vld [vmem:[#allocation3 + $0x208] sm:$0xff]  ;;  %v7210_v45 = vunpack.i.l.bf16 %v9557_v26 }
 0x2f6   : > { %v3796_v58 = vsel %vm3783_vm13, %v3763_v36, %v7195_v30  ;;  %v3797_v40 = vsel %vm3783_vm13, %v3764_v37, %v7196_v22  ;;  %7533 = vrot.lane.b32.xlu1 %v7532_v10, %s7725_s12  ;;  %v7256_v61 = vunpack.i.h.bf16 %v7254_v63  ;;  %v7255_v32 = vunpack.i.l.bf16 %v7254_v63 }
 0x2f7   : > { %v3829_v8 = vsel %vm3816_vm14, %v3796_v58, %v7200_v46  ;;  %v3830_v43 = vsel %vm3816_vm14, %v3797_v40, %v7201_v51  ;;  %v7552_v22 = vpack.i.bf16 %v2689_v6, %v2688_v50  ;;  %v3634_v30 = vsel %vm1836_vm1, %v9258_v18, %v7225_v11  ;;  %v9660_v58 = vld [vmem:[#allocation3 + $0x149] sm:$0xff]  ;;  %v9662_v18 = vld [vmem:[#allocation3 + $0x151] sm:$0xff] }
 0x2f8   : > { %v9636_v7 = vpop.permute.xlu1 %7338  ;;  %v3861_v1 = vpack.c.bf16 %v3830_v43, %v3829_v8  ;;  %v3635_v36 = vsel %vm1836_vm1, %v9249_v2, %v7226_v16  ;;  %v3666_v51 = vsel %vm1968_vm8, %v3634_v30, %v7255_v32  ;;  %v7206_v63 = vunpack.i.h.bf16 %v9483_v28  ;;  %v2658_v30 = vld [vmem:[#allocation3 + $0x227] sm:$0xff] }
 0x2f9   : > { %v9634_v52 = vpop.permute.xlu0 %7258  ;;  %v3667_v46 = vsel %vm1968_vm8, %v3635_v36, %v7256_v61  ;;  %v3699_v2 = vsel %vm3684_vm10, %v3666_v51, %v7205_v12  ;;  %v7592_v28 = vpack.i.bf16 %v9363_v42, %v9359_v57  ;;  %v7216_v15 = vunpack.i.h.bf16 %v9497_v14  ;;  %v2659_v36 = vld [vmem:[#allocation3 + $0x22f] sm:$0xff] }
 0x2fa   : > { %7543 = vrot.lane.b32.xlu1 %v7542_v56, %s7721_s13  ;;  %v3700_v40 = vsel %vm3684_vm10, %v3667_v46, %v7206_v63  ;;  %v3732_v6 = vsel %vm3717_vm11, %v3699_v2, %v7210_v45  ;;  %v7215_v16 = vunpack.i.l.bf16 %v9497_v14  ;;  %v7190_v26 = vunpack.i.l.bf16 %v9538_v47  ;;  %v2452_v12 = vld [vmem:[#allocation3 + $0x10f] sm:$0xff] }
 0x2fb   : > { %v7221_v11 = vunpack.i.h.bf16 %v9574_v55  ;;  %v7220_v50 = vunpack.i.l.bf16 %v9574_v55  ;;  %v7306_v51 = vunpack.i.h.bf16 %v9592_v25  ;;  %v7305_v14 = vunpack.i.l.bf16 %v9592_v25 }
 0x2fc   : > { %4082 = vmatmul.mubr.bf16.gmra.mrb[4].mxu1 %v3861_v1  ;;  %v9643_v9 = vpop.permute.xlu1 %7343  ;;  %v7191_v1 = vunpack.i.h.bf16 %v9538_v47  ;;  %v7310_v47 = vunpack.i.l.bf16 %v9605_v39  ;;  %v7602_v45 = vpack.i.bf16 %v2659_v36, %v2658_v30  ;;  %v7321_v30 = vunpack.i.h.bf16 %v9622_v24 }
 0x2fd   : > { %v9641_v59 = vpop.permute.xlu0 %7263  ;;  %6138 = vmatprep.mubr.msk.bf16.mxu1 %vm1836_vm1, %v3864_v35  ;;  %v3733_v35 = vsel %vm3717_vm11, %v3700_v40, %v7211_v62  ;;  %v7296_v36 = vunpack.i.h.bf16 %v9576_v19 }
 0x2fe   : > { %7553 = vrot.lane.b32.xlu1 %v7552_v22, %s7722_s21  ;;  %v3766_v55 = vsel %vm3750_vm12, %v3733_v35, %v7216_v15  ;;  %v3637_v2 = vsel %vm1836_vm1, %v2452_v12, %v7191_v1 }
 0x2ff   : > { %v3669_v25 = vsel %vm1968_vm8, %v3637_v2, %v7221_v11 }
 0x300   : > { %v9653_v37 = vpop.permute.xlu1 %7348 }
 0x301   : > { %v9651_v60 = vpop.permute.xlu0 %7278 }
 0x302   : > { %7563 = vrot.lane.b32.xlu1 %v7532_v10, %s7719_s26  ;;  %v3866_v10 = vpack.c.bf16 %v9662_v18, %v9660_v58  ;;  %v3765_v58 = vsel %vm3750_vm12, %v3732_v6, %v7215_v16  ;;  %v2451_v18 = vld [vmem:[#allocation3 + $0x107] sm:$0xff] }
 0x304   : > { %v9668_v43 = vpop.permute.xlu1 %7353 }
 0x305   : > { %v9666_v8 = vpop.permute.xlu0 %7288 }
 0x306   : > { %7573 = vrot.lane.b32.xlu1 %v7542_v56, %s7723_s10  ;;  %v7311_v56 = vunpack.i.h.bf16 %v9605_v39  ;;  %s10503_s10 = scalar_lea.hbm %s10562_s7, %s6284_s25 }
 0x308   : > { %v9685_v32 = vpop.permute.xlu1 %7358  ;;  %v3702_v35 = vsel %vm3684_vm10, %v3669_v25, %v7311_v56 }
 0x309   : > { %v7299_v61 = vpop.permute.xlu0 %7298  ;;  %v7360_v53 = vunpack.i.l.bf16 %v9685_v32 }
 0x30a   : > { %v7301_v46 = vunpack.i.h.bf16 %v7299_v61  ;;  %v7300_v63 = vunpack.i.l.bf16 %v7299_v61  ;;  %7583 = vrot.lane.b32.xlu1 %v7552_v22, %s7724_s20  ;;  %v3636_v61 = vsel %vm1836_vm1, %v2451_v18, %v7190_v26  ;;  %v7320_v26 = vunpack.i.l.bf16 %v9622_v24  ;;  %s9976_s20 = scalar_lea.vmem %s10563_s8, %s6282_s18  ;;  %s6096_s18 = sshll.u32 %s297_s17, 6 }
 0x30b   : > { %v3668_v1 = vsel %vm1968_vm8, %v3636_v61, %v7220_v50  ;;  %v7266_v50 = vunpack.i.h.bf16 %v9641_v59  ;;  %v7270_v18 = vunpack.i.l.bf16 %v9540_v17 }
 0x30c   : > { %v3799_v40 = vsel %vm3783_vm13, %v3766_v55, %v7301_v46  ;;  %v3798_v62 = vsel %vm3783_vm13, %v3765_v58, %v7300_v63  ;;  %v9699_v39 = vpop.permute.xlu1 %7363  ;;  %v3701_v22 = vsel %vm3684_vm10, %v3668_v1, %v7310_v47  ;;  %v7295_v63 = vunpack.i.l.bf16 %v9576_v19  ;;  %v2690_v58 = vld [vmem:[#allocation3 + $0x228] sm:$0xff]  ;;  %v2691_v19 = vld [vmem:[#allocation3 + $0x230] sm:$0xff] }
 0x30d   : > { %v7314_v29 = vpop.permute.xlu0 %7313  ;;  %v3831_v6 = vsel %vm3816_vm14, %v3798_v62, %v7305_v14  ;;  %v3832_v15 = vsel %vm3816_vm14, %v3799_v40, %v7306_v51  ;;  %v7271_v55 = vunpack.i.h.bf16 %v9540_v17  ;;  %v7612_v62 = vpack.i.bf16 %v2691_v19, %v2690_v58  ;;  %v2710_v1 = vld [vmem:[#allocation3 + $0x169] sm:$0xff] }
 0x30e   : > { %v7316_v16 = vunpack.i.h.bf16 %v7314_v29  ;;  %v7315_v46 = vunpack.i.l.bf16 %v7314_v29  ;;  %v3863_v11 = vpack.c.bf16 %v3832_v15, %v3831_v6  ;;  %7593 = vrot.lane.b32.xlu1 %v7592_v28, %s7725_s12  ;;  %v7265_v29 = vunpack.i.l.bf16 %v9641_v59  ;;  %s10021_s12 = scalar_lea.vmem [#allocation4], %s6096_s18  ;;  %s7727_s18 = smov [#allocation4]  }
 0x30f   : > { %v3638_v6 = vsel %vm1836_vm1, %v9319_v20, %v7295_v63  ;;  %v3639_v17 = vsel %vm1836_vm1, %v9314_v4, %v7296_v36  ;;  %v7281_v63 = vunpack.i.h.bf16 %v9651_v60  ;;  %v7290_v58 = vunpack.i.l.bf16 %v9666_v8  ;;  %s6002_s26 = sshll.u32 %s10021_s12, 4  ;;  %s7651_s19 = sshll.u32 %s7727_s18, 4  ;;  %s10506_s26 = int_to_ptr.vmem [resolvable:$true] %s6002_s26  ;;  %s7652_s19 = int_to_ptr.vmem [resolvable:$false] %s7651_s19 }
 0x310   : > { %v3734_v12 = vsel %vm3717_vm11, %v3701_v22, %v7315_v46  ;;  %v3735_v51 = vsel %vm3717_vm11, %v3702_v35, %v7316_v16  ;;  %4090 = vmatmul.mubr.bf16.gmra.mrb[8].mxu1 %v3863_v11  ;;  %v9717_v47 = vpop.permute.xlu1 %7373  ;;  %v2711_v35 = vld [vmem:[#allocation3 + $0x171] sm:$0xff]  ;;  %v7276_v46 = vunpack.i.h.bf16 %v9551_v54  ;;  %v7275_v22 = vunpack.i.l.bf16 %v9551_v54  ;;  %s7653_s22 = scalar_lea.vmem %s7652_s19, 2048  ;;  %p7654_p0 = scmp.lt.s32.totalorder %s10506_s26, %s7652_s19 }
 0x311   : > { %v3767_v56 = vsel %vm3750_vm12, %v3734_v12, %v7320_v26  ;;  %v3768_v14 = vsel %vm3750_vm12, %v3735_v51, %v7321_v30  ;;  %v7324_v24 = vpop.permute.xlu0 %7323  ;;  %6139 = vmatprep.mubr.msk.bf16.mxu1 %vm1836_vm1, %v3866_v10  ;;  %v3868_v20 = vpack.c.bf16 %v2711_v35, %v2710_v1  ;;  %v7280_v12 = vunpack.i.l.bf16 %v9651_v60 }
 0x312   : > { %v7326_v2 = vunpack.i.h.bf16 %v7324_v24  ;;  %v7325_v28 = vunpack.i.l.bf16 %v7324_v24  ;;  %v3800_v59 = vsel %vm3783_vm13, %v3767_v56, %v7265_v29  ;;  %v3801_v40 = vsel %vm3783_vm13, %v3768_v14, %v7266_v50  ;;  %7603 = vrot.lane.b32.xlu1 %v7602_v45, %s7721_s13 }
 0x313   : > { %v3833_v61 = vsel %vm3816_vm14, %v3800_v59, %v7270_v18  ;;  %v3834_v25 = vsel %vm3816_vm14, %v3801_v40, %v7271_v55  ;;  %v7286_v51 = vunpack.i.h.bf16 %v9559_v3  ;;  %v7261_v54 = vunpack.i.h.bf16 %v9634_v52  ;;  %v2456_v59 = vld [vmem:[#allocation3 + $0x14f] sm:$0xff] }
 0x314   : > { %v7379_v10 = vpop.permute.xlu1 %7378  ;;  %v3670_v16 = vsel %vm1968_vm8, %v3638_v6, %v7325_v28  ;;  %v3671_v45 = vsel %vm1968_vm8, %v3639_v17, %v7326_v2  ;;  %v3865_v30 = vpack.c.bf16 %v3834_v25, %v3833_v61  ;;  %v7285_v56 = vunpack.i.l.bf16 %v9559_v3  ;;  %v2455_v61 = vld [vmem:[#allocation3 + $0x147] sm:$0xff] }
 0x315   : > { %v9731_v15 = vpop.permute.xlu0 %7328  ;;  %v3703_v26 = vsel %vm3684_vm10, %v3670_v16, %v7275_v22  ;;  %v3704_v4 = vsel %vm3684_vm10, %v3671_v45, %v7276_v46  ;;  %v7260_v14 = vunpack.i.l.bf16 %v9634_v52  ;;  %v7291_v24 = vunpack.i.h.bf16 %v9666_v8  ;;  %v2712_v45 = vld [vmem:[#allocation3 + $0x189] sm:$0xff]  ;;  %v2713_v46 = vld [vmem:[#allocation3 + $0x191] sm:$0xff] }
 0x316   : > { %7613 = vrot.lane.b32.xlu1 %v7612_v62, %s7722_s21  ;;  %v3736_v50 = vsel %vm3717_vm11, %v3703_v26, %v7280_v12  ;;  %v3737_v29 = vsel %vm3717_vm11, %v3704_v4, %v7281_v63  ;;  %v7376_v55 = vunpack.i.h.bf16 %v9717_v47  ;;  %v7381_v18 = vunpack.i.h.bf16 %v7379_v10 }
 0x317   : > { %v7375_v40 = vunpack.i.l.bf16 %v9717_v47  ;;  %v7380_v62 = vunpack.i.l.bf16 %v7379_v10  ;;  %v3769_v3 = vsel %vm3750_vm12, %v3736_v50, %v7285_v56  ;;  %v3770_v52 = vsel %vm3750_vm12, %v3737_v29, %v7286_v51 }
 0x318   : > { %4098 = vmatmul.mubr.bf16.gmra.mrb[12].mxu1 %v3865_v30  ;;  %v7394_v36 = vpop.permute.xlu1 %7393  ;;  %v3641_v25 = vsel %vm1836_vm1, %v2456_v59, %v7261_v54  ;;  %v3640_v17 = vsel %vm1836_vm1, %v2455_v61, %v7260_v14  ;;  %v3870_v29 = vpack.c.bf16 %v2713_v46, %v2712_v45  ;;  %v2458_v46 = vld [vmem:[#allocation3 + $0x16f] sm:$0xff] }
 0x319   : > { %v7334_v11 = vpop.permute.xlu0 %7333  ;;  %6140 = vmatprep.mubr.msk.bf16.mxu1 %vm1836_vm1, %v3868_v20  ;;  %v3673_v1 = vsel %vm1968_vm8, %v3641_v25, %v7291_v24  ;;  %v3672_v22 = vsel %vm1968_vm8, %v3640_v17, %v7290_v58  ;;  %v7396_v63 = vunpack.i.h.bf16 %v7394_v36  ;;  %v7395_v12 = vunpack.i.l.bf16 %v7394_v36 }
 0x31a   : > { %v3706_v30 = vsel %vm3684_vm10, %v3673_v1, %v7381_v18  ;;  %v3705_v4 = vsel %vm3684_vm10, %v3672_v22, %v7380_v62  ;;  %v7336_v56 = vunpack.i.h.bf16 %v7334_v11  ;;  %v7335_v14 = vunpack.i.l.bf16 %v7334_v11 }
 0x31b   : > { %v7341_v18 = vunpack.i.h.bf16 %v9636_v7  ;;  %v7340_v36 = vunpack.i.l.bf16 %v9636_v7  ;;  %v7366_v7 = vunpack.i.h.bf16 %v9699_v39  ;;  %v7365_v25 = vunpack.i.l.bf16 %v9699_v39 }
 0x31c   : > { %v9751_v60 = vpop.permute.xlu1 %7398 }
 0x31d   : > { %v7369_v19 = vpop.permute.xlu0 %7368  ;;  %v3642_v48 = vsel %vm1836_vm1, %v9390_v34, %v7365_v25 }
 0x31e   : > { %v7371_v2 = vunpack.i.h.bf16 %v7369_v19  ;;  %v7370_v28 = vunpack.i.l.bf16 %v7369_v19 }
 0x320   : > { %v3803_v8 = vsel %vm3783_vm13, %v3770_v52, %v7371_v2  ;;  %v3802_v6 = vsel %vm3783_vm13, %v3769_v3, %v7370_v28  ;;  %v9762_v16 = vpop.permute.xlu1 %7423 }
 0x321   : > { %v7384_v35 = vpop.permute.xlu0 %7383  ;;  %v3835_v47 = vsel %vm3816_vm14, %v3802_v6, %v7375_v40  ;;  %v3836_v10 = vsel %vm3816_vm14, %v3803_v8, %v7376_v55  ;;  %v7401_v8 = vunpack.i.h.bf16 %v9751_v60  ;;  %v7400_v6 = vunpack.i.l.bf16 %v9751_v60 }
 0x322   : > { %v7386_v20 = vunpack.i.h.bf16 %v7384_v35  ;;  %v7385_v26 = vunpack.i.l.bf16 %v7384_v35  ;;  %v3867_v51 = vpack.c.bf16 %v3836_v10, %v3835_v47 }
 0x323   : > { %v3674_v39 = vsel %vm1968_vm8, %v3642_v48, %v7400_v6  ;;  %v2459_v6 = vld [vmem:[#allocation3 + $0x187] sm:$0xff] }
 0x324   : > { %v3738_v54 = vsel %vm3717_vm11, %v3705_v4, %v7385_v26  ;;  %v3739_v50 = vsel %vm3717_vm11, %v3706_v30, %v7386_v20  ;;  %4106 = vmatmul.mubr.bf16.gmra.mrb[16].mxu1 %v3867_v51  ;;  %v9773_v55 = vpop.permute.xlu1 %7428 }
 0x325   : > { %v3771_v24 = vsel %vm3750_vm12, %v3738_v54, %v7395_v12  ;;  %v3772_v58 = vsel %vm3750_vm12, %v3739_v50, %v7396_v63  ;;  %v7389_v19 = vpop.permute.xlu0 %7388  ;;  %6141 = vmatprep.mubr.msk.bf16.mxu1 %vm1836_vm1, %v3870_v29  ;;  %v7346_v54 = vunpack.i.h.bf16 %v9643_v9  ;;  %v7345_v50 = vunpack.i.l.bf16 %v9643_v9 }
 0x326   : > { %v3804_v2 = vsel %vm3783_vm13, %v3771_v24, %v7335_v14  ;;  %v3805_v28 = vsel %vm3783_vm13, %v3772_v58, %v7336_v56  ;;  %v7391_v17 = vunpack.i.h.bf16 %v7389_v19  ;;  %v7390_v1 = vunpack.i.l.bf16 %v7389_v19 }
 0x327   : > { %v3837_v11 = vsel %vm3816_vm14, %v3804_v2, %v7340_v36  ;;  %v3838_v59 = vsel %vm3816_vm14, %v3805_v28, %v7341_v18  ;;  %v3707_v14 = vsel %vm3684_vm10, %v3674_v39, %v7345_v50  ;;  %v7351_v36 = vunpack.i.h.bf16 %v9653_v37 }
 0x328   : > { %v9782_v40 = vpop.permute.xlu1 %7433  ;;  %v3869_v3 = vpack.c.bf16 %v3838_v59, %v3837_v11  ;;  %v3723_v60 = vsel %vm3717_vm11, %v9507_v13, %v7391_v17  ;;  %v3722_v20 = vsel %vm3717_vm11, %v9510_v44, %v7390_v1  ;;  %v7350_v2 = vunpack.i.l.bf16 %v9653_v37 }
 0x329   : > { %v9784_v62 = vpop.permute.xlu0 %7403  ;;  %v7330_v37 = vunpack.i.l.bf16 %v9731_v15 }
 0x32a   : > { %v3740_v9 = vsel %vm3717_vm11, %v3707_v14, %v7350_v2 }
 0x32c   : > { %4114 = vmatmul.mubr.bf16.gmra.mrb[20].mxu1 %v3869_v3  ;;  %v9786_v52 = vpop.permute.xlu1 %7438  ;;  %v7356_v3 = vunpack.i.h.bf16 %v9668_v43 }
 0x32d   : > { %v7409_v61 = vpop.permute.xlu0 %7408  ;;  %6142 = vmatprep.mubr.msk.bf16.mxu1 %vm1836_vm1, %v3872_v41  ;;  %v3643_v41 = vsel %vm1836_vm1, %v2458_v46, %v7366_v7  ;;  %v7331_v7 = vunpack.i.h.bf16 %v9731_v15  ;;  %v2716_v46 = vld [vmem:[#allocation3 + $0x1c9] sm:$0xff]  ;;  %v2717_v15 = vld [vmem:[#allocation3 + $0x1d1] sm:$0xff] }
 0x32e   : > { %v7411_v10 = vunpack.i.h.bf16 %v7409_v61  ;;  %v7410_v45 = vunpack.i.l.bf16 %v7409_v61  ;;  %v3675_v30 = vsel %vm1968_vm8, %v3643_v41, %v7401_v8  ;;  %v7355_v61 = vunpack.i.l.bf16 %v9668_v43 }
 0x32f   : > { %v3708_v24 = vsel %vm3684_vm10, %v3675_v30, %v7346_v54  ;;  %v7361_v30 = vunpack.i.h.bf16 %v9685_v32  ;;  %v7640_v54 = vld [vmem:[#allocation3 + $0x6f] sm:$0xff]  ;;  %v7425_v32 = vunpack.i.l.bf16 %v9762_v16 }
 0x330   : > { %v9796_v35 = vpop.permute.xlu1 %7443  ;;  %v3756_v63 = vsel %vm3750_vm12, %v3723_v60, %v7411_v10  ;;  %v3755_v12 = vsel %vm3750_vm12, %v3722_v20, %v7410_v45  ;;  %v3741_v28 = vsel %vm3717_vm11, %v3708_v24, %v7351_v36  ;;  %v3773_v17 = vsel %vm3750_vm12, %v3740_v9, %v7355_v61 }
 0x331   : > { %v7414_v47 = vpop.permute.xlu0 %7413  ;;  %v3774_v1 = vsel %vm3750_vm12, %v3741_v28, %v7356_v3  ;;  %v3627_v50 = vsel %vm1836_vm1, %v7640_v54, %v7136_v49 }
 0x332   : > { %v7416_v22 = vunpack.i.h.bf16 %v7414_v47  ;;  %v7415_v21 = vunpack.i.l.bf16 %v7414_v47 }
 0x334   : > { %v9807_v4 = vpop.permute.xlu1 %7448  ;;  %v3788_v29 = vsel %vm3783_vm13, %v3755_v12, %v7415_v21  ;;  %v3789_v13 = vsel %vm3783_vm13, %v3756_v63, %v7416_v22  ;;  %v3644_v22 = vsel %vm1836_vm1, %v2459_v6, %v7330_v37  ;;  %v3874_v12 = vpack.c.bf16 %v2717_v15, %v2716_v46 }
 0x335   : > { %v7419_v26 = vpop.permute.xlu0 %7418  ;;  %v7451_v37 = vunpack.i.h.bf16 %v9807_v4 }
 0x336   : > { %v7421_v34 = vunpack.i.h.bf16 %v7419_v26  ;;  %v7420_v51 = vunpack.i.l.bf16 %v7419_v26 }
 0x338   : > { %v3821_v56 = vsel %vm3816_vm14, %v3788_v29, %v7420_v51  ;;  %v3822_v44 = vsel %vm3816_vm14, %v3789_v13, %v7421_v34  ;;  %v7454_v19 = vpop.permute.xlu1 %7453  ;;  %v7639_v34 = vld [vmem:[#allocation3 + $0x67] sm:$0xff]  ;;  %v3676_v29 = vsel %vm1968_vm8, %v3644_v22, %v7360_v53 }
 0x339   : > { %v7499_v58 = vpop.permute.xlu0 %7498  ;;  %v3853_v18 = vpack.c.bf16 %v3822_v44, %v3821_v56  ;;  %v7456_v11 = vunpack.i.h.bf16 %v7454_v19  ;;  %v7455_v59 = vunpack.i.l.bf16 %v7454_v19  ;;  %v3626_v51 = vsel %vm1836_vm1, %v7639_v34, %v7135_v5 }
 0x33a   : > { %v7501_v26 = vunpack.i.h.bf16 %v7499_v58  ;;  %v7500_v63 = vunpack.i.l.bf16 %v7499_v58  ;;  %v7426_v56 = vunpack.i.h.bf16 %v9762_v16  ;;  %v7431_v58 = vunpack.i.h.bf16 %v9773_v55 }
 0x33b   : > { %4050 = vmatmul.mubr.bf16.gmra.mrb[40].mxu0 %v3853_v18  ;;  %v3807_v43 = vsel %vm3783_vm13, %v3774_v1, %v7456_v11  ;;  %v3806_v45 = vsel %vm3783_vm13, %v3773_v17, %v7455_v59  ;;  %v7430_v19 = vunpack.i.l.bf16 %v9773_v55 }
 0x33c   : > { %6134 = vmatprep.mubr.msk.bf16.mxu0 %vm1836_vm1, %v3856_v38  ;;  %v7459_v8 = vpop.permute.xlu1 %7458  ;;  %v2460_v38 = vld [vmem:[#allocation3 + $0x18f] sm:$0xff]  ;;  %v3659_v9 = vsel %vm1968_vm8, %v3627_v50, %v7501_v26  ;;  %v3658_v28 = vsel %vm1968_vm8, %v3626_v51, %v7500_v63 }
 0x33d   : > { %v7509_v25 = vpop.permute.xlu0 %7508  ;;  %v7461_v47 = vunpack.i.h.bf16 %v7459_v8  ;;  %v7460_v10 = vunpack.i.l.bf16 %v7459_v8  ;;  %v3645_v21 = vsel %vm1836_vm1, %v2460_v38, %v7331_v7  ;;  %v2700_v50 = vld [vmem:[#allocation3 + $0xc9] sm:$0xff] }
 0x33e   : > { %v3677_v13 = vsel %vm1968_vm8, %v3645_v21, %v7361_v30  ;;  %v7511_v44 = vunpack.i.h.bf16 %v7509_v25  ;;  %v7510_v14 = vunpack.i.l.bf16 %v7509_v25  ;;  %v7450_v25 = vunpack.i.l.bf16 %v9807_v4 }
 0x33f   : > { %v3839_v41 = vsel %vm3816_vm14, %v3806_v45, %v7460_v10  ;;  %v3840_v39 = vsel %vm3816_vm14, %v3807_v43, %v7461_v47 }
 0x340   : > { %v7464_v60 = vpop.permute.xlu1 %7463  ;;  %v3871_v20 = vpack.c.bf16 %v3840_v39, %v3839_v41  ;;  %v3691_v8 = vsel %vm3684_vm10, %v3658_v28, %v7510_v14  ;;  %v3692_v55 = vsel %vm3684_vm10, %v3659_v9, %v7511_v44  ;;  %v7436_v9 = vunpack.i.h.bf16 %v9782_v40 }
 0x341   : > { %v7519_v48 = vpop.permute.xlu0 %7518  ;;  %v7466_v11 = vunpack.i.h.bf16 %v7464_v60  ;;  %v7465_v59 = vunpack.i.l.bf16 %v7464_v60  ;;  %v7435_v28 = vunpack.i.l.bf16 %v9782_v40 }
 0x342   : > { %4122 = vmatmul.mubr.bf16.gmra.mrb[24].mxu1 %v3871_v20  ;;  %v7521_v18 = vunpack.i.h.bf16 %v7519_v48  ;;  %v7520_v36 = vunpack.i.l.bf16 %v7519_v48 }
 0x343   : > { %6143 = vmatprep.mubr.msk.bf16.mxu1 %vm1836_vm1, %v3874_v12  ;;  %v3710_v5 = vsel %vm3684_vm10, %v3677_v13, %v7466_v11  ;;  %v3709_v38 = vsel %vm3684_vm10, %v3676_v29, %v7465_v59  ;;  %v2701_v29 = vld [vmem:[#allocation3 + $0xd1] sm:$0xff] }
 0x344   : > { %v7469_v2 = vpop.permute.xlu1 %7468  ;;  %v3724_v17 = vsel %vm3717_vm11, %v3691_v8, %v7520_v36  ;;  %v3725_v1 = vsel %vm3717_vm11, %v3692_v55, %v7521_v18 }
 0x345   : > { %v7529_v24 = vpop.permute.xlu0 %7528  ;;  %v7471_v61 = vunpack.i.h.bf16 %v7469_v2  ;;  %v7470_v7 = vunpack.i.l.bf16 %v7469_v2  ;;  %v3858_v2 = vpack.c.bf16 %v2701_v29, %v2700_v50 }
 0x346   : > { %v7531_v3 = vunpack.i.h.bf16 %v7529_v24  ;;  %v7530_v16 = vunpack.i.l.bf16 %v7529_v24  ;;  %v3646_v24 = vsel %vm1836_vm1, %v9479_v27, %v7450_v25  ;;  %v10641_v27 = vpack.c.bf16 %v9361_v31, %v9357_v23 }
 0x347   : > { %v3742_v15 = vsel %vm3717_vm11, %v3709_v38, %v7470_v7  ;;  %v3743_v22 = vsel %vm3717_vm11, %v3710_v5, %v7471_v61  ;;  %v7445_v25 = vunpack.i.l.bf16 %v9796_v35 }
 0x348   : > { %v7474_v49 = vpop.permute.xlu1 %7473  ;;  %v3757_v4 = vsel %vm3750_vm12, %v3724_v17, %v7530_v16  ;;  %v3758_v46 = vsel %vm3750_vm12, %v3725_v1, %v7531_v3  ;;  %v7441_v3 = vunpack.i.h.bf16 %v9786_v52  ;;  %v7440_v16 = vunpack.i.l.bf16 %v9786_v52 }
 0x349   : > { %v7539_v6 = vpop.permute.xlu0 %7538  ;;  %v7476_v43 = vunpack.i.h.bf16 %v7474_v49  ;;  %v7475_v45 = vunpack.i.l.bf16 %v7474_v49 }
 0x34a   : > { %v7541_v47 = vunpack.i.h.bf16 %v7539_v6  ;;  %v7540_v10 = vunpack.i.l.bf16 %v7539_v6 }
 0x34b   : > { %v3775_v41 = vsel %vm3750_vm12, %v3742_v15, %v7475_v45  ;;  %v3776_v39 = vsel %vm3750_vm12, %v3743_v22, %v7476_v43  ;;  %v7131_v43 = vunpack.i.h.bf16 %v9454_v33 }
 0x34c   : > { %v3790_v21 = vsel %vm3783_vm13, %v3757_v4, %v7540_v10  ;;  %v3791_v48 = vsel %vm3783_vm13, %v3758_v46, %v7541_v47  ;;  %v7479_v20 = vpop.permute.xlu1 %7478  ;;  %v3808_v26 = vsel %vm3783_vm13, %v3775_v41, %v7425_v32  ;;  %v3809_v63 = vsel %vm3783_vm13, %v3776_v39, %v7426_v56 }
 0x34d   : > { %v7549_v30 = vpop.permute.xlu0 %7548  ;;  %v7481_v12 = vunpack.i.h.bf16 %v7479_v20  ;;  %v7480_v34 = vunpack.i.l.bf16 %v7479_v20  ;;  %v3841_v51 = vsel %vm3816_vm14, %v3808_v26, %v7430_v19  ;;  %v3842_v54 = vsel %vm3816_vm14, %v3809_v63, %v7431_v58  ;;  %v7642_v20 = vld [vmem:[#allocation3 + $0x8f] sm:$0xff] }
 0x34e   : > { %v7551_v53 = vunpack.i.h.bf16 %v7549_v30  ;;  %v7550_v60 = vunpack.i.l.bf16 %v7549_v30  ;;  %v3873_v13 = vpack.c.bf16 %v3842_v54, %v3841_v51  ;;  %v3647_v32 = vsel %vm1836_vm1, %v9470_v0, %v7451_v37 }
 0x34f   : > { %v3678_v36 = vsel %vm1968_vm8, %v3646_v24, %v7480_v34  ;;  %v3679_v19 = vsel %vm1968_vm8, %v3647_v32, %v7481_v12  ;;  %v7446_v37 = vunpack.i.h.bf16 %v9796_v35  ;;  %v7130_v35 = vunpack.i.l.bf16 %v9454_v33 }
 0x350   : > { %v3823_v44 = vsel %vm3816_vm14, %v3790_v21, %v7550_v60  ;;  %v3824_v14 = vsel %vm3816_vm14, %v3791_v48, %v7551_v53  ;;  %4130 = vmatmul.mubr.bf16.gmra.mrb[28].mxu1 %v3873_v13  ;;  %v9882_v58 = vpop.permute.xlu1 %7483  ;;  %v3711_v0 = vsel %vm3684_vm10, %v3678_v36, %v7435_v28  ;;  %v3712_v11 = vsel %vm3684_vm10, %v3679_v19, %v7436_v9  ;;  %v7641_v53 = vld [vmem:[#allocation3 + $0x87] sm:$0xff] }
 0x351   : > { %v7559_v56 = vpop.permute.xlu0 %7558  ;;  %v3855_v18 = vpack.c.bf16 %v3824_v14, %v3823_v44  ;;  %6144 = vmatprep.mubr.msk.bf16.mxu1 %vm1836_vm1, %v10641_v27  ;;  %v3744_v40 = vsel %vm3717_vm11, %v3711_v0, %v7440_v16  ;;  %v3745_v7 = vsel %vm3717_vm11, %v3712_v11, %v7441_v3  ;;  %v10642_v39 = vpack.c.bf16 %v9363_v42, %v9359_v57 }
 0x352   : > { %v3777_v6 = vsel %vm3750_vm12, %v3744_v40, %v7445_v25  ;;  %v3778_v17 = vsel %vm3750_vm12, %v3745_v7, %v7446_v37  ;;  %v7561_v46 = vunpack.i.h.bf16 %v7559_v56  ;;  %v7560_v15 = vunpack.i.l.bf16 %v7559_v56  ;;  %v2463_v40 = vld [vmem:[#allocation3 + $0x1c7] sm:$0xff]  ;;  %v2464_v7 = vld [vmem:[#allocation3 + $0x1cf] sm:$0xff] }
 0x353   : > { %4058 = vmatmul.mubr.bf16.gmra.mrb[44].mxu0 %v3855_v18  ;;  %v3628_v60 = vsel %vm1836_vm1, %v7641_v53, %v7130_v35  ;;  %v3629_v33 = vsel %vm1836_vm1, %v7642_v20, %v7131_v43  ;;  %v7406_v0 = vunpack.i.h.bf16 %v9784_v62  ;;  %v7405_v11 = vunpack.i.l.bf16 %v9784_v62  ;;  %v2722_v43 = vld [vmem:[#allocation3 + $0x229] sm:$0xff]  ;;  %v2723_v35 = vld [vmem:[#allocation3 + $0x231] sm:$0xff] }
 0x354   : > { %6135 = vmatprep.mubr.msk.bf16.mxu0 %vm1836_vm1, %v3858_v2  ;;  %v7489_v61 = vpop.permute.xlu1 %7488  ;;  %v3661_v34 = vsel %vm1968_vm8, %v3629_v33, %v7561_v46  ;;  %v3660_v51 = vsel %vm1968_vm8, %v3628_v60, %v7560_v15 }
 0x355   : > { %v7569_v59 = vpop.permute.xlu0 %7568  ;;  %v7491_v23 = vunpack.i.h.bf16 %v7489_v61  ;;  %v7490_v31 = vunpack.i.l.bf16 %v7489_v61  ;;  %v3648_v25 = vsel %vm1836_vm1, %v2463_v40, %v7405_v11 }
 0x356   : > { %v7571_v22 = vunpack.i.h.bf16 %v7569_v59  ;;  %v7570_v21 = vunpack.i.l.bf16 %v7569_v59 }
 0x357   : > { %v3811_v52 = vsel %vm3783_vm13, %v3778_v17, %v7491_v23  ;;  %v3810_v10 = vsel %vm3783_vm13, %v3777_v6, %v7490_v31 }
 0x358   : > { %v7494_v55 = vpop.permute.xlu1 %7493  ;;  %v3693_v57 = vsel %vm3684_vm10, %v3660_v51, %v7570_v21  ;;  %v3694_v42 = vsel %vm3684_vm10, %v3661_v34, %v7571_v22 }
 0x359   : > { %v7579_v8 = vpop.permute.xlu0 %7578  ;;  %v7496_v1 = vunpack.i.h.bf16 %v7494_v55  ;;  %v7495_v47 = vunpack.i.l.bf16 %v7494_v55 }
 0x35a   : > { %v7581_v48 = vunpack.i.h.bf16 %v7579_v8  ;;  %v7580_v41 = vunpack.i.l.bf16 %v7579_v8  ;;  %v3649_v8 = vsel %vm1836_vm1, %v2464_v7, %v7406_v0 }
 0x35b   : > { %v3843_v5 = vsel %vm3816_vm14, %v3810_v10, %v7495_v47  ;;  %v3844_v38 = vsel %vm3816_vm14, %v3811_v52, %v7496_v1 }
 0x35c   : > { %v7504_v45 = vpop.permute.xlu1 %7503  ;;  %v3875_v4 = vpack.c.bf16 %v3844_v38, %v3843_v5  ;;  %v3726_v29 = vsel %vm3717_vm11, %v3693_v57, %v7580_v41  ;;  %v3727_v13 = vsel %vm3717_vm11, %v3694_v42, %v7581_v48 }
 0x35d   : > { %v7589_v49 = vpop.permute.xlu0 %7588  ;;  %v7506_v59 = vunpack.i.h.bf16 %v7504_v45  ;;  %v7505_v3 = vunpack.i.l.bf16 %v7504_v45 }
 0x35e   : > { %4138 = vmatmul.mubr.bf16.gmra.mrb[32].mxu1 %v3875_v4  ;;  %v7591_v26 = vunpack.i.h.bf16 %v7589_v49  ;;  %v7590_v63 = vunpack.i.l.bf16 %v7589_v49 }
 0x35f   : > { %6145 = vmatprep.mubr.msk.bf16.mxu1 %vm1836_vm1, %v10642_v39  ;;  %v3681_v17 = vsel %vm1968_vm8, %v3649_v8, %v7506_v59  ;;  %v3680_v62 = vsel %vm1968_vm8, %v3648_v25, %v7505_v3  ;;  %v3880_v39 = vpack.c.bf16 %v2723_v35, %v2722_v43  ;;  %v4340_v8 = vlaneseq }
 0x360   : > { %v7514_v12 = vpop.permute.xlu1 %7513  ;;  %v3759_v14 = vsel %vm3750_vm12, %v3726_v29, %v7590_v63  ;;  %v3760_v24 = vsel %vm3750_vm12, %v3727_v13, %v7591_v26  ;;  %v7486_v26 = vunpack.i.h.bf16 %v9882_v58  ;;  %v7485_v63 = vunpack.i.l.bf16 %v9882_v58  ;;  %v7643_v29 = vld [vmem:[#allocation3 + $0x1e7] sm:$0xff] }
 0x361   : > { %v7599_v30 = vpop.permute.xlu0 %7598  ;;  %v7516_v16 = vunpack.i.h.bf16 %v7514_v12  ;;  %v7515_v61 = vunpack.i.l.bf16 %v7514_v12 }
 0x362   : > { %v7601_v54 = vunpack.i.h.bf16 %v7599_v30  ;;  %v7600_v50 = vunpack.i.l.bf16 %v7599_v30  ;;  %v3650_v13 = vsel %vm1836_vm1, %v7643_v29, %v7485_v63 }
 0x363   : > { %v3713_v52 = vsel %vm3684_vm10, %v3680_v62, %v7515_v61  ;;  %v3714_v10 = vsel %vm3684_vm10, %v3681_v17, %v7516_v16 }
 0x364   : > { %v7524_v18 = vpop.permute.xlu1 %7523  ;;  %v3792_v36 = vsel %vm3783_vm13, %v3759_v14, %v7600_v50  ;;  %v3793_v19 = vsel %vm3783_vm13, %v3760_v24, %v7601_v54 }
 0x365   : > { %v7609_v44 = vpop.permute.xlu0 %7608  ;;  %v7526_v23 = vunpack.i.h.bf16 %v7524_v18  ;;  %v7525_v31 = vunpack.i.l.bf16 %v7524_v18 }
 0x366   : > { %v7611_v32 = vunpack.i.h.bf16 %v7609_v44  ;;  %v7610_v56 = vunpack.i.l.bf16 %v7609_v44  ;;  %v7644_v44 = vld [vmem:[#allocation3 + $0x1ef] sm:$0xff] }
 0x367   : > { %v3746_v49 = vsel %vm3717_vm11, %v3713_v52, %v7525_v31  ;;  %v3747_v5 = vsel %vm3717_vm11, %v3714_v10, %v7526_v23  ;;  %v3651_v14 = vsel %vm1836_vm1, %v7644_v44, %v7486_v26  ;;  %v9961_v31 = vld [vmem:[%s10560_s5] ss:$0 sm:$0xff] }
 0x368   : > { %v3825_v2 = vsel %vm3816_vm14, %v3792_v36, %v7610_v56  ;;  %v3826_v9 = vsel %vm3816_vm14, %v3793_v19, %v7611_v32  ;;  %v7534_v27 = vpop.permute.xlu1 %7533 }
 0x369   : > { %v3857_v28 = vpack.c.bf16 %v3826_v9, %v3825_v2  ;;  %v7536_v55 = vunpack.i.h.bf16 %v7534_v27  ;;  %v7535_v6 = vunpack.i.l.bf16 %v7534_v27 }
 0x36b   : > { %4066 = vmatmul.mubr.bf16.gmra.mrb[48].mxu0 %v3857_v28  ;;  %v3779_v45 = vsel %vm3750_vm12, %v3746_v49, %v7535_v6  ;;  %v3780_v4 = vsel %vm3750_vm12, %v3747_v5, %v7536_v55  ;;  %v9966_v6 = vld [vmem:[%s10561_s6] ss:$0 sm:$0xff] }
 0x36c   : > { %v7544_v37 = vpop.permute.xlu1 %7543 }
 0x36d   : > { %v7546_v1 = vunpack.i.h.bf16 %v7544_v37  ;;  %v7545_v47 = vunpack.i.l.bf16 %v7544_v37  ;;  %v7726_v37 = vmov 1983009808  }
 0x36e   : > { %v4338_v25 = vunpack.c.l.s4 %v7726_v37 }
 0x36f   : > { %v3812_v22 = vsel %vm3783_vm13, %v3779_v45, %v7545_v47  ;;  %v3813_v21 = vsel %vm3783_vm13, %v3780_v4, %v7546_v1  ;;  %v4341_v47 = vshrl.u32 %v4340_v8, 7 }
 0x370   : > { %v7554_v38 = vpop.permute.xlu1 %7553  ;;  %v4339_v1 = vunpack.c.0.s8 %v4338_v25 }
 0x371   : > { %v7556_v46 = vunpack.i.h.bf16 %v7554_v38  ;;  %v7555_v15 = vunpack.i.l.bf16 %v7554_v38  ;;  %v9993_v44 = vsub.s32 0, %v4341_v47 }
 0x372   : > { %v9979_v35 = vsub.s32 %v4339_v1, %v4341_v47 }
 0x373   : > { %v3845_v48 = vsel %vm3816_vm14, %v3812_v22, %v7555_v15  ;;  %v3846_v41 = vsel %vm3816_vm14, %v3813_v21, %v7556_v46 }
 0x374   : > { %v7564_v30 = vpop.permute.xlu1 %7563  ;;  %v3877_v53 = vpack.c.bf16 %v3846_v41, %v3845_v48 }
 0x375   : > { %v7566_v12 = vunpack.i.h.bf16 %v7564_v30  ;;  %v7565_v34 = vunpack.i.l.bf16 %v7564_v30 }
 0x376   : > { %4146 = vmatmul.mubr.bf16.gmra.mrb[36].mxu1 %v3877_v53 }
 0x377   : > { %6146 = vmatprep.mubr.msk.bf16.mxu1 %vm1836_vm1, %v3880_v39  ;;  %v3682_v56 = vsel %vm1968_vm8, %v3650_v13, %v7565_v34  ;;  %v3683_v18 = vsel %vm1968_vm8, %v3651_v14, %v7566_v12 }
 0x378   : > { %v7574_v60 = vpop.permute.xlu1 %7573 }
 0x379   : > { %v7576_v51 = vunpack.i.h.bf16 %v7574_v60  ;;  %v7575_v54 = vunpack.i.l.bf16 %v7574_v60 }
 0x37b   : > { %v3715_v19 = vsel %vm3684_vm10, %v3682_v56, %v7575_v54  ;;  %v3716_v2 = vsel %vm3684_vm10, %v3683_v18, %v7576_v51 }
 0x37c   : > { %v7584_v20 = vpop.permute.xlu1 %7583 }
 0x37d   : > { %v7586_v50 = vunpack.i.h.bf16 %v7584_v20  ;;  %v7585_v57 = vunpack.i.l.bf16 %v7584_v20 }
 0x37f   : > { %v3748_v9 = vsel %vm3717_vm11, %v3715_v19, %v7585_v57  ;;  %v3749_v28 = vsel %vm3717_vm11, %v3716_v2, %v7586_v50 }
 0x380   : > { %v7594_v33 = vpop.permute.xlu1 %7593 }
 0x381   : > { %v7596_v24 = vunpack.i.h.bf16 %v7594_v33  ;;  %v7595_v32 = vunpack.i.l.bf16 %v7594_v33 }
 0x383   : > { %v3781_v0 = vsel %vm3750_vm12, %v3748_v9, %v7595_v32  ;;  %v3782_v11 = vsel %vm3750_vm12, %v3749_v28, %v7596_v24 }
 0x384   : > { %v7604_v42 = vpop.permute.xlu1 %7603 }
 0x385   : > { %v7606_v58 = vunpack.i.h.bf16 %v7604_v42  ;;  %v7605_v36 = vunpack.i.l.bf16 %v7604_v42 }
 0x387   : > { %v3814_v16 = vsel %vm3783_vm13, %v3781_v0, %v7605_v36  ;;  %v3815_v61 = vsel %vm3783_vm13, %v3782_v11, %v7606_v58 }
 0x388   : > { %v7614_v27 = vpop.permute.xlu1 %7613 }
 0x389   : > { %v7616_v59 = vunpack.i.h.bf16 %v7614_v27  ;;  %v7615_v3 = vunpack.i.l.bf16 %v7614_v27 }
 0x38b   : > { %v3847_v40 = vsel %vm3816_vm14, %v3814_v16, %v7615_v3  ;;  %v3848_v7 = vsel %vm3816_vm14, %v3815_v61, %v7616_v59 }
 0x38c   : > { %v3879_v23 = vpack.c.bf16 %v3848_v7, %v3847_v40 }
 0x38e   : > { %4154 = vmatmul.mubr.bf16.gmra.mrb[40].mxu1 %v3879_v23 }
 0x390   : > { %v4035_v55 = vpop.f32.mrb[32].mxu0 }
 0x391   : > { %v4169_v17 = vmul.f32 %v9961_v31, %v4035_v55  ;;  %v4037_v62 = vpop.f32.mrb[33].mxu0 }
 0x392   : > { %v4038_v52 = vpop.f32.mrb[34].mxu0 }
 0x393   : > { %v4208_v10 = vadd.f32 %v9966_v6, %v4169_v17  ;;  %v4170_v49 = vmul.f32 %v9961_v31, %v4038_v52  ;;  %v4040_v5 = vpop.f32.mrb[35].mxu0 }
 0x395   : > { %v4240_v38 = vmax.f32 %v4208_v10, 0.0  ;;  %v4209_v43 = vadd.f32 %v9966_v6, %v4170_v49 }
 0x397   : > { %4272 = vst.msk [vmem:[%s9976_s20] sm:$0xff] %vm1836_vm1, %v4240_v38  ;;  %v4241_v45 = vmax.f32 %v4209_v43, 0.0  ;;  %v4336_v4 = vcombine.high %v4240_v38, %v4240_v38  ;;  %v4343_v46 = vrot.slane %v4240_v38, %v9979_v35 }
 0x399   : > { %4273 = vst.msk [vmem:[%s9976_s20 + $0x8] sm:$0xff] %vm1836_vm1, %v4241_v45  ;;  %v4350_v15 = vrot.slane %v4336_v4, %v9979_v35  ;;  %v4353_v22 = vcombine.high %v4241_v45, %v4241_v45  ;;  %v4351_v21 = vcombine.high %v4343_v46, %v4343_v46  ;;  %v4360_v48 = vrot.slane %v4241_v45, %v9979_v35 }
 0x39a   : > { %v6149_v33 = vrot.slane %v4343_v46, 9 }
 0x39b   : > { %v4352_v53 = vcombine.high %v4350_v15, %v4350_v15  ;;  %v4367_v60 = vrot.slane %v4353_v22, %v9979_v35  ;;  %v6150_v34 = vrot.slane %v4351_v21, 9  ;;  %v6151_v51 = vrot.slane %v4350_v15, 9 }
 0x39c   : > { %v4368_v54 = vcombine.high %v4360_v48, %v4360_v48  ;;  %v6153_v13 = vrot.slane %v4360_v48, 9  ;;  %v5392_v14 = vmax.f32 %v4343_v46, %v6149_v33 }
 0x39d   : > { %v6152_v42 = vrot.slane %v4352_v53, 9  ;;  %v4369_v29 = vcombine.high %v4367_v60, %v4367_v60  ;;  %v5393_v18 = vmax.f32 %v4351_v21, %v6150_v34  ;;  %v5394_v58 = vmax.f32 %v4350_v15, %v6151_v51 }
 0x39e   : > { %v4043_v41 = vpop.f32.mrb[36].mxu0  ;;  %v6154_v36 = vrot.slane %v4368_v54, 9  ;;  %v6155_v19 = vrot.slane %v4367_v60, 9  ;;  %v5396_v59 = vmax.f32 %v4360_v48, %v6153_v13 }
 0x39f   : > { %v4171_v39 = vmul.f32 %v9961_v31, %v4043_v41  ;;  %v4045_v30 = vpop.f32.mrb[37].mxu0  ;;  %v5395_v0 = vmax.f32 %v4352_v53, %v6152_v42  ;;  %v6156_v11 = vrot.slane %v4369_v29, 9 }
 0x3a0   : > { %v4046_v20 = vpop.f32.mrb[38].mxu0  ;;  %v5397_v23 = vmax.f32 %v4368_v54, %v6154_v36  ;;  %v5398_v5 = vmax.f32 %v4367_v60, %v6155_v19 }
 0x3a1   : > { %v4210_v26 = vadd.f32 %v9966_v6, %v4171_v39  ;;  %v4172_v63 = vmul.f32 %v9961_v31, %v4046_v20  ;;  %v4048_v12 = vpop.f32.mrb[39].mxu0  ;;  %v5399_v30 = vmax.f32 %v4369_v29, %v6156_v11 }
 0x3a3   : > { %v4242_v50 = vmax.f32 %v4210_v26, 0.0  ;;  %v4211_v57 = vadd.f32 %v9966_v6, %v4172_v63 }
 0x3a5   : > { %4274 = vst.msk [vmem:[%s9976_s20 + $0x10] sm:$0xff] %vm1836_vm1, %v4242_v50  ;;  %v4370_v24 = vcombine.high %v4242_v50, %v4242_v50  ;;  %v4377_v32 = vrot.slane %v4242_v50, %v9979_v35  ;;  %v4243_v56 = vmax.f32 %v4211_v57, 0.0 }
 0x3a7   : > { %v4384_v2 = vrot.slane %v4370_v24, %v9979_v35  ;;  %v4385_v9 = vcombine.high %v4377_v32, %v4377_v32  ;;  %v6157_v28 = vrot.slane %v4377_v32, 9  ;;  %4275 = vst.msk [vmem:[%s9976_s20 + $0x18] sm:$0xff] %vm1836_vm1, %v4243_v56  ;;  %v4387_v27 = vcombine.high %v4243_v56, %v4243_v56 }
 0x3a8   : > { %v4394_v3 = vrot.slane %v4243_v56, %v9979_v35 }
 0x3a9   : > { %v4386_v16 = vcombine.high %v4384_v2, %v4384_v2  ;;  %v6158_v61 = vrot.slane %v4385_v9, 9  ;;  %v6159_v40 = vrot.slane %v4384_v2, 9  ;;  %v5400_v7 = vmax.f32 %v4377_v32, %v6157_v28 }
 0x3aa   : > { %v4401_v37 = vrot.slane %v4387_v27, %v9979_v35  ;;  %v4402_v25 = vcombine.high %v4394_v3, %v4394_v3  ;;  %v6161_v8 = vrot.slane %v4394_v3, 9 }
 0x3ab   : > { %v6160_v55 = vrot.slane %v4386_v16, 9  ;;  %v5401_v17 = vmax.f32 %v4385_v9, %v6158_v61  ;;  %v5402_v62 = vmax.f32 %v4384_v2, %v6159_v40  ;;  %v5520_v1 = vmax.f32 %v5392_v14, %v5400_v7 }
 0x3ac   : > { %v4403_v47 = vcombine.high %v4401_v37, %v4401_v37  ;;  %v6162_v52 = vrot.slane %v4402_v25, 9  ;;  %v6163_v10 = vrot.slane %v4401_v37, 9  ;;  %v5404_v49 = vmax.f32 %v4394_v3, %v6161_v8 }
 0x3ad   : > { %v5403_v38 = vmax.f32 %v4386_v16, %v6160_v55  ;;  %v5521_v43 = vmax.f32 %v5393_v18, %v5401_v17  ;;  %v5522_v45 = vmax.f32 %v5394_v58, %v5402_v62  ;;  %v5651_v48 = vrot.slane %v5520_v1, %v9993_v44 }
 0x3ae   : > { %v6164_v4 = vrot.slane %v4403_v47, 9  ;;  %v5405_v46 = vmax.f32 %v4402_v25, %v6162_v52  ;;  %v5406_v15 = vmax.f32 %v4401_v37, %v6163_v10  ;;  %v5524_v22 = vmax.f32 %v5396_v59, %v5404_v49 }
 0x3af   : > { %v5523_v21 = vmax.f32 %v5395_v0, %v5403_v38  ;;  %v5655_v41 = vrot.slane %v5521_v43, %v9993_v44  ;;  %v5659_v39 = vrot.slane %v5522_v45, %v9993_v44 }
 0x3b0   : > { %v5407_v53 = vmax.f32 %v4403_v47, %v6164_v4  ;;  %v5525_v20 = vmax.f32 %v5397_v23, %v5405_v46  ;;  %v5526_v60 = vmax.f32 %v5398_v5, %v5406_v15  ;;  %v5667_v34 = vrot.slane %v5524_v22, %v9993_v44 }
 0x3b1   : > { %v5663_v33 = vrot.slane %v5523_v21, %v9993_v44  ;;  %v5905_v26 = vsel %vm5904_vm15, %v5655_v41, %v5651_v48 }
 0x3b2   : > { %v5907_v63 = vsel %vm5906_vm0, %v5659_v39, %v5905_v26  ;;  %v5527_v12 = vmax.f32 %v5399_v30, %v5407_v53  ;;  %v5671_v51 = vrot.slane %v5525_v20, %v9993_v44  ;;  %v5675_v50 = vrot.slane %v5526_v60, %v9993_v44 }
 0x3b3   : > { %v5909_v54 = vsel %vm5908_vm2, %v5663_v33, %v5907_v63 }
 0x3b4   : > { %v5911_v57 = vsel %vm5910_vm3, %v5667_v34, %v5909_v54  ;;  %v5679_v42 = vrot.slane %v5527_v12, %v9993_v44 }
 0x3b5   : > { %v5913_v29 = vsel %vm5912_vm4, %v5671_v51, %v5911_v57 }
 0x3b6   : > { %v5915_v13 = vsel %vm5914_vm5, %v5675_v50, %v5913_v29 }
 0x3b7   : > { %v5917_v14 = vsel %vm5916_vm6, %v5679_v42, %v5915_v13 }
 0x3b8   : > { %5975 = vst.msk [vmem:[%s10021_s12] sm:$0xff] %vm1836_vm1, %v5917_v14 }
 0x3c7   : > { %v4075_v24 = vpop.f32.mrb[0].mxu1 }
 0x3c8   : > { %v4179_v32 = vmul.f32 %v9961_v31, %v4075_v24  ;;  %v4077_v56 = vpop.f32.mrb[1].mxu1 }
 0x3c9   : > { %v4078_v18 = vpop.f32.mrb[2].mxu1 }
 0x3ca   : > { %v4218_v58 = vadd.f32 %v9966_v6, %v4179_v32  ;;  %v4180_v36 = vmul.f32 %v9961_v31, %v4078_v18  ;;  %v4080_v19 = vpop.f32.mrb[3].mxu1 }
 0x3cc   : > { %v4250_v2 = vmax.f32 %v4218_v58, 0.0  ;;  %v4219_v9 = vadd.f32 %v9966_v6, %v4180_v36 }
 0x3ce   : > { %4282 = vst.msk [vmem:[%s9976_s20 + $0x50] sm:$0xff] %vm1836_vm1, %v4250_v2  ;;  %v10031_v28 = vmax.f32 %v4219_v9, 0.0  ;;  %v4506_v5 = vcombine.high %v4250_v2, %v4250_v2  ;;  %v10052_v30 = vrot.slane %v4250_v2, %v9979_v35 }
 0x3cf   : > { %v4083_v27 = vpop.f32.mrb[4].mxu1 }
 0x3d0   : > { %4283 = vst.msk [vmem:[%s9976_s20 + $0x58] sm:$0xff] %vm1836_vm1, %v10031_v28  ;;  %v4085_v0 = vpop.f32.mrb[5].mxu1  ;;  %v4181_v11 = vmul.f32 %v9961_v31, %v4083_v27  ;;  %v10056_v60 = vrot.slane %v4506_v5, %v9979_v35 }
 0x3d1   : > { %v4086_v59 = vpop.f32.mrb[6].mxu1 }
 0x3d2   : > { %v4088_v3 = vpop.f32.mrb[7].mxu1  ;;  %v4220_v16 = vadd.f32 %v9966_v6, %v4181_v11  ;;  %v4182_v61 = vmul.f32 %v9961_v31, %v4086_v59 }
 0x3d4   : > { %v4252_v40 = vmax.f32 %v4220_v16, 0.0  ;;  %v4221_v7 = vadd.f32 %v9966_v6, %v4182_v61 }
 0x3d6   : > { %4284 = vst.msk [vmem:[%s9976_s20 + $0x60] sm:$0xff] %vm1836_vm1, %v4252_v40  ;;  %v4253_v23 = vmax.f32 %v4221_v7, 0.0  ;;  %v4540_v37 = vcombine.high %v4252_v40, %v4252_v40  ;;  %v4547_v25 = vrot.slane %v4252_v40, %v9979_v35 }
 0x3d8   : > { %4285 = vst.msk [vmem:[%s9976_s20 + $0x68] sm:$0xff] %vm1836_vm1, %v4253_v23  ;;  %v4554_v8 = vrot.slane %v4540_v37, %v9979_v35  ;;  %v4557_v55 = vcombine.high %v4253_v23, %v4253_v23  ;;  %v4564_v17 = vrot.slane %v4253_v23, %v9979_v35  ;;  %v4555_v62 = vcombine.high %v4547_v25, %v4547_v25 }
 0x3d9   : > { %v6197_v38 = vrot.slane %v4547_v25, 9 }
 0x3da   : > { %v4556_v1 = vcombine.high %v4554_v8, %v4554_v8  ;;  %v4571_v47 = vrot.slane %v4557_v55, %v9979_v35  ;;  %v4572_v43 = vcombine.high %v4564_v17, %v4564_v17  ;;  %v6198_v4 = vrot.slane %v4555_v62, 9 }
 0x3db   : > { %v6199_v21 = vrot.slane %v4554_v8, 9  ;;  %v6201_v39 = vrot.slane %v4564_v17, 9  ;;  %v5440_v33 = vmax.f32 %v4547_v25, %v6197_v38 }
 0x3dc   : > { %v6200_v48 = vrot.slane %v4556_v1, 9  ;;  %v4573_v41 = vcombine.high %v4571_v47, %v4571_v47  ;;  %v6202_v26 = vrot.slane %v4572_v43, 9  ;;  %v6203_v63 = vrot.slane %v4571_v47, 9 }
 0x3dd   : > { %v5441_v12 = vmax.f32 %v4555_v62, %v6198_v4  ;;  %v5442_v50 = vmax.f32 %v4554_v8, %v6199_v21  ;;  %v5444_v29 = vmax.f32 %v4564_v17, %v6201_v39 }
 0x3de   : > { %v5443_v57 = vmax.f32 %v4556_v1, %v6200_v48  ;;  %v6204_v42 = vrot.slane %v4573_v41, 9  ;;  %v5445_v58 = vmax.f32 %v4572_v43, %v6202_v26  ;;  %v5446_v36 = vmax.f32 %v4571_v47, %v6203_v63 }
 0x3e0   : > { %v5447_v21 = vmax.f32 %v4573_v41, %v6204_v42 }
 0x3e3   : > { %v4091_v52 = vpop.f32.mrb[8].mxu1 }
 0x3e4   : > { %v4183_v10 = vmul.f32 %v9961_v31, %v4091_v52  ;;  %v4093_v49 = vpop.f32.mrb[9].mxu1 }
 0x3e5   : > { %v4094_v45 = vpop.f32.mrb[10].mxu1 }
 0x3e6   : > { %v4222_v46 = vadd.f32 %v9966_v6, %v4183_v10  ;;  %v4184_v15 = vmul.f32 %v9961_v31, %v4094_v45  ;;  %v4096_v22 = vpop.f32.mrb[11].mxu1 }
 0x3e8   : > { %v4254_v53 = vmax.f32 %v4222_v46, 0.0  ;;  %v4223_v20 = vadd.f32 %v9966_v6, %v4184_v15 }
 0x3ea   : > { %4286 = vst.msk [vmem:[%s9976_s20 + $0x70] sm:$0xff] %vm1836_vm1, %v4254_v53  ;;  %v4574_v34 = vcombine.high %v4254_v53, %v4254_v53  ;;  %v4581_v51 = vrot.slane %v4254_v53, %v9979_v35  ;;  %v4255_v54 = vmax.f32 %v4223_v20, 0.0 }
 0x3eb   : > { %v4099_v13 = vpop.f32.mrb[12].mxu1 }
 0x3ec   : > { %v4588_v14 = vrot.slane %v4574_v34, %v9979_v35  ;;  %v4589_v24 = vcombine.high %v4581_v51, %v4581_v51  ;;  %v6205_v32 = vrot.slane %v4581_v51, 9  ;;  %4287 = vst.msk [vmem:[%s9976_s20 + $0x78] sm:$0xff] %vm1836_vm1, %v4255_v54  ;;  %v4591_v56 = vcombine.high %v4255_v54, %v4255_v54  ;;  %v4101_v18 = vpop.f32.mrb[13].mxu1 }
 0x3ed   : > { %v4598_v19 = vrot.slane %v4255_v54, %v9979_v35  ;;  %v4185_v2 = vmul.f32 %v9961_v31, %v4099_v13  ;;  %v4102_v9 = vpop.f32.mrb[14].mxu1 }
 0x3ee   : > { %v4590_v27 = vcombine.high %v4588_v14, %v4588_v14  ;;  %v6206_v0 = vrot.slane %v4589_v24, 9  ;;  %v6207_v11 = vrot.slane %v4588_v14, 9  ;;  %v5448_v59 = vmax.f32 %v4581_v51, %v6205_v32  ;;  %v4104_v3 = vpop.f32.mrb[15].mxu1 }
 0x3ef   : > { %v4605_v16 = vrot.slane %v4591_v56, %v9979_v35  ;;  %v4606_v61 = vcombine.high %v4598_v19, %v4598_v19  ;;  %v6209_v40 = vrot.slane %v4598_v19, 9  ;;  %v4224_v7 = vadd.f32 %v9966_v6, %v4185_v2 }
 0x3f0   : > { %v6208_v23 = vrot.slane %v4590_v27, 9  ;;  %v5449_v37 = vmax.f32 %v4589_v24, %v6206_v0  ;;  %v5450_v25 = vmax.f32 %v4588_v14, %v6207_v11  ;;  %v5544_v8 = vmax.f32 %v5440_v33, %v5448_v59 }
 0x3f1   : > { %v4607_v55 = vcombine.high %v4605_v16, %v4605_v16  ;;  %v6210_v17 = vrot.slane %v4606_v61, 9  ;;  %v6211_v62 = vrot.slane %v4605_v16, 9  ;;  %v5452_v1 = vmax.f32 %v4598_v19, %v6209_v40 }
 0x3f2   : > { %v5451_v47 = vmax.f32 %v4590_v27, %v6208_v23  ;;  %v5545_v52 = vmax.f32 %v5441_v12, %v5449_v37  ;;  %v5546_v10 = vmax.f32 %v5442_v50, %v5450_v25  ;;  %v5747_v49 = vrot.slane %v5544_v8, %v9993_v44 }
 0x3f3   : > { %v6212_v5 = vrot.slane %v4607_v55, 9  ;;  %v5453_v38 = vmax.f32 %v4606_v61, %v6210_v17  ;;  %v5454_v43 = vmax.f32 %v4605_v16, %v6211_v62  ;;  %v5548_v45 = vmax.f32 %v5444_v29, %v5452_v1 }
 0x3f4   : > { %v5547_v4 = vmax.f32 %v5443_v57, %v5451_v47  ;;  %v5751_v46 = vrot.slane %v5545_v52, %v9993_v44  ;;  %v5755_v15 = vrot.slane %v5546_v10, %v9993_v44  ;;  %v4256_v22 = vmax.f32 %v4224_v7, 0.0 }
 0x3f5   : > { %v5455_v48 = vmax.f32 %v4607_v55, %v6212_v5  ;;  %v5549_v39 = vmax.f32 %v5445_v58, %v5453_v38  ;;  %v5550_v53 = vmax.f32 %v5446_v36, %v5454_v43  ;;  %v10078_v12 = vcombine.high %v10052_v30, %v10052_v30 }
 0x3f6   : > { %v5759_v20 = vrot.slane %v5547_v4, %v9993_v44  ;;  %v5932_v33 = vsel %vm5904_vm15, %v5751_v46, %v5747_v49  ;;  %4288 = vst.msk [vmem:[%s9976_s20 + $0x80] sm:$0xff] %vm1836_vm1, %v4256_v22  ;;  %v4608_v26 = vcombine.high %v4256_v22, %v4256_v22  ;;  %v4615_v63 = vrot.slane %v4256_v22, %v9979_v35 }
 0x3f7   : > { %v5933_v34 = vsel %vm5906_vm0, %v5755_v15, %v5932_v33  ;;  %v5551_v51 = vmax.f32 %v5447_v21, %v5455_v48  ;;  %v5763_v41 = vrot.slane %v5548_v45, %v9993_v44  ;;  %v4107_v54 = vpop.f32.mrb[16].mxu1  ;;  %v4523_v50 = vcombine.high %v10031_v28, %v10031_v28 }
 0x3f8   : > { %v5767_v57 = vrot.slane %v5549_v39, %v9993_v44  ;;  %v5934_v42 = vsel %vm5908_vm2, %v5759_v20, %v5933_v34  ;;  %v4622_v29 = vrot.slane %v4608_v26, %v9979_v35  ;;  %v4109_v13 = vpop.f32.mrb[17].mxu1  ;;  %v5771_v14 = vrot.slane %v5550_v53, %v9993_v44 }
 0x3f9   : > { %v5935_v24 = vsel %vm5910_vm3, %v5763_v41, %v5934_v42  ;;  %v4186_v32 = vmul.f32 %v9961_v31, %v4102_v9  ;;  %v4187_v56 = vmul.f32 %v9961_v31, %v4107_v54  ;;  %v4110_v18 = vpop.f32.mrb[18].mxu1  ;;  %v10093_v58 = vrot.slane %v10031_v28, %v9979_v35 }
 0x3fa   : > { %v5775_v36 = vrot.slane %v5551_v51, %v9993_v44  ;;  %v5936_v19 = vsel %vm5912_vm4, %v5767_v57, %v5935_v24  ;;  %v4623_v2 = vcombine.high %v4615_v63, %v4615_v63  ;;  %v4112_v27 = vpop.f32.mrb[19].mxu1  ;;  %v6189_v0 = vrot.slane %v10052_v30, 9 }
 0x3fb   : > { %v5937_v11 = vsel %vm5914_vm5, %v5771_v14, %v5936_v19  ;;  %v4225_v9 = vadd.f32 %v9966_v6, %v4186_v32  ;;  %v4226_v59 = vadd.f32 %v9966_v6, %v4187_v56  ;;  %v10103_v3 = vcombine.high %v10056_v60, %v10056_v60 }
 0x3fc   : > { %v5938_v28 = vsel %vm5916_vm6, %v5775_v36, %v5937_v11  ;;  %v4624_v16 = vcombine.high %v4622_v29, %v4622_v29  ;;  %v6213_v61 = vrot.slane %v4615_v63, 9  ;;  %v6190_v40 = vrot.slane %v10078_v12, 9 }
 0x3fd   : > { %5978 = vst.msk [vmem:[%s10021_s12 + $0x18] sm:$0xff] %vm1836_vm1, %v5938_v28  ;;  %v4257_v7 = vmax.f32 %v4225_v9, 0.0  ;;  %v4258_v23 = vmax.f32 %v4226_v59, 0.0  ;;  %v4188_v37 = vmul.f32 %v9961_v31, %v4110_v18  ;;  %v10111_v25 = vrot.slane %v4523_v50, %v9979_v35 }
 0x3fe   : > { %v10115_v8 = vcombine.high %v10093_v58, %v10093_v58  ;;  %v6214_v55 = vrot.slane %v4623_v2, 9  ;;  %v6215_v17 = vrot.slane %v4622_v29, 9  ;;  %v6216_v49 = vrot.slane %v4624_v16, 9 }
 0x3ff   : > { %4289 = vst.msk [vmem:[%s9976_s20 + $0x88] sm:$0xff] %vm1836_vm1, %v4257_v7  ;;  %v4625_v62 = vcombine.high %v4257_v7, %v4257_v7  ;;  %v4632_v1 = vrot.slane %v4257_v7, %v9979_v35  ;;  %4290 = vst.msk [vmem:[%s9976_s20 + $0x90] sm:$0xff] %vm1836_vm1, %v4258_v23  ;;  %v4642_v47 = vcombine.high %v4258_v23, %v4258_v23  ;;  %v4115_v10 = vpop.f32.mrb[20].mxu1 }
 0x400   : > { %v4649_v52 = vrot.slane %v4258_v23, %v9979_v35  ;;  %v5456_v5 = vmax.f32 %v4615_v63, %v6213_v61  ;;  %v4227_v38 = vadd.f32 %v9966_v6, %v4188_v37  ;;  %v4189_v43 = vmul.f32 %v9961_v31, %v4115_v10  ;;  %v4117_v45 = vpop.f32.mrb[21].mxu1 }
 0x401   : > { %v4639_v4 = vrot.slane %v4625_v62, %v9979_v35  ;;  %v4640_v46 = vcombine.high %v4632_v1, %v4632_v1  ;;  %v6217_v15 = vrot.slane %v4632_v1, 9  ;;  %v4656_v22 = vrot.slane %v4642_v47, %v9979_v35  ;;  %v10127_v21 = vpop.f32.mrb[22].mxu1 }
 0x402   : > { %v5457_v48 = vmax.f32 %v4623_v2, %v6214_v55  ;;  %v4657_v39 = vcombine.high %v4649_v52, %v4649_v52  ;;  %v6221_v53 = vrot.slane %v4649_v52, 9  ;;  %v4259_v20 = vmax.f32 %v4227_v38, 0.0  ;;  %v4120_v33 = vpop.f32.mrb[23].mxu1 }
 0x403   : > { %v5458_v26 = vmax.f32 %v4622_v29, %v6215_v17  ;;  %v4641_v63 = vcombine.high %v4639_v4, %v4639_v4  ;;  %v6218_v34 = vrot.slane %v4640_v46, 9  ;;  %v4228_v51 = vadd.f32 %v9966_v6, %v4189_v43 }
 0x404   : > { %v4658_v41 = vcombine.high %v4656_v22, %v4656_v22  ;;  %v6222_v54 = vrot.slane %v4657_v39, 9  ;;  %v6223_v50 = vrot.slane %v4656_v22, 9  ;;  %v5464_v57 = vmax.f32 %v4649_v52, %v6221_v53  ;;  %4291 = vst.msk [vmem:[%s9976_s20 + $0x98] sm:$0xff] %vm1836_vm1, %v4259_v20 }
 0x405   : > { %v5459_v42 = vmax.f32 %v4624_v16, %v6216_v49  ;;  %v6219_v13 = vrot.slane %v4639_v4, 9  ;;  %v5460_v14 = vmax.f32 %v4632_v1, %v6217_v15  ;;  %v4659_v24 = vcombine.high %v4259_v20, %v4259_v20 }
 0x406   : > { %v6224_v32 = vrot.slane %v4658_v41, 9  ;;  %v5465_v56 = vmax.f32 %v4657_v39, %v6222_v54  ;;  %v5466_v18 = vmax.f32 %v4656_v22, %v6223_v50  ;;  %v5552_v36 = vmax.f32 %v5456_v5, %v5464_v57 }
 0x407   : > { %v6220_v29 = vrot.slane %v4641_v63, 9  ;;  %v4666_v19 = vrot.slane %v4259_v20, %v9979_v35  ;;  %v4673_v2 = vrot.slane %v4659_v24, %v9979_v35  ;;  %v4260_v27 = vmax.f32 %v4228_v51, 0.0 }
 0x408   : > { %v5461_v11 = vmax.f32 %v4640_v46, %v6218_v34  ;;  %v5467_v9 = vmax.f32 %v4658_v41, %v6224_v32  ;;  %v5553_v59 = vmax.f32 %v5457_v48, %v5465_v56  ;;  %v5554_v28 = vmax.f32 %v5458_v26, %v5466_v18 }
 0x409   : > { %v4674_v61 = vcombine.high %v4666_v19, %v4666_v19  ;;  %v4675_v16 = vcombine.high %v4673_v2, %v4673_v2  ;;  %v6225_v7 = vrot.slane %v4666_v19, 9  ;;  %v6227_v23 = vrot.slane %v4673_v2, 9  ;;  %4292 = vst.msk [vmem:[%s9976_s20 + $0xa0] sm:$0xff] %vm1836_vm1, %v4260_v27 }
 0x40a   : > { %v5555_v37 = vmax.f32 %v5459_v42, %v5467_v9  ;;  %v5779_v55 = vrot.slane %v5552_v36, %v9993_v44  ;;  %v5783_v17 = vrot.slane %v5553_v59, %v9993_v44  ;;  %v5787_v62 = vrot.slane %v5554_v28, %v9993_v44 }
 0x40b   : > { %v6226_v1 = vrot.slane %v4674_v61, 9  ;;  %v6228_v47 = vrot.slane %v4675_v16, 9  ;;  %v5468_v52 = vmax.f32 %v4666_v19, %v6225_v7  ;;  %v5470_v10 = vmax.f32 %v4673_v2, %v6227_v23 }
 0x40c   : > { %v5462_v49 = vmax.f32 %v4639_v4, %v6219_v13  ;;  %v5463_v5 = vmax.f32 %v4641_v63, %v6220_v29  ;;  %v5791_v38 = vrot.slane %v5555_v37, %v9993_v44  ;;  %v5939_v43 = vsel %vm5904_vm15, %v5783_v17, %v5779_v55 }
 0x40d   : > { %v5940_v45 = vsel %vm5906_vm0, %v5787_v62, %v5939_v43  ;;  %v5469_v46 = vmax.f32 %v4674_v61, %v6226_v1  ;;  %v5471_v15 = vmax.f32 %v4675_v16, %v6228_v47  ;;  %v5556_v22 = vmax.f32 %v5460_v14, %v5468_v52 }
 0x40e   : > { %v4051_v48 = vpop.f32.mrb[40].mxu0  ;;  %v5558_v39 = vmax.f32 %v5462_v49, %v5470_v10  ;;  %v5941_v53 = vsel %vm5908_vm2, %v5791_v38, %v5940_v45  ;;  %v4676_v20 = vcombine.high %v4260_v27, %v4260_v27  ;;  %v6191_v26 = vrot.slane %v10056_v60, 9 }
 0x40f   : > { %v4053_v33 = vpop.f32.mrb[41].mxu0  ;;  %v5557_v34 = vmax.f32 %v5461_v11, %v5469_v46  ;;  %v5559_v4 = vmax.f32 %v5463_v5, %v5471_v15  ;;  %v5795_v63 = vrot.slane %v5556_v22, %v9993_v44  ;;  %v6192_v41 = vrot.slane %v10103_v3, 9 }
 0x410   : > { %v4054_v51 = vpop.f32.mrb[42].mxu0  ;;  %v10149_v54 = vmax.f32 %v10052_v30, %v6189_v0  ;;  %v10154_v50 = vmax.f32 %v10078_v12, %v6190_v40  ;;  %v6193_v57 = vrot.slane %v10093_v58, 9  ;;  %v4539_v13 = vcombine.high %v10111_v25, %v10111_v25 }
 0x411   : > { %v4056_v42 = vpop.f32.mrb[43].mxu0  ;;  %v6194_v14 = vrot.slane %v10115_v8, 9  ;;  %v5799_v24 = vrot.slane %v5557_v34, %v9993_v44  ;;  %v5942_v32 = vsel %vm5910_vm3, %v5795_v63, %v5941_v53  ;;  %v5803_v30 = vrot.slane %v5558_v39, %v9993_v44 }
 0x412   : > { %v4683_v0 = vrot.slane %v4260_v27, %v9979_v35  ;;  %v4690_v56 = vrot.slane %v4676_v20, %v9979_v35  ;;  %v4190_v12 = vmul.f32 %v9961_v31, %v10127_v21  ;;  %v5807_v40 = vrot.slane %v5559_v4, %v9993_v44 }
 0x413   : > { %v5943_v18 = vsel %vm5912_vm4, %v5799_v24, %v5942_v32  ;;  %v4173_v36 = vmul.f32 %v9961_v31, %v4051_v48  ;;  %v4174_v29 = vmul.f32 %v9961_v31, %v4054_v51  ;;  %v10172_v19 = vmax.f32 %v10056_v60, %v6191_v26 }
 0x414   : > { %v6195_v2 = vrot.slane %v10111_v25, 9  ;;  %v5944_v27 = vsel %vm5914_vm5, %v5803_v30, %v5943_v18  ;;  %v4229_v11 = vadd.f32 %v9966_v6, %v4190_v12  ;;  %v10178_v9 = vmax.f32 %v10093_v58, %v6193_v57 }
 0x415   : > { %v5945_v21 = vsel %vm5916_vm6, %v5807_v40, %v5944_v27  ;;  %v4212_v59 = vadd.f32 %v9966_v6, %v4173_v36  ;;  %v4213_v28 = vadd.f32 %v9966_v6, %v4174_v29  ;;  %v10184_v61 = vmax.f32 %v10103_v3, %v6192_v41  ;;  %v4123_v23 = vpop.f32.mrb[24].mxu1 }
 0x416   : > { %v6196_v60 = vrot.slane %v4539_v13, 9  ;;  %5979 = vst.msk [vmem:[%s10021_s12 + $0x20] sm:$0xff] %vm1836_vm1, %v5945_v21  ;;  %v4691_v16 = vcombine.high %v4683_v0, %v4683_v0  ;;  %v4261_v7 = vmax.f32 %v4229_v11, 0.0  ;;  %v10189_v58 = vmax.f32 %v10115_v8, %v6194_v14  ;;  %v4125_v62 = vpop.f32.mrb[25].mxu1 }
 0x417   : > { %v4692_v37 = vcombine.high %v4690_v56, %v4690_v56  ;;  %v4244_v55 = vmax.f32 %v4212_v59, 0.0  ;;  %v4245_v17 = vmax.f32 %v4213_v28, 0.0  ;;  %v10192_v1 = vmax.f32 %v10111_v25, %v6195_v2  ;;  %v4126_v10 = vpop.f32.mrb[26].mxu1 }
 0x418   : > { %v6229_v3 = vrot.slane %v4683_v0, 9  ;;  %4293 = vst.msk [vmem:[%s9976_s20 + $0xa8] sm:$0xff] %vm1836_vm1, %v4261_v7  ;;  %v4693_v47 = vcombine.high %v4261_v7, %v4261_v7  ;;  %v4700_v52 = vrot.slane %v4261_v7, %v9979_v35  ;;  %v4191_v38 = vmul.f32 %v9961_v31, %v4123_v23  ;;  %v4128_v43 = vpop.f32.mrb[27].mxu1 }
 0x419   : > { %4276 = vst.msk [vmem:[%s9976_s20 + $0x20] sm:$0xff] %vm1836_vm1, %v4244_v55  ;;  %v4404_v49 = vcombine.high %v4244_v55, %v4244_v55  ;;  %v4411_v8 = vrot.slane %v4244_v55, %v9979_v35  ;;  %4277 = vst.msk [vmem:[%s9976_s20 + $0x28] sm:$0xff] %vm1836_vm1, %v4245_v17  ;;  %v4421_v5 = vcombine.high %v4245_v17, %v4245_v17  ;;  %v6230_v25 = vrot.slane %v4691_v16, 9 }
 0x41a   : > { %v4707_v45 = vrot.slane %v4693_v47, %v9979_v35  ;;  %v4708_v46 = vcombine.high %v4700_v52, %v4700_v52  ;;  %v4428_v15 = vrot.slane %v4245_v17, %v9979_v35  ;;  %v6231_v22 = vrot.slane %v4690_v56, 9 }
 0x41b   : > { %v6232_v48 = vrot.slane %v4692_v37, 9  ;;  %v4418_v39 = vrot.slane %v4404_v49, %v9979_v35  ;;  %v4419_v53 = vcombine.high %v4411_v8, %v4411_v8  ;;  %v10206_v20 = vmax.f32 %v4539_v13, %v6196_v60 }
 0x41c   : > { %v4709_v33 = vcombine.high %v4707_v45, %v4707_v45  ;;  %v6233_v26 = vrot.slane %v4700_v52, 9  ;;  %v10209_v34 = vrot.slane %v4421_v5, %v9979_v35  ;;  %v6234_v4 = vrot.slane %v4708_v46, 9 }
 0x41d   : > { %v4420_v63 = vcombine.high %v4418_v39, %v4418_v39  ;;  %v6165_v51 = vrot.slane %v4411_v8, 9  ;;  %v4230_v41 = vadd.f32 %v9966_v6, %v4191_v38  ;;  %v10212_v57 = vmax.f32 %v4683_v0, %v6229_v3 }
 0x41e   : > { %v6235_v42 = vrot.slane %v4707_v45, 9  ;;  %v6166_v14 = vrot.slane %v4419_v53, 9  ;;  %v4436_v24 = vcombine.high %v4428_v15, %v4428_v15  ;;  %v10214_v32 = vmax.f32 %v4691_v16, %v6230_v25 }
 0x41f   : > { %v10216_v30 = vmax.f32 %v4690_v56, %v6231_v22  ;;  %v10218_v13 = vmax.f32 %v4692_v37, %v6232_v48  ;;  %v6167_v12 = vrot.slane %v4418_v39, 9  ;;  %v6236_v40 = vrot.slane %v4709_v33, 9 }
 0x420   : > { %v10220_v18 = vmax.f32 %v4700_v52, %v6233_v26  ;;  %v6168_v36 = vrot.slane %v4420_v63, 9  ;;  %v10224_v29 = vcombine.high %v10209_v34, %v10209_v34  ;;  %v10226_v0 = vmax.f32 %v4708_v46, %v6234_v4 }
 0x421   : > { %v10228_v2 = vmax.f32 %v4411_v8, %v6165_v51  ;;  %v4262_v27 = vmax.f32 %v4230_v41, 0.0  ;;  %v4192_v56 = vmul.f32 %v9961_v31, %v4126_v10  ;;  %v10231_v11 = vmax.f32 %v4707_v45, %v6235_v42 }
 0x422   : > { %v10233_v21 = vmax.f32 %v4419_v53, %v6166_v14  ;;  %v6169_v59 = vrot.slane %v4428_v15, 9  ;;  %v6170_v28 = vrot.slane %v4436_v24, 9  ;;  %v10235_v60 = vmax.f32 %v4418_v39, %v6167_v12 }
 0x423   : > { %4294 = vst.msk [vmem:[%s9976_s20 + $0xb0] sm:$0xff] %vm1836_vm1, %v4262_v27  ;;  %v4710_v16 = vcombine.high %v4262_v27, %v4262_v27  ;;  %v4717_v7 = vrot.slane %v4262_v27, %v9979_v35  ;;  %v4231_v23 = vadd.f32 %v9966_v6, %v4192_v56  ;;  %v10241_v37 = vmax.f32 %v4709_v33, %v6236_v40  ;;  %v4131_v3 = vpop.f32.mrb[28].mxu1 }
 0x424   : > { %v10243_v55 = vmax.f32 %v4420_v63, %v6168_v36  ;;  %v6171_v17 = vrot.slane %v10209_v34, 9  ;;  %v6172_v62 = vrot.slane %v10224_v29, 9  ;;  %v4133_v8 = vpop.f32.mrb[29].mxu1  ;;  %v10248_v38 = vmax.f32 %v4428_v15, %v6169_v59 }
 0x425   : > { %v4724_v47 = vrot.slane %v4710_v16, %v9979_v35  ;;  %v4725_v52 = vcombine.high %v4717_v7, %v4717_v7  ;;  %v6237_v10 = vrot.slane %v4717_v7, 9  ;;  %v4263_v49 = vmax.f32 %v4231_v23, 0.0  ;;  %v10254_v46 = vpop.f32.mrb[30].mxu1 }
 0x426   : > { %v4059_v5 = vpop.f32.mrb[44].mxu0  ;;  %v10250_v43 = vmax.f32 %v4436_v24, %v6170_v28  ;;  %v4193_v25 = vmul.f32 %v9961_v31, %v4131_v3  ;;  %v4136_v26 = vpop.f32.mrb[31].mxu1 }
 0x427   : > { %v4175_v45 = vmul.f32 %v9961_v31, %v4059_v5  ;;  %v4061_v22 = vpop.f32.mrb[45].mxu0  ;;  %v4726_v48 = vcombine.high %v4724_v47, %v4724_v47  ;;  %v6238_v39 = vrot.slane %v4725_v52, 9  ;;  %v6239_v53 = vrot.slane %v4724_v47, 9  ;;  %4295 = vst.msk [vmem:[%s9976_s20 + $0xb8] sm:$0xff] %vm1836_vm1, %v4263_v49 }
 0x428   : > { %v5480_v33 = vmax.f32 %v4717_v7, %v6237_v10  ;;  %v10258_v4 = vpop.f32.mrb[46].mxu0  ;;  %v4727_v15 = vcombine.high %v4263_v49, %v4263_v49  ;;  %v4734_v63 = vrot.slane %v4263_v49, %v9979_v35  ;;  %v4232_v51 = vadd.f32 %v9966_v6, %v4193_v25 }
 0x429   : > { %v4214_v41 = vadd.f32 %v9966_v6, %v4175_v45  ;;  %v4064_v31 = vpop.f32.mrb[47].mxu0  ;;  %v6240_v42 = vrot.slane %v4726_v48, 9  ;;  %v5481_v14 = vmax.f32 %v4725_v52, %v6238_v39  ;;  %v5482_v24 = vmax.f32 %v4724_v47, %v6239_v53 }
 0x42a   : > { %v5560_v12 = vmax.f32 %v10212_v57, %v5480_v33  ;;  %v4741_v40 = vrot.slane %v4727_v15, %v9979_v35  ;;  %v4742_v36 = vcombine.high %v4734_v63, %v4734_v63  ;;  %v6241_v27 = vrot.slane %v4734_v63, 9 }
 0x42b   : > { %v4264_v56 = vmax.f32 %v4232_v51, 0.0  ;;  %v5483_v59 = vmax.f32 %v4726_v48, %v6240_v42  ;;  %v5561_v28 = vmax.f32 %v10214_v32, %v5481_v14  ;;  %v5562_v16 = vmax.f32 %v10216_v30, %v5482_v24 }
 0x42c   : > { %v5811_v7 = vrot.slane %v5560_v12, %v9993_v44  ;;  %v4743_v6 = vcombine.high %v4741_v40, %v4741_v40  ;;  %v6242_v23 = vrot.slane %v4742_v36, 9  ;;  %v6243_v3 = vrot.slane %v4741_v40, 9 }
 0x42d   : > { %v5484_v10 = vmax.f32 %v4734_v63, %v6241_v27  ;;  %4296 = vst.msk [vmem:[%s9976_s20 + $0xc0] sm:$0xff] %vm1836_vm1, %v4264_v56  ;;  %v5563_v57 = vmax.f32 %v10218_v13, %v5483_v59  ;;  %v5815_v47 = vrot.slane %v5561_v28, %v9993_v44  ;;  %v5819_v52 = vrot.slane %v5562_v16, %v9993_v44 }
 0x42e   : > { %v4744_v49 = vcombine.high %v4264_v56, %v4264_v56  ;;  %v6244_v8 = vrot.slane %v4743_v6, 9  ;;  %v5485_v5 = vmax.f32 %v4742_v36, %v6242_v23  ;;  %v5486_v32 = vmax.f32 %v4741_v40, %v6243_v3 }
 0x42f   : > { %v5564_v30 = vmax.f32 %v10220_v18, %v5484_v10  ;;  %v5823_v25 = vrot.slane %v5563_v57, %v9993_v44  ;;  %v5946_v45 = vsel %vm5904_vm15, %v5815_v47, %v5811_v7  ;;  %v4751_v22 = vrot.slane %v4264_v56, %v9979_v35 }
 0x430   : > { %v4758_v48 = vrot.slane %v4744_v49, %v9979_v35  ;;  %v5947_v13 = vsel %vm5906_vm0, %v5819_v52, %v5946_v45  ;;  %v5487_v39 = vmax.f32 %v4743_v6, %v6244_v8  ;;  %v5565_v53 = vmax.f32 %v10226_v0, %v5485_v5 }
 0x431   : > { %v5566_v33 = vmax.f32 %v10231_v11, %v5486_v32  ;;  %v5827_v26 = vrot.slane %v5564_v30, %v9993_v44  ;;  %v5948_v15 = vsel %vm5908_vm2, %v5823_v25, %v5947_v13  ;;  %v4759_v18 = vcombine.high %v4751_v22, %v4751_v22  ;;  %v4139_v24 = vpop.f32.mrb[32].mxu1  ;;  %v10327_v32 = vld [vmem:[%s10561_s6] ss:$0 sm:$0xff] }
 0x432   : > { %v4760_v63 = vcombine.high %v4758_v48, %v4758_v48  ;;  %v10286_v51 = vmax.f32 %v10209_v34, %v6171_v17  ;;  %v5567_v31 = vmax.f32 %v10241_v37, %v5487_v39  ;;  %v5831_v42 = vrot.slane %v5565_v53, %v9993_v44  ;;  %v4141_v36 = vpop.f32.mrb[33].mxu1 }
 0x433   : > { %v6245_v14 = vrot.slane %v4751_v22, 9  ;;  %v5835_v0 = vrot.slane %v5566_v33, %v9993_v44  ;;  %v5949_v11 = vsel %vm5910_vm3, %v5827_v26, %v5948_v15  ;;  %v6246_v12 = vrot.slane %v4759_v18, 9  ;;  %v4142_v56 = vpop.f32.mrb[34].mxu1 }
 0x434   : > { %v6247_v40 = vrot.slane %v4758_v48, 9  ;;  %v10295_v27 = vmax.f32 %v10224_v29, %v6172_v62  ;;  %v5839_v34 = vrot.slane %v5567_v31, %v9993_v44  ;;  %v5950_v37 = vsel %vm5912_vm4, %v5831_v42, %v5949_v11  ;;  %v4144_v6 = vpop.f32.mrb[35].mxu1 }
 0x435   : > { %v4246_v17 = vmax.f32 %v4214_v41, 0.0  ;;  %v5951_v59 = vsel %vm5914_vm5, %v5835_v0, %v5950_v37  ;;  %v6248_v28 = vrot.slane %v4760_v63, 9  ;;  %v10300_v16 = vmax.f32 %v4751_v22, %v6245_v14  ;;  %v10311_v41 = vld [vmem:[%s10560_s5] ss:$0 sm:$0xff] }
 0x436   : > { %v10302_v7 = vmax.f32 %v4759_v18, %v6246_v12  ;;  %v5952_v23 = vsel %vm5916_vm6, %v5839_v34, %v5951_v59  ;;  %v4194_v3 = vmul.f32 %v10311_v41, %v10254_v46  ;;  %v10317_v10 = vmax.f32 %v4758_v48, %v6247_v40 }
 0x437   : > { %4278 = vst.msk [vmem:[%s9976_s20 + $0x30] sm:$0xff] %vm1836_vm1, %v4246_v17  ;;  %v4438_v29 = vcombine.high %v4246_v17, %v4246_v17  ;;  %v4445_v62 = vrot.slane %v4246_v17, %v9979_v35  ;;  %5980 = vst.msk [vmem:[%s10021_s12 + $0x28] sm:$0xff] %vm1836_vm1, %v5952_v23  ;;  %v4176_v57 = vmul.f32 %v10311_v41, %v10258_v4 }
 0x438   : > { %v4195_v47 = vmul.f32 %v10311_v41, %v4139_v24  ;;  %v4196_v52 = vmul.f32 %v10311_v41, %v4142_v56  ;;  %v4233_v46 = vadd.f32 %v10327_v32, %v4194_v3  ;;  %v10330_v30 = vmax.f32 %v4760_v63, %v6248_v28 }
 0x439   : > { %v4452_v49 = vrot.slane %v4438_v29, %v9979_v35  ;;  %v4453_v8 = vcombine.high %v4445_v62, %v4445_v62  ;;  %v6173_v5 = vrot.slane %v4445_v62, 9  ;;  %v4215_v4 = vadd.f32 %v10327_v32, %v4176_v57 }
 0x43a   : > { %v4234_v25 = vadd.f32 %v10327_v32, %v4195_v47  ;;  %v4235_v45 = vadd.f32 %v10327_v32, %v4196_v52  ;;  %v4265_v53 = vmax.f32 %v4233_v46, 0.0 }
 0x43b   : > { %v4454_v22 = vcombine.high %v4452_v49, %v4452_v49  ;;  %v6174_v48 = vrot.slane %v4453_v8, 9  ;;  %v6175_v13 = vrot.slane %v4452_v49, 9  ;;  %v5416_v39 = vmax.f32 %v4445_v62, %v6173_v5 }
 0x43c   : > { %v4247_v33 = vmax.f32 %v4215_v4, 0.0  ;;  %v4266_v26 = vmax.f32 %v4234_v25, 0.0  ;;  %v10335_v15 = vmax.f32 %v4235_v45, 0.0  ;;  %4297 = vst.msk [vmem:[%s9976_s20 + $0xc8] sm:$0xff] %vm1836_vm1, %v4265_v53  ;;  %v4761_v14 = vcombine.high %v4265_v53, %v4265_v53 }
 0x43d   : > { %v6176_v18 = vrot.slane %v4454_v22, 9  ;;  %v5417_v63 = vmax.f32 %v4453_v8, %v6174_v48  ;;  %v5418_v31 = vmax.f32 %v4452_v49, %v6175_v13  ;;  %v5528_v42 = vmax.f32 %v10228_v2, %v5416_v39 }
 0x43e   : > { %v4768_v24 = vrot.slane %v4265_v53, %v9979_v35  ;;  %4279 = vst.msk [vmem:[%s9976_s20 + $0x38] sm:$0xff] %vm1836_vm1, %v4247_v33  ;;  %v4455_v0 = vcombine.high %v4247_v33, %v4247_v33  ;;  %v4462_v11 = vrot.slane %v4247_v33, %v9979_v35  ;;  %4298 = vst.msk [vmem:[%s9976_s20 + $0xd0] sm:$0xff] %vm1836_vm1, %v4266_v26  ;;  %v10349_v12 = vpop.f32.mrb[48].mxu0 }
 0x43f   : > { %4299 = vst.msk [vmem:[%s9976_s20 + $0xd8] sm:$0xff] %vm1836_vm1, %v10335_v15  ;;  %v5419_v40 = vmax.f32 %v4454_v22, %v6176_v18  ;;  %v5529_v2 = vmax.f32 %v10233_v21, %v5417_v63  ;;  %v5530_v36 = vmax.f32 %v10235_v60, %v5418_v31  ;;  %v5683_v34 = vrot.slane %v5528_v42, %v9993_v44  ;;  %v4069_v37 = vpop.f32.mrb[49].mxu0 }
 0x440   : > { %v4775_v17 = vrot.slane %v4761_v14, %v9979_v35  ;;  %v4776_v56 = vcombine.high %v4768_v24, %v4768_v24  ;;  %v6249_v59 = vrot.slane %v4768_v24, 9  ;;  %v4469_v28 = vrot.slane %v4455_v0, %v9979_v35  ;;  %v10356_v6 = vpop.f32.mrb[50].mxu0 }
 0x441   : > { %v5531_v23 = vmax.f32 %v10243_v55, %v5419_v40  ;;  %v5687_v29 = vrot.slane %v5529_v2, %v9993_v44  ;;  %v5691_v62 = vrot.slane %v5530_v36, %v9993_v44  ;;  %v4470_v21 = vcombine.high %v4462_v11, %v4462_v11  ;;  %v4072_v3 = vpop.f32.mrb[51].mxu0 }
 0x442   : > { %v4777_v60 = vcombine.high %v4775_v17, %v4775_v17  ;;  %v6250_v57 = vrot.slane %v4776_v56, 9  ;;  %v6251_v47 = vrot.slane %v4775_v17, 9  ;;  %v10361_v52 = vmax.f32 %v4768_v24, %v6249_v59 }
 0x443   : > { %v5695_v49 = vrot.slane %v5531_v23, %v9993_v44  ;;  %v5918_v8 = vsel %vm5904_vm15, %v5687_v29, %v5683_v34  ;;  %v4471_v5 = vcombine.high %v4469_v28, %v4469_v28  ;;  %v6177_v46 = vrot.slane %v4462_v11, 9 }
 0x444   : > { %v5919_v4 = vsel %vm5906_vm0, %v5691_v62, %v5918_v8  ;;  %v6252_v55 = vrot.slane %v4777_v60, 9  ;;  %v10366_v25 = vmax.f32 %v4776_v56, %v6250_v57  ;;  %v10368_v45 = vmax.f32 %v4775_v17, %v6251_v47 }
 0x445   : > { %v6178_v22 = vrot.slane %v4470_v21, 9  ;;  %v6179_v48 = vrot.slane %v4469_v28, 9  ;;  %v6180_v13 = vrot.slane %v4471_v5, 9  ;;  %v5420_v39 = vmax.f32 %v4462_v11, %v6177_v46 }
 0x446   : > { %v10370_v53 = vmax.f32 %v4777_v60, %v6252_v55  ;;  %v5920_v33 = vsel %vm5908_vm2, %v5695_v49, %v5919_v4  ;;  %v4778_v18 = vcombine.high %v4266_v26, %v4266_v26  ;;  %v4785_v63 = vrot.slane %v4266_v26, %v9979_v35 }
 0x447   : > { %v5421_v31 = vmax.f32 %v4470_v21, %v6178_v22  ;;  %v5422_v42 = vmax.f32 %v4469_v28, %v6179_v48  ;;  %v5423_v14 = vmax.f32 %v4471_v5, %v6180_v13  ;;  %v5532_v24 = vmax.f32 %v10248_v38, %v5420_v39 }
 0x448   : > { %v4792_v0 = vrot.slane %v4778_v18, %v9979_v35  ;;  %v4793_v40 = vcombine.high %v4785_v63, %v4785_v63  ;;  %v6253_v2 = vrot.slane %v4785_v63, 9  ;;  %v4795_v36 = vcombine.high %v10335_v15, %v10335_v15 }
 0x449   : > { %v5533_v11 = vmax.f32 %v10250_v43, %v5421_v31  ;;  %v5534_v34 = vmax.f32 %v10286_v51, %v5422_v42  ;;  %v5535_v37 = vmax.f32 %v10295_v27, %v5423_v14  ;;  %v5699_v26 = vrot.slane %v5532_v24, %v9993_v44  ;;  %v4147_v21 = vpop.f32.mrb[36].mxu1 }
 0x44a   : > { %v4794_v17 = vcombine.high %v4792_v0, %v4792_v0  ;;  %v6254_v56 = vrot.slane %v4793_v40, 9  ;;  %v6255_v59 = vrot.slane %v4792_v0, 9  ;;  %v5496_v28 = vmax.f32 %v4785_v63, %v6253_v2  ;;  %v4149_v60 = vpop.f32.mrb[37].mxu1 }
 0x44b   : > { %v5703_v38 = vrot.slane %v5533_v11, %v9993_v44  ;;  %v5707_v23 = vrot.slane %v5534_v34, %v9993_v44  ;;  %v5711_v29 = vrot.slane %v5535_v37, %v9993_v44  ;;  %v5921_v62 = vsel %vm5910_vm3, %v5699_v26, %v5920_v33  ;;  %v10393_v5 = vpop.f32.mrb[38].mxu1 }
 0x44c   : > { %v6256_v43 = vrot.slane %v4794_v17, 9  ;;  %v5497_v3 = vmax.f32 %v4793_v40, %v6254_v56  ;;  %v5498_v51 = vmax.f32 %v4792_v0, %v6255_v59  ;;  %v5568_v27 = vmax.f32 %v10300_v16, %v5496_v28  ;;  %v4152_v22 = vpop.f32.mrb[39].mxu1 }
 0x44d   : > { %v5922_v57 = vsel %vm5912_vm4, %v5703_v38, %v5921_v62  ;;  %v4802_v47 = vrot.slane %v10335_v15, %v9979_v35  ;;  %v4809_v49 = vrot.slane %v4795_v36, %v9979_v35  ;;  %v4177_v8 = vmul.f32 %v10311_v41, %v10349_v12 }
 0x44e   : > { %v5923_v46 = vsel %vm5914_vm5, %v5707_v23, %v5922_v57  ;;  %v5499_v4 = vmax.f32 %v4794_v17, %v6256_v43  ;;  %v5569_v55 = vmax.f32 %v10302_v7, %v5497_v3  ;;  %v5570_v16 = vmax.f32 %v10317_v10, %v5498_v51 }
 0x44f   : > { %v5924_v48 = vsel %vm5916_vm6, %v5711_v29, %v5923_v46  ;;  %v5843_v13 = vrot.slane %v5568_v27, %v9993_v44  ;;  %v4810_v15 = vcombine.high %v4802_v47, %v4802_v47  ;;  %v4811_v39 = vcombine.high %v4809_v49, %v4809_v49 }
 0x450   : > { %5976 = vst.msk [vmem:[%s10021_s12 + $0x8] sm:$0xff] %vm1836_vm1, %v5924_v48  ;;  %v5571_v12 = vmax.f32 %v10330_v30, %v5499_v4  ;;  %v5847_v33 = vrot.slane %v5569_v55, %v9993_v44  ;;  %v5851_v18 = vrot.slane %v5570_v16, %v9993_v44  ;;  %v6257_v63 = vrot.slane %v4802_v47, 9 }
 0x451   : > { %v6258_v31 = vrot.slane %v4810_v15, 9  ;;  %v6259_v7 = vrot.slane %v4809_v49, 9  ;;  %v6260_v42 = vrot.slane %v4811_v39, 9  ;;  %v4216_v10 = vadd.f32 %v10327_v32, %v4177_v8 }
 0x452   : > { %v5855_v14 = vrot.slane %v5571_v12, %v9993_v44  ;;  %v5953_v24 = vsel %vm5904_vm15, %v5847_v33, %v5843_v13  ;;  %v5500_v0 = vmax.f32 %v4802_v47, %v6257_v63  ;;  %v4178_v40 = vmul.f32 %v10311_v41, %v10356_v6 }
 0x453   : > { %v5954_v30 = vsel %vm5906_vm0, %v5851_v18, %v5953_v24  ;;  %v5501_v2 = vmax.f32 %v4810_v15, %v6258_v31  ;;  %v5502_v36 = vmax.f32 %v4809_v49, %v6259_v7  ;;  %v5503_v11 = vmax.f32 %v4811_v39, %v6260_v42 }
 0x454   : > { %v5572_v34 = vmax.f32 %v10361_v52, %v5500_v0  ;;  %v5955_v37 = vsel %vm5908_vm2, %v5855_v14, %v5954_v30  ;;  %v4248_v26 = vmax.f32 %v4216_v10, 0.0  ;;  %v4217_v17 = vadd.f32 %v10327_v32, %v4178_v40 }
 0x455   : > { %v5573_v56 = vmax.f32 %v10366_v25, %v5501_v2  ;;  %v5574_v59 = vmax.f32 %v10368_v45, %v5502_v36  ;;  %v5575_v28 = vmax.f32 %v10370_v53, %v5503_v11  ;;  %v4197_v6 = vmul.f32 %v10311_v41, %v4147_v21 }
 0x456   : > { %v5859_v38 = vrot.slane %v5572_v34, %v9993_v44  ;;  %4280 = vst.msk [vmem:[%s9976_s20 + $0x40] sm:$0xff] %vm1836_vm1, %v4248_v26  ;;  %v4472_v23 = vcombine.high %v4248_v26, %v4248_v26  ;;  %v4479_v52 = vrot.slane %v4248_v26, %v9979_v35  ;;  %v4249_v29 = vmax.f32 %v4217_v17, 0.0 }
 0x457   : > { %v5863_v62 = vrot.slane %v5573_v56, %v9993_v44  ;;  %v5867_v43 = vrot.slane %v5574_v59, %v9993_v44  ;;  %v5871_v25 = vrot.slane %v5575_v28, %v9993_v44  ;;  %v4236_v45 = vadd.f32 %v10327_v32, %v4197_v6 }
 0x458   : > { %v5956_v53 = vsel %vm5910_vm3, %v5859_v38, %v5955_v37  ;;  %v4486_v21 = vrot.slane %v4472_v23, %v9979_v35  ;;  %v4487_v3 = vcombine.high %v4479_v52, %v4479_v52  ;;  %v6181_v51 = vrot.slane %v4479_v52, 9  ;;  %4281 = vst.msk [vmem:[%s9976_s20 + $0x48] sm:$0xff] %vm1836_vm1, %v4249_v29 }
 0x459   : > { %v5957_v27 = vsel %vm5912_vm4, %v5863_v62, %v5956_v53  ;;  %v4489_v60 = vcombine.high %v4249_v29, %v4249_v29  ;;  %v4496_v57 = vrot.slane %v4249_v29, %v9979_v35  ;;  %v4268_v47 = vmax.f32 %v4236_v45, 0.0 }
 0x45a   : > { %v5958_v49 = vsel %vm5914_vm5, %v5867_v43, %v5957_v27  ;;  %v4488_v8 = vcombine.high %v4486_v21, %v4486_v21  ;;  %v6182_v46 = vrot.slane %v4487_v3, 9  ;;  %v6183_v4 = vrot.slane %v4486_v21, 9 }
 0x45b   : > { %v5959_v55 = vsel %vm5916_vm6, %v5871_v25, %v5958_v49  ;;  %v5424_v16 = vmax.f32 %v4479_v52, %v6181_v51  ;;  %v4503_v22 = vrot.slane %v4489_v60, %v9979_v35  ;;  %v4504_v48 = vcombine.high %v4496_v57, %v4496_v57  ;;  %4300 = vst.msk [vmem:[%s9976_s20 + $0xe0] sm:$0xff] %vm1836_vm1, %v4268_v47 }
 0x45c   : > { %5981 = vst.msk [vmem:[%s10021_s12 + $0x30] sm:$0xff] %vm1836_vm1, %v5959_v55  ;;  %v6184_v13 = vrot.slane %v4488_v8, 9  ;;  %v5425_v15 = vmax.f32 %v4487_v3, %v6182_v46  ;;  %v5426_v39 = vmax.f32 %v4486_v21, %v6183_v4  ;;  %v6185_v12 = vrot.slane %v4496_v57, 9 }
 0x45d   : > { %v5536_v33 = vmax.f32 %v5424_v16, %v10149_v54  ;;  %v4505_v18 = vcombine.high %v4503_v22, %v4503_v22  ;;  %v6186_v63 = vrot.slane %v4504_v48, 9  ;;  %v6187_v31 = vrot.slane %v4503_v22, 9 }
 0x45e   : > { %v5427_v7 = vmax.f32 %v4488_v8, %v6184_v13  ;;  %v5537_v42 = vmax.f32 %v5425_v15, %v10154_v50  ;;  %v5538_v10 = vmax.f32 %v5426_v39, %v10172_v19  ;;  %v5428_v14 = vmax.f32 %v4496_v57, %v6185_v12 }
 0x45f   : > { %v5715_v24 = vrot.slane %v5536_v33, %v9993_v44  ;;  %v6188_v0 = vrot.slane %v4505_v18, 9  ;;  %v5429_v40 = vmax.f32 %v4504_v48, %v6186_v63  ;;  %v5430_v30 = vmax.f32 %v4503_v22, %v6187_v31 }
 0x460   : > { %v5539_v2 = vmax.f32 %v5427_v7, %v10184_v61  ;;  %v5719_v36 = vrot.slane %v5537_v42, %v9993_v44  ;;  %v5723_v54 = vrot.slane %v5538_v10, %v9993_v44  ;;  %v5540_v11 = vmax.f32 %v5428_v14, %v10178_v9 }
 0x461   : > { %v5431_v34 = vmax.f32 %v4505_v18, %v6188_v0  ;;  %v5541_v37 = vmax.f32 %v5429_v40, %v10189_v58  ;;  %v5542_v50 = vmax.f32 %v5430_v30, %v10192_v1  ;;  %v4812_v19 = vcombine.high %v4268_v47, %v4268_v47  ;;  %v4155_v6 = vpop.f32.mrb[40].mxu1 }
 0x462   : > { %v5727_v26 = vrot.slane %v5539_v2, %v9993_v44  ;;  %v5925_v17 = vsel %vm5904_vm15, %v5719_v36, %v5715_v24  ;;  %v4819_v56 = vrot.slane %v4268_v47, %v9979_v35  ;;  %v5731_v28 = vrot.slane %v5540_v11, %v9993_v44  ;;  %v4157_v38 = vpop.f32.mrb[41].mxu1 }
 0x463   : > { %v5926_v61 = vsel %vm5906_vm0, %v5723_v54, %v5925_v17  ;;  %v5543_v59 = vmax.f32 %v5431_v34, %v10206_v20  ;;  %v5735_v9 = vrot.slane %v5541_v37, %v9993_v44  ;;  %v5739_v58 = vrot.slane %v5542_v50, %v9993_v44  ;;  %v4158_v62 = vpop.f32.mrb[42].mxu1 }
 0x464   : > { %v5927_v1 = vsel %vm5908_vm2, %v5727_v26, %v5926_v61  ;;  %v4826_v52 = vrot.slane %v4812_v19, %v9979_v35  ;;  %v4198_v29 = vmul.f32 %v10311_v41, %v10393_v5  ;;  %v4199_v20 = vmul.f32 %v10311_v41, %v4155_v6  ;;  %v4160_v53 = vpop.f32.mrb[43].mxu1 }
 0x465   : > { %v5928_v23 = vsel %vm5910_vm3, %v5731_v28, %v5927_v1  ;;  %v5743_v43 = vrot.slane %v5543_v59, %v9993_v44  ;;  %v4827_v45 = vcombine.high %v4819_v56, %v4819_v56  ;;  %v4200_v47 = vmul.f32 %v10311_v41, %v4158_v62 }
 0x466   : > { %v5929_v25 = vsel %vm5912_vm4, %v5735_v9, %v5928_v23  ;;  %v4237_v3 = vadd.f32 %v10327_v32, %v4198_v29  ;;  %v4238_v51 = vadd.f32 %v10327_v32, %v4199_v20  ;;  %v4828_v5 = vcombine.high %v4826_v52, %v4826_v52 }
 0x467   : > { %v5930_v21 = vsel %vm5914_vm5, %v5739_v58, %v5929_v25  ;;  %v6261_v49 = vrot.slane %v4819_v56, 9  ;;  %v6262_v8 = vrot.slane %v4827_v45, 9  ;;  %v6263_v22 = vrot.slane %v4826_v52, 9 }
 0x468   : > { %v5931_v27 = vsel %vm5916_vm6, %v5743_v43, %v5930_v21  ;;  %v4269_v60 = vmax.f32 %v4237_v3, 0.0  ;;  %v4270_v57 = vmax.f32 %v4238_v51, 0.0  ;;  %v4239_v48 = vadd.f32 %v10327_v32, %v4200_v47 }
 0x469   : > { %5977 = vst.msk [vmem:[%s10021_s12 + $0x10] sm:$0xff] %vm1836_vm1, %v5931_v27  ;;  %v6264_v13 = vrot.slane %v4828_v5, 9  ;;  %v5504_v12 = vmax.f32 %v4819_v56, %v6261_v49  ;;  %v5505_v31 = vmax.f32 %v4827_v45, %v6262_v8  ;;  %v5506_v32 = vmax.f32 %v4826_v52, %v6263_v22 }
 0x46a   : > { %4301 = vst.msk [vmem:[%s9976_s20 + $0xe8] sm:$0xff] %vm1836_vm1, %v4269_v60  ;;  %v4829_v46 = vcombine.high %v4269_v60, %v4269_v60  ;;  %v4836_v4 = vrot.slane %v4269_v60, %v9979_v35  ;;  %4302 = vst.msk [vmem:[%s9976_s20 + $0xf0] sm:$0xff] %vm1836_vm1, %v4270_v57  ;;  %v4846_v55 = vcombine.high %v4270_v57, %v4270_v57  ;;  %v4271_v63 = vmax.f32 %v4239_v48, 0.0 }
 0x46b   : > { %v4853_v16 = vrot.slane %v4270_v57, %v9979_v35  ;;  %v5507_v30 = vmax.f32 %v4828_v5, %v6264_v13 }
 0x46c   : > { %v4843_v15 = vrot.slane %v4829_v46, %v9979_v35  ;;  %v4844_v41 = vcombine.high %v4836_v4, %v4836_v4  ;;  %v4860_v39 = vrot.slane %v4846_v55, %v9979_v35  ;;  %v6265_v42 = vrot.slane %v4836_v4, 9  ;;  %4303 = vst.msk [vmem:[%s9976_s20 + $0xf8] sm:$0xff] %vm1836_vm1, %v4271_v63  ;;  %s7647_s20 = scalar_lea.vmem %s10506_s26, 1024 }
 0x46d   : > { %v4861_v33 = vcombine.high %v4853_v16, %v4853_v16  ;;  %v6269_v18 = vrot.slane %v4853_v16, 9  ;;  %v4863_v36 = vcombine.high %v4271_v63, %v4271_v63  ;;  %v4870_v26 = vrot.slane %v4271_v63, %v9979_v35  ;;  %p7648_p11 = scmp.ne.s32.totalorder %s10506_s26, %s7647_s20  ;;  %p7655_p1 = scmp.lt.s32.totalorder %s7653_s22, %s7647_s20 }
 0x46e   : > { %v4845_v7 = vcombine.high %v4843_v15, %v4843_v15  ;;  %v6266_v10 = vrot.slane %v4844_v41, 9  ;;  %v4862_v14 = vcombine.high %v4860_v39, %v4860_v39  ;;  %v6271_v0 = vrot.slane %v4860_v39, 9 }
 0x46f   : > { %v6270_v24 = vrot.slane %v4861_v33, 9  ;;  %v5512_v40 = vmax.f32 %v4853_v16, %v6269_v18  ;;  %v6267_v2 = vrot.slane %v4843_v15, 9  ;;  %v5508_v19 = vmax.f32 %v4836_v4, %v6265_v42  ;;  %p7649_p12 = pnand %p7648_p11, %p7812_p5  ;;  %p7656_p2 = por %p7655_p1, %p7654_p0 }
 0x470   : > { %v6272_v54 = vrot.slane %v4862_v14, 9  ;;  %v5514_v34 = vmax.f32 %v4860_v39, %v6271_v0  ;;  %v6268_v50 = vrot.slane %v4845_v7, 9  ;;  %v4877_v17 = vrot.slane %v4863_v36, %v9979_v35 }
 0x471   : > { %v5513_v11 = vmax.f32 %v4861_v33, %v6270_v24  ;;  %v5576_v37 = vmax.f32 %v5504_v12, %v5512_v40  ;;  %v5509_v56 = vmax.f32 %v4844_v41, %v6266_v10  ;;  %v4878_v6 = vcombine.high %v4870_v26, %v4870_v26  ;;  %p7650_p13 = pneg %p7649_p12 }
 0x472   : > { %v5515_v61 = vmax.f32 %v4862_v14, %v6272_v54  ;;  %v5578_v28 = vmax.f32 %v5506_v32, %v5514_v34  ;;  %v4879_v9 = vcombine.high %v4877_v17, %v4877_v17  ;;  %v6273_v58 = vrot.slane %v4870_v26, 9 }
 0x473   : > { %v5577_v59 = vmax.f32 %v5505_v31, %v5513_v11  ;;  %v6275_v1 = vrot.slane %v4877_v17, 9  ;;  %v5875_v23 = vrot.slane %v5576_v37, %v9993_v44  ;;  %v6274_v20 = vrot.slane %v4878_v6, 9  ;;  %p7657_p3 = pnand %p7656_p2, %p7650_p13 }
 0x474   : > { %v5579_v38 = vmax.f32 %v5507_v30, %v5515_v61  ;;  %v5883_v29 = vrot.slane %v5578_v28, %v9993_v44  ;;  %v6276_v62 = vrot.slane %v4879_v9, 9  ;;  %v5516_v43 = vmax.f32 %v4870_v26, %v6273_v58 }
 0x475   : > { %v5879_v52 = vrot.slane %v5577_v59, %v9993_v44  ;;  %v5518_v35 = vmax.f32 %v4877_v17, %v6275_v1  ;;  %v5510_v25 = vmax.f32 %v4843_v15, %v6267_v2  ;;  %v5511_v45 = vmax.f32 %v4845_v7, %v6268_v50 }
 0x476   : > { %v5887_v53 = vrot.slane %v5579_v38, %v9993_v44  ;;  %v5517_v51 = vmax.f32 %v4878_v6, %v6274_v20  ;;  %v5519_v27 = vmax.f32 %v4879_v9, %v6276_v62  ;;  %v5580_v5 = vmax.f32 %v5508_v19, %v5516_v43 }
 0x477   : > { %v5960_v21 = vsel %vm5904_vm15, %v5879_v52, %v5875_v23  ;;  %v5582_v60 = vmax.f32 %v5510_v25, %v5518_v35 }
 0x478   : > { %v5961_v3 = vsel %vm5906_vm0, %v5883_v29, %v5960_v21  ;;  %v5581_v47 = vmax.f32 %v5509_v56, %v5517_v51  ;;  %v5583_v49 = vmax.f32 %v5511_v45, %v5519_v27  ;;  %v5891_v8 = vrot.slane %v5580_v5, %v9993_v44 }
 0x479   : > { %v5962_v57 = vsel %vm5908_vm2, %v5887_v53, %v5961_v3  ;;  %v5899_v55 = vrot.slane %v5582_v60, %v9993_v44 }
 0x47a   : > { %v5895_v46 = vrot.slane %v5581_v47, %v9993_v44  ;;  %v5963_v4 = vsel %vm5910_vm3, %v5891_v8, %v5962_v57  ;;  %v5903_v16 = vrot.slane %v5583_v49, %v9993_v44 }
 0x47c   : > { %v5964_v22 = vsel %vm5912_vm4, %v5895_v46, %v5963_v4 }
 0x47d   : > { %v5965_v48 = vsel %vm5914_vm5, %v5899_v55, %v5964_v22 }
 0x47e   : > { %v5966_v13 = vsel %vm5916_vm6, %v5903_v16, %v5965_v48 }
 0x47f   : > { %5982 = vst.msk [vmem:[%s10021_s12 + $0x38] sm:$0xff] %vm1836_vm1, %v5966_v13 }
 0x480   : > { %7660 = shalt.err (!%p7657_p3)
}
 0x481   : > { %s7661_s17 = scalar_lea.hbm %s10503_s10, 1024  ;;  %s7665_s23 = scalar_lea.hbm %s10562_s7, 2048 }
 0x482   : > { %p7662_p4 = scmp.ne.s32.totalorder %s10503_s10, %s7661_s17  ;;  %p7666_p9 = scmp.lt.u32.totalorder %s10503_s10, %s10562_s7 }
 0x483   : > { %p7667_p10 = scmp.lt.u32.totalorder %s7665_s23, %s7661_s17  ;;  %p7669_p12 = scmp.lt.u32.totalorder %s7661_s17, %s10503_s10 }
 0x484   : > { %p7663_p7 = pnand %p7662_p4, %p7812_p5 }
 0x485   : > { %p7668_p11 = por %p7667_p10, %p7666_p9 }
 0x486   : > { %p7664_p8 = pneg %p7663_p7 }
 0x487   : > { %p7670_p13 = por %p7669_p12, %p7668_p11 }
 0x489   : > { %p7671_p0 = pnand %p7670_p13, %p7664_p8 }
 0x48b   : > { %7674 = shalt.err (!%p7671_p0)
}
 0x48c   : > { %s7728_s21 = smov 128   ;;  %s10643_s20 = smov 8  }
 0x48d   : > { %6361 = dma.vmem_to_hbm [thread:$0]  (%p7812_p5), %s10506_s26, 1024, %s10503_s10, %s10513_s9, %s7728_s21, %s7728_s21, %s10643_s20  }
 0x48e PF: > { %p6367_p1 = scmp.ge.s32.totalorder %s7709_s30, 2  ;;  %s6020_s18 = sand.u32 1, %s7697_s27  }
 0x48f   : > { %s6021_s19 = scalar_lea.sflag [#allocation5], %s6020_s18 }
 0x490   : > { %p6364_p2 = pnand %p6367_p1, %p7816_p6 }
 0x492   : > { %7692 = dma.done.wait (!%p6364_p2), %s6021_s19, 1024  }
 0x493   : > { %7694 = vsyncadd (!%p6364_p2), %s6021_s19, 4294966272  ;;  %p19_p3 = scmp.ge.s32.totalorder %s7799_s11, 4   ;;  %s10644_s27 = smov %s7701_s28 }
 0x494   : > { %s10645_s28 = smov %s7705_s29  ;;  %s10646_s29 = smov %s7810_s14 }
 0x495   : > { %s10647_s30 = smov %s7799_s11  ;;  %21 = sbr.rel (!%p19_p3) target bundleno = 3 (0x3), region = 101 }
 0x49c   :  { %6034 = vsyncpa [#allocation5], 1 }
 0x49d   :  { %6036 = vsyncpa [#allocation5 + $0x1], 1 }

</bundles_post_ra>
